<compile_context>
chip_gen: v5e
topology: v5e:2x2
jax: 0.10.0
libtpu: 0.0.40
codegen_flags: <defaults>
</compile_context>

<pallas_src>
import functools

import jax
import jax.numpy as jnp
from jax import lax
from jax.experimental import pallas as pl
from jax.experimental.pallas import tpu as pltpu

_HIGHEST = jax.lax.Precision.HIGHEST


# --------------------------------------------------------------------------- #
# Kernels
# --------------------------------------------------------------------------- #
def _layernorm(v, gamma, beta, eps=1e-5):
    # one-pass statistics: mean and mean-of-squares
    mu = jnp.mean(v, axis=-1, keepdims=True)
    msq = jnp.mean(v * v, axis=-1, keepdims=True)
    var = jnp.maximum(msq - mu * mu, 0.0)
    return (v - mu) * jax.lax.rsqrt(var + eps) * gamma + beta


def _encoder_kernel(x_ref, wa_ref, w1t_ref, w2t_ref, b1_ref, vec_ref, o_ref,
                    *, h_chunk):
    """Standard path (E >= 128). Weights are resident bf16; activations f32."""
    x = x_ref[...].astype(jnp.float32)

    b_attn = vec_ref[0:1, :]
    g1, be1 = vec_ref[1:2, :], vec_ref[2:3, :]
    b2 = vec_ref[3:4, :]
    g2, be2 = vec_ref[4:5, :], vec_ref[5:6, :]

    # --- self-attention block (seq_len == 1 -> softmax == 1; V/O fused offline) ---
    attn = jnp.dot(x.astype(jnp.bfloat16), wa_ref[...],
                   preferred_element_type=jnp.float32) + b_attn
    y = _layernorm(x + attn, g1, be1)
    yb = y.astype(jnp.bfloat16)

    # --- feed-forward, tiled over H so the [rows, H] relu intermediate stays small ---
    H = w1t_ref.shape[1]
    E = w2t_ref.shape[1]
    rows = x.shape[0]
    n_chunks = H // h_chunk

    def ff_step(c, acc):
        h0 = pl.multiple_of(c * h_chunk, h_chunk)
        h = jnp.dot(yb, w1t_ref[:, pl.ds(h0, h_chunk)],
                    preferred_element_type=jnp.float32)
        h = jnp.maximum(h + b1_ref[:, pl.ds(h0, h_chunk)], 0.0)
        return acc + jnp.dot(h.astype(jnp.bfloat16),
                             w2t_ref[pl.ds(h0, h_chunk), :],
                             preferred_element_type=jnp.float32)

    ff = lax.fori_loop(0, n_chunks, ff_step,
                       jnp.zeros((rows, E), jnp.float32), unroll=True)
    z = _layernorm(y + ff + b2, g2, be2)

    # AdaptiveMaxPool1d(1) over the length-1 sequence axis == identity.
    o_ref[...] = z.astype(o_ref.dtype)


def _packed_kernel(x_ref, wa_ref, w1t_ref, w2t_ref, b1_ref, vec_ref, avg_ref, o_ref):
    """Lane-dense path (E < 128): 128//E sentences per 128-lane row.

    Weights are block-diagonal so each 128-wide matmul applies the original ExE /
    ExH / HxE weights independently to each E-lane segment. LayerNorm statistics
    are computed per segment with a block-diagonal averaging matmul (f32 HIGHEST).
    """
    x = x_ref[...].astype(jnp.float32)

    b_attn = vec_ref[0:1, :]
    g1, be1 = vec_ref[1:2, :], vec_ref[2:3, :]
    b2 = vec_ref[3:4, :]
    g2, be2 = vec_ref[4:5, :], vec_ref[5:6, :]
    avg = avg_ref[...]

    def seg_ln(v, gamma, beta, eps=1e-5):
        mu = jnp.dot(v, avg, precision=_HIGHEST, preferred_element_type=jnp.float32)
        msq = jnp.dot(v * v, avg, precision=_HIGHEST,
                      preferred_element_type=jnp.float32)
        var = jnp.maximum(msq - mu * mu, 0.0)
        return (v - mu) * jax.lax.rsqrt(var + eps) * gamma + beta

    attn = jnp.dot(x.astype(jnp.bfloat16), wa_ref[...],
                   preferred_element_type=jnp.float32) + b_attn
    y = seg_ln(x + attn, g1, be1)

    h = jnp.dot(y.astype(jnp.bfloat16), w1t_ref[...],
                preferred_element_type=jnp.float32) + b1_ref[...]
    h = jnp.maximum(h, 0.0)
    ff = jnp.dot(h.astype(jnp.bfloat16), w2t_ref[...],
                 preferred_element_type=jnp.float32) + b2
    z = seg_ln(y + ff, g2, be2)

    o_ref[...] = z.astype(o_ref.dtype)   # AdaptiveMaxPool1d(1) == identity


# --------------------------------------------------------------------------- #
# Wrapper helpers
# --------------------------------------------------------------------------- #
def _prepare_attention(params):
    # (x Wv^T + bv) Wo^T + bo == x (Wv^T Wo^T) + (bv Wo^T + bo); weights are frozen,
    # so fuse offline at full f32 precision (don't bake bf16 error into the weights).
    wv, wo = params["wv"], params["wo"]
    w_attn = jnp.dot(wv.T, wo.T, precision=_HIGHEST)
    b_attn = jnp.dot(params["bv"], wo.T, precision=_HIGHEST) + params["bo"]
    return w_attn, b_attn


def _pack_vecs(vectors, width):
    slab = jnp.zeros((8, width), jnp.float32)
    for i, v in enumerate(vectors):
        slab = slab.at[i].set(v.astype(jnp.float32))
    return slab


def _block_diag(w, pack):
    a, b = w.shape
    out = jnp.zeros((pack * a, pack * b), w.dtype)
    for i in range(pack):
        out = out.at[i * a:(i + 1) * a, i * b:(i + 1) * b].set(w)
    return out


def _choose_tiling(rows, max_block):
    """Pick (block_rows, num_tiles): block multiple of 8, minimal padded work, and
    an even tile count preferred so v7x's two TensorCores stay balanced under
    dimension_semantics=("parallel",)."""
    rows = max(int(rows), 1)
    best_key, best = None, None
    max_grid = min(-(-rows // 8), 4096)
    for g in range(1, max_grid + 1):
        blk = -(-rows // g)
        blk = -(-blk // 8) * 8
        if blk > max_block:
            continue
        per_core = blk * ((g + 1) // 2)      # work on the busier of 2 TCs
        total = blk * g                      # total (padded) work, single-TC chips
        key = (per_core, total, g)
        if best_key is None or key < best_key:
            best_key, best = key, (blk, g)
    if best is None:
        blk = -(-max_block // 8) * 8
        return blk, -(-rows // blk)
    return best


def _vmem_capacity_bytes():
    try:
        return int(pltpu.get_tpu_info().vmem_capacity_bytes)
    except Exception:
        return 64 << 20        # assume the smallest generation (v7x) if unknown


def _vmem_limit_bytes(vmem_needed):
    if vmem_needed <= (12 << 20):
        return None            # comfortably inside every generation's default limit
    cap = _vmem_capacity_bytes()
    return max(16 << 20, min(int(vmem_needed * 1.4) + (2 << 20), cap - (8 << 20)))


def _call_with_resident_weights(build, args):
    """Weights never change across the grid -> single-buffer them (Buffered(1)).
    Falls back to default double-buffering if this jax lacks pipeline_mode."""
    if not hasattr(pl, "Buffered"):
        return build(None)(*args)
    try:
        return build(pl.Buffered(1))(*args)
    except Exception:
        return build(None)(*args)


# --------------------------------------------------------------------------- #
# Forward wrappers
# --------------------------------------------------------------------------- #
def _forward_standard(x, params, *, max_block, ff_chunk):
    S, E = x.shape
    H = params["w1"].shape[0]                      # dim_feedforward = 4E

    w_attn, b_attn = _prepare_attention(params)
    wa = w_attn.astype(jnp.bfloat16)               # [E, E]
    w1t = params["w1"].T.astype(jnp.bfloat16)      # [E, H]
    w2t = params["w2"].T.astype(jnp.bfloat16)      # [H, E]
    b1 = params["b1"].reshape(1, H).astype(jnp.float32)
    vecs = _pack_vecs([b_attn, params["g1"], params["be1"],
                       params["b2"], params["g2"], params["be2"]], E)

    # feed-forward chunking over H (largest multiple-of-128 divisor <= 1024)
    if ff_chunk is None:
        h_chunk = H
        if H > 1024:
            for c in (1024, 512, 256, 128):
                if H % c == 0:
                    h_chunk = c
                    break
    else:
        h_chunk = int(ff_chunk)
    if H % h_chunk != 0:
        raise ValueError(f"ff_chunk={h_chunk} must divide H={H}")

    block_s, grid_n = _choose_tiling(S, max_block)
    Sp = block_s * grid_n
    if Sp != S:
        x = jnp.pad(x, ((0, Sp - S), (0, 0)))

    tile_map = lambda i: (i, 0)
    const_map = lambda i: (0, 0)

    weight_bytes = 2 * (E * E + 2 * E * H) + 4 * (H + 8 * E)
    # conservative accounting: 2x weights (covers the no-pipeline_mode fallback),
    # double-buffered x/o tiles, live relu chunk, f32 intermediates.
    vmem_needed = (2 * weight_bytes
                   + 4 * (2 * 2 * block_s * E + block_s * h_chunk + 5 * block_s * E))
    vmem_limit = _vmem_limit_bytes(vmem_needed)

    cost = pl.CostEstimate(flops=2 * S * (E * E + 2 * E * H), transcendentals=0,
                           bytes_accessed=8 * Sp * E + weight_bytes)

    kernel = functools.partial(_encoder_kernel, h_chunk=h_chunk)

    def build(weight_mode):
        kw = {} if weight_mode is None else {"pipeline_mode": weight_mode}
        return pl.pallas_call(
            kernel,
            out_shape=jax.ShapeDtypeStruct((Sp, E), jnp.float32),
            grid=(grid_n,),
            in_specs=[
                pl.BlockSpec((block_s, E), tile_map),
                pl.BlockSpec((E, E), const_map, **kw),
                pl.BlockSpec((E, H), const_map, **kw),
                pl.BlockSpec((H, E), const_map, **kw),
                pl.BlockSpec((1, H), const_map, **kw),
                pl.BlockSpec((8, E), const_map, **kw),
            ],
            out_specs=pl.BlockSpec((block_s, E), tile_map),
            compiler_params=pltpu.CompilerParams(
                dimension_semantics=("parallel",),
                vmem_limit_bytes=vmem_limit),
            cost_estimate=cost,
        )

    out = _call_with_resident_weights(build, (x, wa, w1t, w2t, b1, vecs))
    return out[:S]


def _forward_lane_packed(x, params, *, max_block):
    S, E = x.shape
    H = params["w1"].shape[0]
    pack = 128 // E
    L = pack * E                                   # = 128 (lane-dense rows)
    Hp = pack * H

    w_attn, b_attn = _prepare_attention(params)
    wa = _block_diag(w_attn, pack).astype(jnp.bfloat16)               # [128, 128]
    w1t = _block_diag(params["w1"].T, pack).astype(jnp.bfloat16)      # [128, Hp]
    w2t = _block_diag(params["w2"].T, pack).astype(jnp.bfloat16)      # [Hp, 128]
    b1 = jnp.tile(params["b1"], pack).reshape(1, Hp).astype(jnp.float32)
    vecs = _pack_vecs([jnp.tile(v, pack) for v in
                       (b_attn, params["g1"], params["be1"],
                        params["b2"], params["g2"], params["be2"])], L)
    avg = _block_diag(jnp.full((E, E), 1.0 / E, jnp.float32), pack)   # segmented mean

    rows = pl.cdiv(S, pack)
    S1 = rows * pack
    if S1 != S:
        x = jnp.pad(x, ((0, S1 - S), (0, 0)))
    xp = x.reshape(rows, L)

    block_r, grid_n = _choose_tiling(rows, max_block)
    Rp = block_r * grid_n
    if Rp != rows:
        xp = jnp.pad(xp, ((0, Rp - rows), (0, 0)))

    tile_map = lambda i: (i, 0)
    const_map = lambda i: (0, 0)

    cost = pl.CostEstimate(
        flops=2 * Rp * (3 * L * L + 2 * L * Hp), transcendentals=0,
        bytes_accessed=8 * Rp * L + 2 * (L * L + 2 * L * Hp) + 4 * (Hp + 8 * L + L * L))

    def build(weight_mode):
        kw = {} if weight_mode is None else {"pipeline_mode": weight_mode}
        return pl.pallas_call(
            _packed_kernel,
            out_shape=jax.ShapeDtypeStruct((Rp, L), jnp.float32),
            grid=(grid_n,),
            in_specs=[
                pl.BlockSpec((block_r, L), tile_map),
                pl.BlockSpec((L, L), const_map, **kw),
                pl.BlockSpec((L, Hp), const_map, **kw),
                pl.BlockSpec((Hp, L), const_map, **kw),
                pl.BlockSpec((1, Hp), const_map, **kw),
                pl.BlockSpec((8, L), const_map, **kw),
                pl.BlockSpec((L, L), const_map, **kw),
            ],
            out_specs=pl.BlockSpec((block_r, L), tile_map),
            compiler_params=pltpu.CompilerParams(
                dimension_semantics=("parallel",)),
            cost_estimate=cost,
        )

    out = _call_with_resident_weights(build, (xp, wa, w1t, w2t, b1, vecs, avg))
    return out.reshape(Rp * pack, E)[:S]


def language_encoder_forward(base_embeddings, params, *, max_block=512, ff_chunk=None):
    """base_embeddings: [S, E] f32 output of the frozen T5WithAttentionMLP.
    params: TransformerEncoderLayer weights (see make_params)."""
    S, E = base_embeddings.shape
    if E < 128 and 128 % E == 0:
        # lane-dense packing: 128//E sentences per 128-lane row
        return _forward_lane_packed(base_embeddings, params, max_block=max_block)
    return _forward_standard(base_embeddings, params,
                             max_block=max_block, ff_chunk=ff_chunk)


# --------------------------------------------------------------------------- #
# Pure-JAX reference (unfused PyTorch math, eval mode) and params
# --------------------------------------------------------------------------- #
def _ref_layernorm(v, gamma, beta, eps=1e-5):
    mu = jnp.mean(v, axis=-1, keepdims=True)
    var = jnp.mean((v - mu) ** 2, axis=-1, keepdims=True)
    return (v - mu) * jax.lax.rsqrt(var + eps) * gamma + beta


def language_encoder_reference(x, params):
    v = jnp.dot(x, params["wv"].T, precision=_HIGHEST) + params["bv"]
    attn = jnp.dot(v, params["wo"].T, precision=_HIGHEST) + params["bo"]
    y = _ref_layernorm(x + attn, params["g1"], params["be1"])
    h = jnp.maximum(jnp.dot(y, params["w1"].T, precision=_HIGHEST) + params["b1"], 0.0)
    ff = jnp.dot(h, params["w2"].T, precision=_HIGHEST) + params["b2"]
    return _ref_layernorm(y + ff, params["g2"], params["be2"])


def make_params(key, embedding_dim):
    E = embedding_dim
    ks = jax.random.split(key, 8)
    scale = 0.02
    return {
        # value / output projections of nn.MultiheadAttention (only ones that matter
        # when seq_len == 1)
        "wv": scale * jax.random.normal(ks[0], (E, E), jnp.float32),
        "bv": scale * jax.random.normal(ks[1], (E,), jnp.float32),
        "wo": scale * jax.random.normal(ks[2], (E, E), jnp.float32),
        "bo": scale * jax.random.normal(ks[3], (E,), jnp.float32),
        # feed-forward (dim_feedforward = 4E)
        "w1": scale * jax.random.normal(ks[4], (4 * E, E), jnp.float32),
        "b1": scale * jax.random.normal(ks[5], (4 * E,), jnp.float32),
        "w2": scale * jax.random.normal(ks[6], (E, 4 * E), jnp.float32),
        "b2": scale * jax.random.normal(ks[7], (E,), jnp.float32),
        # layer norms
        "g1": jnp.ones((E,), jnp.float32), "be1": jnp.zeros((E,), jnp.float32),
        "g2": jnp.ones((E,), jnp.float32), "be2": jnp.zeros((E,), jnp.float32),
    }


if __name__ == "__main__":
    key = jax.random.PRNGKey(0)
    k_emb, k_par, k_big, k_par2, k_std = jax.random.split(key, 5)

    # ---- shipped configuration: embedding_dim = 32 -> lane-packed path ----
    E, S = 32, 8
    base_embeddings = jax.random.normal(k_emb, (S, E), jnp.float32)
    params = make_params(k_par, E)

    out = jax.block_until_ready(language_encoder_forward(base_embeddings, params))
    ref = language_encoder_reference(base_embeddings, params)
    assert out.shape == (S, E)
    assert jnp.all(jnp.isfinite(out))
    assert jnp.allclose(out, ref, rtol=2e-3, atol=2e-3)

    # gridded lane-packed path (padding, even 2-tile grid)
    big = jax.random.normal(k_big, (600, E), jnp.float32)
    out_big = jax.block_until_ready(language_encoder_forward(big, params))
    ref_big = language_encoder_reference(big, params)
    assert out_big.shape == (600, E)
    assert jnp.allclose(out_big, ref_big, rtol=2e-3, atol=2e-3)

    # standard path (E >= 128) with the H-chunked feed-forward exercised
    E2, S2 = 128, 64
    params2 = make_params(k_par2, E2)
    x2 = jax.random.normal(k_std, (S2, E2), jnp.float32)
    out2 = jax.block_until_ready(
        language_encoder_forward(x2, params2, ff_chunk=256))
    ref2 = language_encoder_reference(x2, params2)
    assert out2.shape == (S2, E2)
    assert jnp.allclose(out2, ref2, rtol=2e-3, atol=2e-3)

    print("KERNEL_OK")
</pallas_src>

<mosaic_0001>
module attributes {stable_mosaic.version = 11 : i64} {
  func.func @_packed_kernel(%arg0: i32, %arg1: memref<8x128xf32, #tpu.memory_space<vmem>>, %arg2: memref<128x128xbf16, #tpu.memory_space<vmem>>, %arg3: memref<128x512xbf16, #tpu.memory_space<vmem>>, %arg4: memref<512x128xbf16, #tpu.memory_space<vmem>>, %arg5: memref<1x512xf32, #tpu.memory_space<vmem>>, %arg6: memref<8x128xf32, #tpu.memory_space<vmem>>, %arg7: memref<128x128xf32, #tpu.memory_space<vmem>>, %arg8: memref<8x128xf32, #tpu.memory_space<vmem>>) attributes {dimension_semantics = [#tpu.dimension_semantics<parallel>], iteration_bounds = array<i64: 1>, scalar_prefetch = 0 : i64, scratch_operands = 0 : i64, tpu.core_type = #tpu.core_type<tc>, window_params = [{transform_indices = @transform_0, window_bounds = array<i64: 8, 128>}, {pipeline_mode = #tpu.pipeline_mode<synchronous>, transform_indices = @transform_1, window_bounds = array<i64: 128, 128>}, {pipeline_mode = #tpu.pipeline_mode<synchronous>, transform_indices = @transform_2, window_bounds = array<i64: 128, 512>}, {pipeline_mode = #tpu.pipeline_mode<synchronous>, transform_indices = @transform_3, window_bounds = array<i64: 512, 128>}, {pipeline_mode = #tpu.pipeline_mode<synchronous>, transform_indices = @transform_4, window_bounds = array<i64: 1, 512>}, {pipeline_mode = #tpu.pipeline_mode<synchronous>, transform_indices = @transform_5, window_bounds = array<i64: 8, 128>}, {pipeline_mode = #tpu.pipeline_mode<synchronous>, transform_indices = @transform_6, window_bounds = array<i64: 128, 128>}, {transform_indices = @transform_7, window_bounds = array<i64: 8, 128>}]} {
    %c0 = arith.constant 0 : index
    %c0_0 = arith.constant 0 : index
    %0 = vector.load %arg1[%c0, %c0_0] : memref<8x128xf32, #tpu.memory_space<vmem>>, vector<8x128xf32>
    %c0_1 = arith.constant 0 : index
    %c0_2 = arith.constant 0 : index
    %1 = vector.load %arg6[%c0_1, %c0_2] : memref<8x128xf32, #tpu.memory_space<vmem>>, vector<1x128xf32>
    %c1 = arith.constant 1 : index
    %c0_3 = arith.constant 0 : index
    %2 = vector.load %arg6[%c1, %c0_3] : memref<8x128xf32, #tpu.memory_space<vmem>>, vector<1x128xf32>
    %c2 = arith.constant 2 : index
    %c0_4 = arith.constant 0 : index
    %3 = vector.load %arg6[%c2, %c0_4] : memref<8x128xf32, #tpu.memory_space<vmem>>, vector<1x128xf32>
    %c3 = arith.constant 3 : index
    %c0_5 = arith.constant 0 : index
    %4 = vector.load %arg6[%c3, %c0_5] : memref<8x128xf32, #tpu.memory_space<vmem>>, vector<1x128xf32>
    %c4 = arith.constant 4 : index
    %c0_6 = arith.constant 0 : index
    %5 = vector.load %arg6[%c4, %c0_6] : memref<8x128xf32, #tpu.memory_space<vmem>>, vector<1x128xf32>
    %c5 = arith.constant 5 : index
    %c0_7 = arith.constant 0 : index
    %6 = vector.load %arg6[%c5, %c0_7] : memref<8x128xf32, #tpu.memory_space<vmem>>, vector<1x128xf32>
    %c0_8 = arith.constant 0 : index
    %c0_9 = arith.constant 0 : index
    %7 = vector.load %arg7[%c0_8, %c0_9] : memref<128x128xf32, #tpu.memory_space<vmem>>, vector<128x128xf32>
    %8 = arith.truncf %0 : vector<8x128xf32> to vector<8x128xbf16>
    %c0_10 = arith.constant 0 : index
    %c0_11 = arith.constant 0 : index
    %9 = vector.load %arg2[%c0_10, %c0_11] : memref<128x128xbf16, #tpu.memory_space<vmem>>, vector<128x128xbf16>
    %cst = arith.constant dense<0.000000e+00> : vector<8x128xf32>
    %10 = tpu.matmul %8, %9, %cst {dimension_numbers = #tpu.dot_dimension_numbers<[1], [0], [0], [1], [0, 0, 1, 1], [], []>} : vector<8x128xbf16>, vector<128x128xbf16>, vector<8x128xf32> -> vector<8x128xf32>
    %11 = vector.broadcast %1 : vector<1x128xf32> to vector<8x128xf32>
    %12 = arith.addf %10, %11 : vector<8x128xf32>
    %13 = arith.addf %0, %12 : vector<8x128xf32>
    %cst_12 = arith.constant dense<0.000000e+00> : vector<8x128xf32>
    %14 = tpu.matmul %13, %7, %cst_12 {dimension_numbers = #tpu.dot_dimension_numbers<[1], [0], [0], [1], [0, 0, 1, 1], [], []>, precision = #tpu.contract_precision<fp32>} : vector<8x128xf32>, vector<128x128xf32>, vector<8x128xf32> -> vector<8x128xf32>
    %15 = arith.mulf %13, %13 : vector<8x128xf32>
    %cst_13 = arith.constant dense<0.000000e+00> : vector<8x128xf32>
    %16 = tpu.matmul %15, %7, %cst_13 {dimension_numbers = #tpu.dot_dimension_numbers<[1], [0], [0], [1], [0, 0, 1, 1], [], []>, precision = #tpu.contract_precision<fp32>} : vector<8x128xf32>, vector<128x128xf32>, vector<8x128xf32> -> vector<8x128xf32>
    %17 = arith.mulf %14, %14 : vector<8x128xf32>
    %18 = arith.subf %16, %17 : vector<8x128xf32>
    %cst_14 = arith.constant 0.000000e+00 : f32
    %19 = vector.broadcast %cst_14 : f32 to vector<8x128xf32>
    %20 = arith.maximumf %18, %19 : vector<8x128xf32>
    %21 = arith.subf %13, %14 : vector<8x128xf32>
    %cst_15 = arith.constant 9.99999974E-6 : f32
    %22 = vector.broadcast %cst_15 : f32 to vector<8x128xf32>
    %23 = arith.addf %20, %22 : vector<8x128xf32>
    %24 = math.rsqrt %23 : vector<8x128xf32>
    %25 = arith.mulf %21, %24 : vector<8x128xf32>
    %26 = vector.broadcast %2 : vector<1x128xf32> to vector<8x128xf32>
    %27 = arith.mulf %25, %26 : vector<8x128xf32>
    %28 = vector.broadcast %3 : vector<1x128xf32> to vector<8x128xf32>
    %29 = arith.addf %27, %28 : vector<8x128xf32>
    %30 = arith.truncf %29 : vector<8x128xf32> to vector<8x128xbf16>
    %c0_16 = arith.constant 0 : index
    %c0_17 = arith.constant 0 : index
    %31 = vector.load %arg3[%c0_16, %c0_17] : memref<128x512xbf16, #tpu.memory_space<vmem>>, vector<128x512xbf16>
    %cst_18 = arith.constant dense<0.000000e+00> : vector<8x512xf32>
    %32 = tpu.matmul %30, %31, %cst_18 {dimension_numbers = #tpu.dot_dimension_numbers<[1], [0], [0], [1], [0, 0, 1, 1], [], []>} : vector<8x128xbf16>, vector<128x512xbf16>, vector<8x512xf32> -> vector<8x512xf32>
    %c0_19 = arith.constant 0 : index
    %c0_20 = arith.constant 0 : index
    %33 = vector.load %arg5[%c0_19, %c0_20] : memref<1x512xf32, #tpu.memory_space<vmem>>, vector<1x512xf32>
    %34 = vector.broadcast %33 : vector<1x512xf32> to vector<8x512xf32>
    %35 = arith.addf %32, %34 : vector<8x512xf32>
    %cst_21 = arith.constant 0.000000e+00 : f32
    %36 = vector.broadcast %cst_21 : f32 to vector<8x512xf32>
    %37 = arith.maximumf %35, %36 : vector<8x512xf32>
    %38 = arith.truncf %37 : vector<8x512xf32> to vector<8x512xbf16>
    %c0_22 = arith.constant 0 : index
    %c0_23 = arith.constant 0 : index
    %39 = vector.load %arg4[%c0_22, %c0_23] : memref<512x128xbf16, #tpu.memory_space<vmem>>, vector<512x128xbf16>
    %cst_24 = arith.constant dense<0.000000e+00> : vector<8x128xf32>
    %40 = tpu.matmul %38, %39, %cst_24 {dimension_numbers = #tpu.dot_dimension_numbers<[1], [0], [0], [1], [0, 0, 1, 1], [], []>} : vector<8x512xbf16>, vector<512x128xbf16>, vector<8x128xf32> -> vector<8x128xf32>
    %41 = vector.broadcast %4 : vector<1x128xf32> to vector<8x128xf32>
    %42 = arith.addf %40, %41 : vector<8x128xf32>
    %43 = arith.addf %29, %42 : vector<8x128xf32>
    %cst_25 = arith.constant dense<0.000000e+00> : vector<8x128xf32>
    %44 = tpu.matmul %43, %7, %cst_25 {dimension_numbers = #tpu.dot_dimension_numbers<[1], [0], [0], [1], [0, 0, 1, 1], [], []>, precision = #tpu.contract_precision<fp32>} : vector<8x128xf32>, vector<128x128xf32>, vector<8x128xf32> -> vector<8x128xf32>
    %45 = arith.mulf %43, %43 : vector<8x128xf32>
    %cst_26 = arith.constant dense<0.000000e+00> : vector<8x128xf32>
    %46 = tpu.matmul %45, %7, %cst_26 {dimension_numbers = #tpu.dot_dimension_numbers<[1], [0], [0], [1], [0, 0, 1, 1], [], []>, precision = #tpu.contract_precision<fp32>} : vector<8x128xf32>, vector<128x128xf32>, vector<8x128xf32> -> vector<8x128xf32>
    %47 = arith.mulf %44, %44 : vector<8x128xf32>
    %48 = arith.subf %46, %47 : vector<8x128xf32>
    %cst_27 = arith.constant 0.000000e+00 : f32
    %49 = vector.broadcast %cst_27 : f32 to vector<8x128xf32>
    %50 = arith.maximumf %48, %49 : vector<8x128xf32>
    %51 = arith.subf %43, %44 : vector<8x128xf32>
    %cst_28 = arith.constant 9.99999974E-6 : f32
    %52 = vector.broadcast %cst_28 : f32 to vector<8x128xf32>
    %53 = arith.addf %50, %52 : vector<8x128xf32>
    %54 = math.rsqrt %53 : vector<8x128xf32>
    %55 = arith.mulf %51, %54 : vector<8x128xf32>
    %56 = vector.broadcast %5 : vector<1x128xf32> to vector<8x128xf32>
    %57 = arith.mulf %55, %56 : vector<8x128xf32>
    %58 = vector.broadcast %6 : vector<1x128xf32> to vector<8x128xf32>
    %59 = arith.addf %57, %58 : vector<8x128xf32>
    %c0_29 = arith.constant 0 : index
    %c0_30 = arith.constant 0 : index
    %60 = vector.load %arg8[%c0_29, %c0_30] : memref<8x128xf32, #tpu.memory_space<vmem>>, vector<8x128xf32>
    tpu.vector_store %arg8[%c0_29, %c0_30], %59 {strides = array<i32>} : memref<8x128xf32, #tpu.memory_space<vmem>>, vector<8x128xf32>,
    return
  }
  func.func @transform_0(%arg0: i32) -> (i32, i32) {
    %c0_i32 = arith.constant 0 : i32
    %c0_i32_0 = arith.constant 0 : i32
    return %arg0, %c0_i32 : i32, i32
  }
  func.func @transform_1(%arg0: i32) -> (i32, i32) {
    %c0_i32 = arith.constant 0 : i32
    %c0_i32_0 = arith.constant 0 : i32
    %c0_i32_1 = arith.constant 0 : i32
    return %c0_i32, %c0_i32_0 : i32, i32
  }
  func.func @transform_2(%arg0: i32) -> (i32, i32) {
    %c0_i32 = arith.constant 0 : i32
    %c0_i32_0 = arith.constant 0 : i32
    %c0_i32_1 = arith.constant 0 : i32
    return %c0_i32, %c0_i32_0 : i32, i32
  }
  func.func @transform_3(%arg0: i32) -> (i32, i32) {
    %c0_i32 = arith.constant 0 : i32
    %c0_i32_0 = arith.constant 0 : i32
    %c0_i32_1 = arith.constant 0 : i32
    return %c0_i32, %c0_i32_0 : i32, i32
  }
  func.func @transform_4(%arg0: i32) -> (i32, i32) {
    %c0_i32 = arith.constant 0 : i32
    %c0_i32_0 = arith.constant 0 : i32
    %c0_i32_1 = arith.constant 0 : i32
    return %c0_i32, %c0_i32_0 : i32, i32
  }
  func.func @transform_5(%arg0: i32) -> (i32, i32) {
    %c0_i32 = arith.constant 0 : i32
    %c0_i32_0 = arith.constant 0 : i32
    %c0_i32_1 = arith.constant 0 : i32
    return %c0_i32, %c0_i32_0 : i32, i32
  }
  func.func @transform_6(%arg0: i32) -> (i32, i32) {
    %c0_i32 = arith.constant 0 : i32
    %c0_i32_0 = arith.constant 0 : i32
    %c0_i32_1 = arith.constant 0 : i32
    return %c0_i32, %c0_i32_0 : i32, i32
  }
  func.func @transform_7(%arg0: i32) -> (i32, i32) {
    %c0_i32 = arith.constant 0 : i32
    %c0_i32_0 = arith.constant 0 : i32
    return %arg0, %c0_i32 : i32, i32
  }
}

module attributes {stable_mosaic.version = 11 : i64} {
  func.func @_packed_kernel(%arg0: i32, %arg1: memref<8x128xf32, #tpu.memory_space<vmem>>, %arg2: memref<128x128xbf16, #tpu.memory_space<vmem>>, %arg3: memref<128x512xbf16, #tpu.memory_space<vmem>>, %arg4: memref<512x128xbf16, #tpu.memory_space<vmem>>, %arg5: memref<1x512xf32, #tpu.memory_space<vmem>>, %arg6: memref<8x128xf32, #tpu.memory_space<vmem>>, %arg7: memref<128x128xf32, #tpu.memory_space<vmem>>, %arg8: memref<8x128xf32, #tpu.memory_space<vmem>>) attributes {dimension_semantics = [#tpu.dimension_semantics<parallel>], iteration_bounds = array<i64: 1>, scalar_prefetch = 0 : i64, scratch_operands = 0 : i64, tpu.core_type = #tpu.core_type<tc>, window_params = [{transform_indices = @transform_0, window_bounds = array<i64: 8, 128>}, {pipeline_mode = #tpu.pipeline_mode<synchronous>, transform_indices = @transform_1, window_bounds = array<i64: 128, 128>}, {pipeline_mode = #tpu.pipeline_mode<synchronous>, transform_indices = @transform_2, window_bounds = array<i64: 128, 512>}, {pipeline_mode = #tpu.pipeline_mode<synchronous>, transform_indices = @transform_3, window_bounds = array<i64: 512, 128>}, {pipeline_mode = #tpu.pipeline_mode<synchronous>, transform_indices = @transform_4, window_bounds = array<i64: 1, 512>}, {pipeline_mode = #tpu.pipeline_mode<synchronous>, transform_indices = @transform_5, window_bounds = array<i64: 8, 128>}, {pipeline_mode = #tpu.pipeline_mode<synchronous>, transform_indices = @transform_6, window_bounds = array<i64: 128, 128>}, {transform_indices = @transform_7, window_bounds = array<i64: 8, 128>}]} {
    %c0 = arith.constant 0 : index
    %c0_0 = arith.constant 0 : index
    %0 = vector.load %arg1[%c0, %c0_0] : memref<8x128xf32, #tpu.memory_space<vmem>>, vector<8x128xf32>
    %c0_1 = arith.constant 0 : index
    %c0_2 = arith.constant 0 : index
    %1 = vector.load %arg6[%c0_1, %c0_2] : memref<8x128xf32, #tpu.memory_space<vmem>>, vector<1x128xf32>
    %c1 = arith.constant 1 : index
    %c0_3 = arith.constant 0 : index
    %2 = vector.load %arg6[%c1, %c0_3] : memref<8x128xf32, #tpu.memory_space<vmem>>, vector<1x128xf32>
    %c2 = arith.constant 2 : index
    %c0_4 = arith.constant 0 : index
    %3 = vector.load %arg6[%c2, %c0_4] : memref<8x128xf32, #tpu.memory_space<vmem>>, vector<1x128xf32>
    %c3 = arith.constant 3 : index
    %c0_5 = arith.constant 0 : index
    %4 = vector.load %arg6[%c3, %c0_5] : memref<8x128xf32, #tpu.memory_space<vmem>>, vector<1x128xf32>
    %c4 = arith.constant 4 : index
    %c0_6 = arith.constant 0 : index
    %5 = vector.load %arg6[%c4, %c0_6] : memref<8x128xf32, #tpu.memory_space<vmem>>, vector<1x128xf32>
    %c5 = arith.constant 5 : index
    %c0_7 = arith.constant 0 : index
    %6 = vector.load %arg6[%c5, %c0_7] : memref<8x128xf32, #tpu.memory_space<vmem>>, vector<1x128xf32>
    %c0_8 = arith.constant 0 : index
    %c0_9 = arith.constant 0 : index
    %7 = vector.load %arg7[%c0_8, %c0_9] : memref<128x128xf32, #tpu.memory_space<vmem>>, vector<128x128xf32>
    %8 = arith.truncf %0 : vector<8x128xf32> to vector<8x128xbf16>
    %c0_10 = arith.constant 0 : index
    %c0_11 = arith.constant 0 : index
    %9 = vector.load %arg2[%c0_10, %c0_11] : memref<128x128xbf16, #tpu.memory_space<vmem>>, vector<128x128xbf16>
    %cst = arith.constant dense<0.000000e+00> : vector<8x128xf32>
    %10 = tpu.matmul %8, %9, %cst {dimension_numbers = #tpu.dot_dimension_numbers<[1], [0], [0], [1], [0, 0, 1, 1], [], []>} : vector<8x128xbf16>, vector<128x128xbf16>, vector<8x128xf32> -> vector<8x128xf32>
    %11 = vector.broadcast %1 : vector<1x128xf32> to vector<8x128xf32>
    %12 = arith.addf %10, %11 : vector<8x128xf32>
    %13 = arith.addf %0, %12 : vector<8x128xf32>
    %cst_12 = arith.constant dense<0.000000e+00> : vector<8x128xf32>
    %14 = tpu.matmul %13, %7, %cst_12 {dimension_numbers = #tpu.dot_dimension_numbers<[1], [0], [0], [1], [0, 0, 1, 1], [], []>, precision = #tpu.contract_precision<fp32>} : vector<8x128xf32>, vector<128x128xf32>, vector<8x128xf32> -> vector<8x128xf32>
    %15 = arith.mulf %13, %13 : vector<8x128xf32>
    %cst_13 = arith.constant dense<0.000000e+00> : vector<8x128xf32>
    %16 = tpu.matmul %15, %7, %cst_13 {dimension_numbers = #tpu.dot_dimension_numbers<[1], [0], [0], [1], [0, 0, 1, 1], [], []>, precision = #tpu.contract_precision<fp32>} : vector<8x128xf32>, vector<128x128xf32>, vector<8x128xf32> -> vector<8x128xf32>
    %17 = arith.mulf %14, %14 : vector<8x128xf32>
    %18 = arith.subf %16, %17 : vector<8x128xf32>
    %cst_14 = arith.constant 0.000000e+00 : f32
    %19 = vector.broadcast %cst_14 : f32 to vector<8x128xf32>
    %20 = arith.maximumf %18, %19 : vector<8x128xf32>
    %21 = arith.subf %13, %14 : vector<8x128xf32>
    %cst_15 = arith.constant 9.99999974E-6 : f32
    %22 = vector.broadcast %cst_15 : f32 to vector<8x128xf32>
    %23 = arith.addf %20, %22 : vector<8x128xf32>
    %24 = math.rsqrt %23 : vector<8x128xf32>
    %25 = arith.mulf %21, %24 : vector<8x128xf32>
    %26 = vector.broadcast %2 : vector<1x128xf32> to vector<8x128xf32>
    %27 = arith.mulf %25, %26 : vector<8x128xf32>
    %28 = vector.broadcast %3 : vector<1x128xf32> to vector<8x128xf32>
    %29 = arith.addf %27, %28 : vector<8x128xf32>
    %30 = arith.truncf %29 : vector<8x128xf32> to vector<8x128xbf16>
    %c0_16 = arith.constant 0 : index
    %c0_17 = arith.constant 0 : index
    %31 = vector.load %arg3[%c0_16, %c0_17] : memref<128x512xbf16, #tpu.memory_space<vmem>>, vector<128x512xbf16>
    %cst_18 = arith.constant dense<0.000000e+00> : vector<8x512xf32>
    %32 = tpu.matmul %30, %31, %cst_18 {dimension_numbers = #tpu.dot_dimension_numbers<[1], [0], [0], [1], [0, 0, 1, 1], [], []>} : vector<8x128xbf16>, vector<128x512xbf16>, vector<8x512xf32> -> vector<8x512xf32>
    %c0_19 = arith.constant 0 : index
    %c0_20 = arith.constant 0 : index
    %33 = vector.load %arg5[%c0_19, %c0_20] : memref<1x512xf32, #tpu.memory_space<vmem>>, vector<1x512xf32>
    %34 = vector.broadcast %33 : vector<1x512xf32> to vector<8x512xf32>
    %35 = arith.addf %32, %34 : vector<8x512xf32>
    %cst_21 = arith.constant 0.000000e+00 : f32
    %36 = vector.broadcast %cst_21 : f32 to vector<8x512xf32>
    %37 = arith.maximumf %35, %36 : vector<8x512xf32>
    %38 = arith.truncf %37 : vector<8x512xf32> to vector<8x512xbf16>
    %c0_22 = arith.constant 0 : index
    %c0_23 = arith.constant 0 : index
    %39 = vector.load %arg4[%c0_22, %c0_23] : memref<512x128xbf16, #tpu.memory_space<vmem>>, vector<512x128xbf16>
    %cst_24 = arith.constant dense<0.000000e+00> : vector<8x128xf32>
    %40 = tpu.matmul %38, %39, %cst_24 {dimension_numbers = #tpu.dot_dimension_numbers<[1], [0], [0], [1], [0, 0, 1, 1], [], []>} : vector<8x512xbf16>, vector<512x128xbf16>, vector<8x128xf32> -> vector<8x128xf32>
    %41 = vector.broadcast %4 : vector<1x128xf32> to vector<8x128xf32>
    %42 = arith.addf %40, %41 : vector<8x128xf32>
    %43 = arith.addf %29, %42 : vector<8x128xf32>
    %cst_25 = arith.constant dense<0.000000e+00> : vector<8x128xf32>
    %44 = tpu.matmul %43, %7, %cst_25 {dimension_numbers = #tpu.dot_dimension_numbers<[1], [0], [0], [1], [0, 0, 1, 1], [], []>, precision = #tpu.contract_precision<fp32>} : vector<8x128xf32>, vector<128x128xf32>, vector<8x128xf32> -> vector<8x128xf32>
    %45 = arith.mulf %43, %43 : vector<8x128xf32>
    %cst_26 = arith.constant dense<0.000000e+00> : vector<8x128xf32>
    %46 = tpu.matmul %45, %7, %cst_26 {dimension_numbers = #tpu.dot_dimension_numbers<[1], [0], [0], [1], [0, 0, 1, 1], [], []>, precision = #tpu.contract_precision<fp32>} : vector<8x128xf32>, vector<128x128xf32>, vector<8x128xf32> -> vector<8x128xf32>
    %47 = arith.mulf %44, %44 : vector<8x128xf32>
    %48 = arith.subf %46, %47 : vector<8x128xf32>
    %cst_27 = arith.constant 0.000000e+00 : f32
    %49 = vector.broadcast %cst_27 : f32 to vector<8x128xf32>
    %50 = arith.maximumf %48, %49 : vector<8x128xf32>
    %51 = arith.subf %43, %44 : vector<8x128xf32>
    %cst_28 = arith.constant 9.99999974E-6 : f32
    %52 = vector.broadcast %cst_28 : f32 to vector<8x128xf32>
    %53 = arith.addf %50, %52 : vector<8x128xf32>
    %54 = math.rsqrt %53 : vector<8x128xf32>
    %55 = arith.mulf %51, %54 : vector<8x128xf32>
    %56 = vector.broadcast %5 : vector<1x128xf32> to vector<8x128xf32>
    %57 = arith.mulf %55, %56 : vector<8x128xf32>
    %58 = vector.broadcast %6 : vector<1x128xf32> to vector<8x128xf32>
    %59 = arith.addf %57, %58 : vector<8x128xf32>
    %c0_29 = arith.constant 0 : index
    %c0_30 = arith.constant 0 : index
    %60 = vector.load %arg8[%c0_29, %c0_30] : memref<8x128xf32, #tpu.memory_space<vmem>>, vector<8x128xf32>
    tpu.vector_store %arg8[%c0_29, %c0_30], %59 {strides = array<i32>} : memref<8x128xf32, #tpu.memory_space<vmem>>, vector<8x128xf32>,
    return
  }
  func.func @transform_0(%arg0: i32) -> (i32, i32) {
    %c0_i32 = arith.constant 0 : i32
    %c0_i32_0 = arith.constant 0 : i32
    return %arg0, %c0_i32 : i32, i32
  }
  func.func @transform_1(%arg0: i32) -> (i32, i32) {
    %c0_i32 = arith.constant 0 : i32
    %c0_i32_0 = arith.constant 0 : i32
    %c0_i32_1 = arith.constant 0 : i32
    return %c0_i32, %c0_i32_0 : i32, i32
  }
  func.func @transform_2(%arg0: i32) -> (i32, i32) {
    %c0_i32 = arith.constant 0 : i32
    %c0_i32_0 = arith.constant 0 : i32
    %c0_i32_1 = arith.constant 0 : i32
    return %c0_i32, %c0_i32_0 : i32, i32
  }
  func.func @transform_3(%arg0: i32) -> (i32, i32) {
    %c0_i32 = arith.constant 0 : i32
    %c0_i32_0 = arith.constant 0 : i32
    %c0_i32_1 = arith.constant 0 : i32
    return %c0_i32, %c0_i32_0 : i32, i32
  }
  func.func @transform_4(%arg0: i32) -> (i32, i32) {
    %c0_i32 = arith.constant 0 : i32
    %c0_i32_0 = arith.constant 0 : i32
    %c0_i32_1 = arith.constant 0 : i32
    return %c0_i32, %c0_i32_0 : i32, i32
  }
  func.func @transform_5(%arg0: i32) -> (i32, i32) {
    %c0_i32 = arith.constant 0 : i32
    %c0_i32_0 = arith.constant 0 : i32
    %c0_i32_1 = arith.constant 0 : i32
    return %c0_i32, %c0_i32_0 : i32, i32
  }
  func.func @transform_6(%arg0: i32) -> (i32, i32) {
    %c0_i32 = arith.constant 0 : i32
    %c0_i32_0 = arith.constant 0 : i32
    %c0_i32_1 = arith.constant 0 : i32
    return %c0_i32, %c0_i32_0 : i32, i32
  }
  func.func @transform_7(%arg0: i32) -> (i32, i32) {
    %c0_i32 = arith.constant 0 : i32
    %c0_i32_0 = arith.constant 0 : i32
    return %arg0, %c0_i32 : i32, i32
  }
}

</mosaic_0001>

<bundles_post_ra>
// kernel: tpu_custom_call.1
= control target key start
LH: loop header
LB: loop body
LE: loop exit
PB: predicated region body
PF: predicated region fallthrough
CT: control target
= control target key end

     0   :  { %12 = vsyncpa [#allocation3], 0  ;;  %s3524_s0 = inlined_call_operand.hbm [shape: f32[8,128], index: 0, kind: input, shape index: {}]   ;;  %s3525_s1 = inlined_call_operand.hbm [shape: bf16[128,128], index: 1, kind: input, shape index: {}]   ;;  %s3526_s2 = inlined_call_operand.hbm [shape: bf16[128,512], index: 2, kind: input, shape index: {}]   ;;  %s3527_s3 = inlined_call_operand.hbm [shape: bf16[512,128], index: 3, kind: input, shape index: {}]   ;;  %s3528_s4 = inlined_call_operand.hbm [shape: f32[1,512], index: 4, kind: input, shape index: {}]   ;;  %s3529_s5 = inlined_call_operand.hbm [shape: f32[8,128], index: 5, kind: input, shape index: {}]   ;;  %s3530_s6 = inlined_call_operand.hbm [shape: f32[128,128], index: 6, kind: input, shape index: {}]   ;;  %s3531_s7 = inlined_call_operand.hbm [shape: f32[8,128], index: 7, kind: output, shape index: {}]  }
   0x1   :  { %13 = vsyncpa [#allocation6], 0 }
   0x2   :  { %14 = vsyncpa [#allocation9], 0 }
   0x3   :  { %15 = vsyncpa [#allocation12], 0  ;;  %s32_s26 = sshll.u32 %s3525_s1, 4  ;;  %s33_s26 = int_to_ptr.hbm [resolvable:$true] %s32_s26 }
   0x4   :  { %16 = vsyncpa [#allocation4], 0  ;;  %s2819_s27 = smov [#allocation5]   ;;  %s58_s8 = sshll.u32 %s3527_s3, 4  ;;  %s59_s8 = int_to_ptr.hbm [resolvable:$true] %s58_s8 }
   0x5   :  { %s34_s28 = sshll.u32 %s2819_s27, 4  ;;  %s2820_s9 = smov 64   ;;  %s35_s28 = int_to_ptr.vmem [resolvable:$true] %s34_s28 }
   0x6   :  { %s2821_s10 = smov 4   ;;  %s2822_s11 = smov [#allocation8]  }
   0x7   :  { %40 = dma.hbm_to_vmem [thread:$0]  %s33_s26, 1024, %s35_s28, [#allocation6], %s2820_s9, %s2820_s9, %s2821_s10  }
   0x8   :  { %s60_s12 = sshll.u32 %s2822_s11, 4  ;;  %s83_s15 = sshll.u32 %s3529_s5, 4  ;;  %s61_s12 = int_to_ptr.vmem [resolvable:$true] %s60_s12  ;;  %s84_s15 = int_to_ptr.hbm [resolvable:$true] %s83_s15 }
   0x9   :  { %66 = dma.hbm_to_vmem [thread:$0]  %s59_s8, 4096, %s61_s12, [#allocation9], %s2820_s9, %s2820_s9, %s2821_s10  }
   0xa   :  { %s22_s17 = sshll.u32 %s3524_s0, 4  ;;  %s2823_s18 = smov [#allocation11]   ;;  %s23_s17 = int_to_ptr.hbm [resolvable:$true] %s22_s17 }
   0xb   :  { %s85_s19 = sshll.u32 %s2823_s18, 4  ;;  %s2824_s3 = smov [#allocation2]   ;;  %s86_s19 = int_to_ptr.vmem [resolvable:$true] %s85_s19 }
   0xc   :  { %88 = dma.hbm_to_vmem [thread:$0]  %s84_s15, 128, %s86_s19, [#allocation12]  }
   0xd   :  { %s24_s20 = sshll.u32 %s2824_s3, 4  ;;  %s45_s23 = sshll.u32 %s3526_s2, 4  ;;  %s25_s20 = int_to_ptr.vmem [resolvable:$true] %s24_s20  ;;  %s46_s23 = int_to_ptr.hbm [resolvable:$true] %s45_s23 }
   0xe   :  { %27 = dma.hbm_to_vmem [thread:$0]  %s23_s17, 128, %s25_s20, [#allocation3]  }
   0xf   :  { %s2825_s5 = smov [#allocation7]   ;;  %s72_s0 = sshll.u32 %s3528_s4, 4  ;;  %s73_s0 = int_to_ptr.hbm [resolvable:$true] %s72_s0 }
  0x10   :  { %s47_s24 = sshll.u32 %s2825_s5, 4  ;;  %s2826_s27 = smov 256   ;;  %s48_s24 = int_to_ptr.vmem [resolvable:$true] %s47_s24 }
  0x11   :  { %s2827_s28 = smov 16   ;;  %s2828_s29 = smov [#allocation10]  }
  0x12   :  { %53 = dma.hbm_to_vmem [thread:$0]  %s46_s23, 4096, %s48_s24, [#allocation6], %s2826_s27, %s2826_s27, %s2827_s28  }
  0x13   :  { %s74_s30 = sshll.u32 %s2828_s29, 4  ;;  %s93_s2 = sshll.u32 %s3530_s6, 4  ;;  %s75_s30 = int_to_ptr.vmem [resolvable:$true] %s74_s30  ;;  %s94_s2 = int_to_ptr.hbm [resolvable:$true] %s93_s2 }
  0x14   :  { %77 = dma.hbm_to_vmem [thread:$0]  %s73_s0, 64, %s75_s30, [#allocation9]  }
  0x15   :  { %s2829_s10 = smov [#allocation13]   ;;  %s2830_s12 = smov 128  }
  0x16   :  { %s95_s11 = sshll.u32 %s2829_s10, 4  ;;  %s2831_s13 = smov 8   ;;  %s96_s11 = int_to_ptr.vmem [resolvable:$true] %s95_s11 }
  0x17   :  { %101 = dma.hbm_to_vmem [thread:$0]  %s94_s2, 2048, %s96_s11, [#allocation12], %s2830_s12, %s2830_s12, %s2831_s13  }
  0x18   :  { %2809 = dma.done.wait [#allocation3], 128  }
  0x19   :  { %2810 = vsyncadd [#allocation3], 4294967168 }
  0x1a   :  { %2811 = dma.done.wait [#allocation6], 5120  }
  0x1b   :  { %2812 = vsyncadd [#allocation6], 4294962176 }
  0x1c   :  { %2813 = dma.done.wait [#allocation9], 4160  }
  0x1d   :  { %2814 = vsyncadd [#allocation9], 4294963136 }
  0x1e   :  { %2815 = dma.done.wait [#allocation12], 2176  }
  0x1f   :  { %2816 = vsyncadd [#allocation12], 4294965120  ;;  %v2528_v0 = vld [vmem:[#allocation5 + $0x38] sm:$0xff]  ;;  %v2527_v1 = vld [vmem:[#allocation5 + $0x30] sm:$0xff]  ;;  %s2832_s4 = smov [#allocation14]   ;;  %s2220_s1 = sshll.u32 %s3531_s7, 4  ;;  %s2221_s1 = int_to_ptr.hbm [resolvable:$true] %s2220_s1 }
  0x20   :  { %219 = vmatpush.bf16.msra.mxu0 %v2528_v0  ;;  %v152_v2 = vld [vmem:[#allocation13 + $0x78] sm:$0xff]  ;;  %v151_v3 = vld [vmem:[#allocation13 + $0x70] sm:$0xff]  ;;  %v150_v4 = vld [vmem:[#allocation13 + $0x68] sm:$0xff]  ;;  %s2218_s6 = sshll.u32 %s2832_s4, 4  ;;  %s2219_s6 = int_to_ptr.vmem [resolvable:$true] %s2218_s6 }
  0x21   :  { %v2894_v5 = vand.u32 4294901760, %v152_v2  ;;  %v2896_v6 = vand.u32 4294901760, %v151_v3  ;;  %v2898_v7 = vand.u32 4294901760, %v150_v4  ;;  %v149_v8 = vld [vmem:[#allocation13 + $0x60] sm:$0xff]  ;;  %v148_v9 = vld [vmem:[#allocation13 + $0x58] sm:$0xff]  ;;  %v147_v10 = vld [vmem:[#allocation13 + $0x50] sm:$0xff] }
  0x22   :  { %v2526_v11 = vld [vmem:[#allocation5 + $0x28] sm:$0xff]  ;;  %v2900_v12 = vand.u32 4294901760, %v149_v8  ;;  %v2902_v13 = vand.u32 4294901760, %v148_v9  ;;  %v2904_v14 = vand.u32 4294901760, %v147_v10  ;;  %v146_v18 = vld [vmem:[#allocation13 + $0x48] sm:$0xff]  ;;  %v2525_v30 = vld [vmem:[#allocation5 + $0x20] sm:$0xff] }
  0x23   :  { %v2907_v15 = vsub.f32 %v152_v2, %v2894_v5  ;;  %v2910_v16 = vsub.f32 %v151_v3, %v2896_v6  ;;  %v2913_v17 = vsub.f32 %v150_v4, %v2898_v7  ;;  %234 = vmatpush.msra.mxu1 %v2894_v5  ;;  %v2925_v22 = vand.u32 4294901760, %v146_v18  ;;  %v145_v26 = vld [vmem:[#allocation13 + $0x40] sm:$0xff]  ;;  %v144_v36 = vld [vmem:[#allocation13 + $0x38] sm:$0xff]  ;;  %v143_v41 = vld [vmem:[#allocation13 + $0x30] sm:$0xff] }
  0x24   :  { %220 = vmatpush.bf16.msra.mxu0 %v2527_v1  ;;  %v2917_v19 = vsub.f32 %v149_v8, %v2900_v12  ;;  %v2920_v20 = vsub.f32 %v148_v9, %v2902_v13  ;;  %v2923_v21 = vsub.f32 %v147_v10, %v2904_v14  ;;  %v2954_v34 = vand.u32 4294901760, %v145_v26  ;;  %v2524_v43 = vld [vmem:[#allocation5 + $0x18] sm:$0xff]  ;;  %v141_v55 = vld [vmem:[#allocation13 + $0x20] sm:$0xff]  ;;  %v140_v62 = vld [vmem:[#allocation13 + $0x18] sm:$0xff] }
  0x25   :  { %v2928_v23 = vand.u32 4294901760, %v2907_v15  ;;  %v2931_v24 = vand.u32 4294901760, %v2910_v16  ;;  %377 = vmatpush.msra.mxu3 %v2907_v15  ;;  %v2935_v25 = vand.u32 4294901760, %v2913_v17  ;;  %236 = vmatpush.msra.mxu1 %v2896_v6  ;;  %v2945_v29 = vsub.f32 %v146_v18, %v2925_v22  ;;  %v142_v48 = vld [vmem:[#allocation13 + $0x28] sm:$0xff]  ;;  %v139_v4 = vld [vmem:[#allocation13 + $0x10] sm:$0xff]  ;;  %v2522_v9 = vld [vmem:[#allocation5 + $0x8] sm:$0xff] }
  0x26   :  { %v2939_v27 = vand.u32 4294901760, %v2917_v19  ;;  %v2942_v28 = vand.u32 4294901760, %v2920_v20  ;;  %v2957_v35 = vand.u32 4294901760, %v2923_v21  ;;  %v2968_v40 = vsub.f32 %v145_v26, %v2954_v34  ;;  %v2523_v57 = vld [vmem:[#allocation5 + $0x10] sm:$0xff] }
  0x27   :  { %3592 = vst [vmem:[#allocation20_spill] sm:$0xff] %v2928_v23  ;;  %v277_v31 = vsub.f32 %v2907_v15, %v2928_v23  ;;  %v283_v32 = vsub.f32 %v2910_v16, %v2931_v24  ;;  %v289_v33 = vsub.f32 %v2913_v17, %v2935_v25  ;;  %380 = vmatpush.msra.mxu3 %v2910_v16  ;;  %v2977_v45 = vand.u32 4294901760, %v2945_v29 }
  0x28   :  { %3593 = vst [vmem:[#allocation21_spill] sm:$0xff] %v2931_v24  ;;  %221 = vmatpush.bf16.msra.mxu0 %v2526_v11  ;;  %238 = vmatpush.msra.mxu1 %v2898_v7  ;;  %v295_v39 = vsub.f32 %v2917_v19, %v2939_v27  ;;  %v301_v42 = vsub.f32 %v2920_v20, %v2942_v28  ;;  %v2979_v46 = vand.u32 4294901760, %v144_v36  ;;  %v2981_v47 = vand.u32 4294901760, %v143_v41 }
  0x29   :  { %3594 = vst [vmem:[#allocation22_spill] sm:$0xff] %v2935_v25  ;;  %v2960_v37 = vand.u32 4294901760, %v277_v31  ;;  %v2962_v38 = vand.u32 4294901760, %v283_v32  ;;  %383 = vmatpush.msra.mxu3 %v2913_v17  ;;  %v2974_v44 = vand.u32 4294901760, %v289_v33  ;;  %v2985_v49 = vand.u32 4294901760, %v2968_v40 }
  0x2a   :  { %3595 = vst [vmem:[#allocation23_spill] sm:$0xff] %v2939_v27  ;;  %240 = vmatpush.msra.mxu1 %v2900_v12  ;;  %v2988_v50 = vand.u32 4294901760, %v142_v48  ;;  %v2991_v51 = vand.u32 4294901760, %v295_v39  ;;  %v307_v52 = vsub.f32 %v2923_v21, %v2957_v35  ;;  %v2996_v53 = vsub.f32 %v144_v36, %v2979_v46 }
  0x2b   :  { %3596 = vst [vmem:[#allocation24_spill] sm:$0xff] %v2942_v28  ;;  %279 = vmatpush.msra.mxu2 %v2960_v37  ;;  %386 = vmatpush.msra.mxu3 %v2917_v19  ;;  %v2999_v54 = vsub.f32 %v143_v41, %v2981_v47  ;;  %v3003_v56 = vand.u32 4294901760, %v141_v55  ;;  %v3006_v58 = vand.u32 4294901760, %v301_v42  ;;  %v313_v59 = vsub.f32 %v2945_v29, %v2977_v45  ;;  %v137_v41 = vld [vmem:[#allocation13] sm:$0xff] }
  0x2c   :  { %3597 = vst [vmem:[#allocation25_spill] sm:$0xff] %v2957_v35  ;;  %222 = vmatpush.bf16.msra.mxu0 %v2525_v30  ;;  %242 = vmatpush.msra.mxu1 %v2902_v13  ;;  %v3011_v60 = vand.u32 4294901760, %v2996_v53  ;;  %v3014_v61 = vsub.f32 %v142_v48, %v2988_v50  ;;  %v319_v63 = vsub.f32 %v2968_v40, %v2985_v49  ;;  %v3020_v0 = vand.u32 4294901760, %v140_v62  ;;  %v138_v30 = vld [vmem:[#allocation13 + $0x8] sm:$0xff] }
  0x2d   :  { %3598 = vst [vmem:[#allocation26_spill] sm:$0xff] %v2977_v45  ;;  %285 = vmatpush.msra.mxu2 %v2962_v38  ;;  %389 = vmatpush.msra.mxu3 %v2920_v20  ;;  %v3023_v1 = vand.u32 4294901760, %v307_v52  ;;  %v3026_v2 = vand.u32 4294901760, %v2999_v54  ;;  %v3029_v3 = vsub.f32 %v141_v55, %v3003_v56  ;;  %v3033_v8 = vand.u32 4294901760, %v139_v4  ;;  %v3065_v48 = vld [vmem:[#allocation2] sm:$0xff] }
  0x2e   :  { %3599 = vst [vmem:[#allocation27_spill] sm:$0xff] %v2985_v49  ;;  %244 = vmatpush.msra.mxu1 %v2904_v14  ;;  %v3036_v10 = vand.u32 4294901760, %v313_v59  ;;  %v325_v11 = vsub.f32 %v2996_v53, %v3011_v60  ;;  %v3041_v18 = vand.u32 4294901760, %v3014_v61  ;;  %v3044_v26 = vsub.f32 %v140_v62, %v3020_v0 }
  0x2f   :  { %3600 = vst [vmem:[#allocation28_spill] sm:$0xff] %v2999_v54  ;;  %291 = vmatpush.msra.mxu2 %v2974_v44  ;;  %392 = vmatpush.msra.mxu3 %v2923_v21  ;;  %v3046_v31 = vand.u32 4294901760, %v319_v63  ;;  %v331_v32 = vsub.f32 %v2999_v54, %v3026_v2  ;;  %v3054_v33 = vand.u32 4294901760, %v3029_v3  ;;  %v3057_v36 = vsub.f32 %v139_v4, %v3033_v8 }
  0x30   :  { %223 = vmatpush.bf16.msra.mxu0 %v2524_v43  ;;  %3601 = vst [vmem:[#allocation29_spill] sm:$0xff] %v3011_v60  ;;  %246 = vmatpush.msra.mxu1 %v2925_v22  ;;  %v3059_v39 = vand.u32 4294901760, %v138_v30  ;;  %v3063_v42 = vand.u32 4294901760, %v137_v41  ;;  %v2521_v43 = vld [vmem:[#allocation5] sm:$0xff]  ;;  %v3068_v52 = vand.u32 4294901760, %v325_v11  ;;  %v337_v55 = vsub.f32 %v3014_v61, %v3041_v18 }
  0x31   :  { %297 = vmatpush.msra.mxu2 %v2991_v51  ;;  %3602 = vst [vmem:[#allocation30_spill] sm:$0xff] %v3026_v2  ;;  %395 = vmatpush.msra.mxu3 %v2945_v29  ;;  %v3081_v62 = vand.u32 4294901760, %v331_v32  ;;  %v343_v63 = vsub.f32 %v3029_v3, %v3054_v33  ;;  %v3086_v4 = vand.u32 4294901760, %v3057_v36  ;;  %v153_v11 = vpack.c.bf16 %v3065_v48, %v3065_v48 }
  0x32   :  { %3603 = vst [vmem:[#allocation31_spill] sm:$0xff] %v3029_v3  ;;  %248 = vmatpush.msra.mxu1 %v2954_v34  ;;  %v3076_v59 = vsub.f32 %v138_v30, %v3059_v39  ;;  %v3096_v30 = vand.u32 4294901760, %v337_v55 }
  0x33   :  { %303 = vmatpush.msra.mxu2 %v3006_v58  ;;  %3604 = vst [vmem:[#allocation32_spill] sm:$0xff] %v3036_v10  ;;  %398 = vmatpush.msra.mxu3 %v2968_v40 }
  0x34   :  { %224 = vmatpush.bf16.msra.mxu0 %v2523_v57  ;;  %3605 = vst [vmem:[#allocation33_spill] sm:$0xff] %v3041_v18  ;;  %250 = vmatpush.msra.mxu1 %v2979_v46  ;;  %v3073_v57 = vand.u32 4294901760, %v3044_v26 }
  0x35   :  { %3606 = vst [vmem:[#allocation34_spill] sm:$0xff] %v3044_v26  ;;  %309 = vmatpush.msra.mxu2 %v3023_v1  ;;  %401 = vmatpush.msra.mxu3 %v2996_v53 }
  0x36   :  { %3607 = vst [vmem:[#allocation35_spill] sm:$0xff] %v3046_v31  ;;  %252 = vmatpush.msra.mxu1 %v2981_v47  ;;  %v349_v32 = vsub.f32 %v3044_v26, %v3073_v57 }
  0x37   :  { %3608 = vst [vmem:[#allocation36_spill] sm:$0xff] %v3054_v33  ;;  %315 = vmatpush.msra.mxu2 %v3036_v10  ;;  %404 = vmatpush.msra.mxu3 %v2999_v54  ;;  %v3101_v54 = vand.u32 4294901760, %v3076_v59 }
  0x38   :  { %3609 = vst [vmem:[#allocation37_spill] sm:$0xff] %v3057_v36  ;;  %225 = vmatpush.bf16.msra.mxu0 %v2522_v9  ;;  %254 = vmatpush.msra.mxu1 %v2988_v50  ;;  %v3089_v9 = vsub.f32 %v137_v41, %v3063_v42  ;;  %v3106_v41 = vand.u32 4294901760, %v343_v63 }
  0x39   :  { %3610 = vst [vmem:[#allocation38_spill] sm:$0xff] %v3073_v57  ;;  %321 = vmatpush.msra.mxu2 %v3046_v31  ;;  %407 = vmatpush.msra.mxu3 %v3014_v61  ;;  %v361_v63 = vsub.f32 %v3076_v59, %v3101_v54 }
  0x3a   :  { %3611 = vst [vmem:[#allocation39_spill] sm:$0xff] %v3076_v59  ;;  %256 = vmatpush.msra.mxu1 %v3003_v56  ;;  %v3111_v55 = vand.u32 4294901760, %v3089_v9 }
  0x3b   :  { %3612 = vst [vmem:[#allocation40_spill] sm:$0xff] %v3081_v62  ;;  %327 = vmatpush.msra.mxu2 %v3068_v52  ;;  %410 = vmatpush.msra.mxu3 %v3029_v3  ;;  %v3117_v3 = vand.u32 4294901760, %v349_v32  ;;  %v3133_v32 = vand.u32 4294901760, %v361_v63 }
  0x3c   :  { %3613 = vst [vmem:[#allocation41_spill] sm:$0xff] %v3086_v4  ;;  %226 = vmatpush.bf16.msra.mxu0 %v2521_v43  ;;  %v355_v43 = vsub.f32 %v3057_v36, %v3086_v4  ;;  %258 = vmatpush.msra.mxu1 %v3020_v0 }
  0x3d   :  { %3614 = vst [vmem:[#allocation42_spill] sm:$0xff] %v3089_v9  ;;  %333 = vmatpush.msra.mxu2 %v3081_v62  ;;  %413 = vmatpush.msra.mxu3 %v3044_v26  ;;  %v367_v26 = vsub.f32 %v3089_v9, %v3111_v55 }
  0x3e   :  { %3615 = vst [vmem:[#allocation43_spill] sm:$0xff] %v3096_v30  ;;  %260 = vmatpush.msra.mxu1 %v3033_v8 }
  0x3f   :  { %3616 = vst [vmem:[#allocation44_spill] sm:$0xff] %v3101_v54  ;;  %227 = vmatmul.bf16.vlgmr.msra.gmra.mxu0 %v153_v11  ;;  %339 = vmatpush.msra.mxu2 %v3096_v30  ;;  %v3125_v11 = vand.u32 4294901760, %v355_v43  ;;  %v3139_v43 = vand.u32 4294901760, %v367_v26  ;;  %v2607_v26 = vld [vmem:[#allocation11] ss:$0 sm:$0xff] }
  0x40   :  { %430 = vmatpush.msrb.mxu0 %v2894_v5  ;;  %3617 = vst [vmem:[#allocation45_spill] sm:$0xff] %v3106_v41  ;;  %416 = vmatpush.msra.mxu3 %v3057_v36 }
  0x41   :  { %3618 = vst [vmem:[#allocation46_spill] sm:$0xff] %v3111_v55  ;;  %345 = vmatpush.msra.mxu2 %v3106_v41  ;;  %262 = vmatpush.msra.mxu1 %v3059_v39 }
  0x42   :  { %432 = vmatpush.msrb.mxu0 %v2896_v6  ;;  %3619 = vst [vmem:[#allocation47_spill] sm:$0xff] %v3125_v11  ;;  %419 = vmatpush.msra.mxu3 %v3076_v59 }
  0x43   :  { %351 = vmatpush.msra.mxu2 %v3117_v3  ;;  %3620 = vst [vmem:[#allocation48_spill] sm:$0xff] %v3133_v32  ;;  %264 = vmatpush.msra.mxu1 %v3063_v42 }
  0x44   :  { %434 = vmatpush.msrb.mxu0 %v2898_v7  ;;  %422 = vmatpush.msra.mxu3 %v3089_v9  ;;  %3621 = vst [vmem:[#allocation49_spill] sm:$0xff] %v3139_v43 }
  0x45   :  { %357 = vmatpush.msra.mxu2 %v3125_v11  ;;  %471 = vmatpush.msrb.mxu1 %v2928_v23 }
  0x46   :  { %436 = vmatpush.msrb.mxu0 %v2900_v12  ;;  %576 = vmatpush.msrb.mxu3 %v2894_v5 }
  0x47   :  { %363 = vmatpush.msra.mxu2 %v3133_v32  ;;  %475 = vmatpush.msrb.mxu1 %v2931_v24 }
  0x48   :  { %438 = vmatpush.msrb.mxu0 %v2902_v13  ;;  %578 = vmatpush.msrb.mxu3 %v2896_v6 }
  0x49   :  { %369 = vmatpush.msra.mxu2 %v3139_v43  ;;  %479 = vmatpush.msrb.mxu1 %v2935_v25 }
  0x4a   :  { %440 = vmatpush.msrb.mxu0 %v2904_v14  ;;  %580 = vmatpush.msrb.mxu3 %v2898_v7 }
  0x4b   :  { %538 = vmatpush.msrb.mxu2 %v2894_v5  ;;  %483 = vmatpush.msrb.mxu1 %v2939_v27 }
  0x4c   :  { %442 = vmatpush.msrb.mxu0 %v2925_v22  ;;  %582 = vmatpush.msrb.mxu3 %v2900_v12 }
  0x4d   :  { %540 = vmatpush.msrb.mxu2 %v2896_v6  ;;  %487 = vmatpush.msrb.mxu1 %v2942_v28 }
  0x4e   :  { %444 = vmatpush.msrb.mxu0 %v2954_v34  ;;  %584 = vmatpush.msrb.mxu3 %v2902_v13 }
  0x4f   :  { %542 = vmatpush.msrb.mxu2 %v2898_v7  ;;  %491 = vmatpush.msrb.mxu1 %v2957_v35 }
  0x50   :  { %446 = vmatpush.msrb.mxu0 %v2979_v46  ;;  %586 = vmatpush.msrb.mxu3 %v2904_v14 }
  0x51   :  { %544 = vmatpush.msrb.mxu2 %v2900_v12  ;;  %495 = vmatpush.msrb.mxu1 %v2977_v45 }
  0x52   :  { %448 = vmatpush.msrb.mxu0 %v2981_v47  ;;  %588 = vmatpush.msrb.mxu3 %v2925_v22 }
  0x53   :  { %546 = vmatpush.msrb.mxu2 %v2902_v13  ;;  %499 = vmatpush.msrb.mxu1 %v2985_v49 }
  0x54   :  { %450 = vmatpush.msrb.mxu0 %v2988_v50  ;;  %590 = vmatpush.msrb.mxu3 %v2954_v34 }
  0x55   :  { %548 = vmatpush.msrb.mxu2 %v2904_v14  ;;  %503 = vmatpush.msrb.mxu1 %v3011_v60 }
  0x56   :  { %452 = vmatpush.msrb.mxu0 %v3003_v56  ;;  %592 = vmatpush.msrb.mxu3 %v2979_v46 }
  0x57   :  { %550 = vmatpush.msrb.mxu2 %v2925_v22  ;;  %507 = vmatpush.msrb.mxu1 %v3026_v2 }
  0x58   :  { %454 = vmatpush.msrb.mxu0 %v3020_v0  ;;  %594 = vmatpush.msrb.mxu3 %v2981_v47 }
  0x59   :  { %552 = vmatpush.msrb.mxu2 %v2954_v34  ;;  %511 = vmatpush.msrb.mxu1 %v3041_v18 }
  0x5a   :  { %456 = vmatpush.msrb.mxu0 %v3033_v8  ;;  %596 = vmatpush.msrb.mxu3 %v2988_v50 }
  0x5b   :  { %554 = vmatpush.msrb.mxu2 %v2979_v46  ;;  %515 = vmatpush.msrb.mxu1 %v3054_v33 }
  0x5c   :  { %458 = vmatpush.msrb.mxu0 %v3059_v39  ;;  %598 = vmatpush.msrb.mxu3 %v3003_v56 }
  0x5d   :  { %556 = vmatpush.msrb.mxu2 %v2981_v47  ;;  %519 = vmatpush.msrb.mxu1 %v3073_v57 }
  0x5e   :  { %460 = vmatpush.msrb.mxu0 %v3063_v42  ;;  %600 = vmatpush.msrb.mxu3 %v3020_v0 }
  0x5f   :  { %558 = vmatpush.msrb.mxu2 %v2988_v50  ;;  %523 = vmatpush.msrb.mxu1 %v3086_v4 }
  0x60   :  { %621 = vmatpush.msra.mxu0 %v2960_v37  ;;  %602 = vmatpush.msrb.mxu3 %v3033_v8 }
  0x61   :  { %560 = vmatpush.msrb.mxu2 %v3003_v56  ;;  %527 = vmatpush.msrb.mxu1 %v3101_v54 }
  0x62   :  { %627 = vmatpush.msra.mxu0 %v2962_v38  ;;  %604 = vmatpush.msrb.mxu3 %v3059_v39 }
  0x63   :  { %562 = vmatpush.msrb.mxu2 %v3020_v0  ;;  %531 = vmatpush.msrb.mxu1 %v3111_v55 }
  0x64   :  { %633 = vmatpush.msra.mxu0 %v2974_v44  ;;  %606 = vmatpush.msrb.mxu3 %v3063_v42 }
  0x65   :  { %564 = vmatpush.msrb.mxu2 %v3033_v8 }
  0x66   :  { %639 = vmatpush.msra.mxu0 %v2991_v51 }
  0x67   :  { %566 = vmatpush.msrb.mxu2 %v3059_v39 }
  0x68   :  { %645 = vmatpush.msra.mxu0 %v3006_v58 }
  0x69   :  { %568 = vmatpush.msrb.mxu2 %v3063_v42 }
  0x6a   :  { %651 = vmatpush.msra.mxu0 %v3023_v1 }
  0x6c   :  { %657 = vmatpush.msra.mxu0 %v3036_v10 }
  0x6e   :  { %663 = vmatpush.msra.mxu0 %v3046_v31 }
  0x70   :  { %669 = vmatpush.msra.mxu0 %v3068_v52 }
  0x72   :  { %675 = vmatpush.msra.mxu0 %v3081_v62 }
  0x74   :  { %681 = vmatpush.msra.mxu0 %v3096_v30 }
  0x76   :  { %687 = vmatpush.msra.mxu0 %v3106_v41 }
  0x78   :  { %693 = vmatpush.msra.mxu0 %v3117_v3 }
  0x7a   :  { %699 = vmatpush.msra.mxu0 %v3125_v11 }
  0x7c   :  { %705 = vmatpush.msra.mxu0 %v3133_v32 }
  0x7e   :  { %711 = vmatpush.msra.mxu0 %v3139_v43 }
  0xbc   :  { %v228_v63 = vpop.f32.mrf.mxu0 }
  0xbd   :  { %v229_v10 = vadd.f32 %v2607_v26, %v228_v63 }
  0xbf   :  { %v3219_v31 = vadd.f32 %v229_v10, %v3065_v48 }
  0xc1   :  { %v574_v62 = vmul.f32 %v3219_v31, %v3219_v31  ;;  %v265_v30 = vand.u32 4294901760, %v3219_v31 }
  0xc3   :  { %v3224_v41 = vand.u32 4294901760, %v574_v62  ;;  %371 = vmatmul.f32.vlgmr.msra.gmra.mxu2 %v265_v30  ;;  %v266_v11 = vsub.f32 %v3219_v31, %v265_v30 }
  0xc4   :  { %772 = vmatpush.msra.mxu2 %v2894_v5  ;;  %v230_v32 = vpop.f32.mrf.mxu0 }
  0xc5   :  { %425 = vmatmul.f32.vlgmr.msra.gmra.mxu3 %v266_v11  ;;  %v267_v43 = vand.u32 4294901760, %v266_v11  ;;  %v3229_v26 = vsub.f32 %v574_v62, %v3224_v41 }
  0xc6   :  { %774 = vmatpush.msra.mxu2 %v2896_v6  ;;  %813 = vmatpush.msra.mxu3 %v2928_v23 }
  0xc7   :  { %464 = vmatmul.f32.vlgmr.msrb.gmra.mxu0 %v267_v43  ;;  %v268_v10 = vsub.f32 %v266_v11, %v267_v43  ;;  %v609_v48 = vand.u32 4294901760, %v3229_v26  ;;  %v3623_v11 = vld [vmem:[#allocation31_spill] sm:$0xff]  ;;  %v3624_v43 = vld [vmem:[#allocation34_spill] sm:$0xff] }
  0xc8   :  { %776 = vmatpush.msra.mxu2 %v2898_v7  ;;  %817 = vmatpush.msra.mxu3 %v2931_v24 }
  0xc9   :  { %880 = vmatpush.msrb.mxu0 %v2894_v5  ;;  %v269_v32 = vand.u32 4294901760, %v268_v10  ;;  %v610_v63 = vsub.f32 %v3229_v26, %v609_v48  ;;  %v2379_v10 = vld [vmem:[#allocation7 + $0xe0] sm:$0xf] }
  0xca   :  { %778 = vmatpush.msra.mxu2 %v2900_v12  ;;  %821 = vmatpush.msra.mxu3 %v2935_v25  ;;  %v2554_v25 = vld [vmem:[#allocation7 + $0xcc] sm:$0xf] }
  0xcb   :  { %882 = vmatpush.msrb.mxu0 %v2896_v6  ;;  %270 = vmatmul.f32.vlgmr.msra.gmra.mxu1 %v269_v32  ;;  %v611_v62 = vand.u32 4294901760, %v610_v63  ;;  %v2557_v32 = vld [vmem:[#allocation7 + $0xe4] sm:$0xf] }
  0xcc   :  { %570 = vmatmul.f32.vlgmr.msrb.gmra.mxu2 %v265_v30  ;;  %719 = vmatpush.msra.mxu1 %v2907_v15 }
  0xcd   :  { %780 = vmatpush.msra.mxu2 %v2902_v13  ;;  %825 = vmatpush.msra.mxu3 %v2939_v27 }
  0xce   :  { %884 = vmatpush.msrb.mxu0 %v2898_v7  ;;  %612 = vmatmul.f32.vlgmr.msrb.gmra.mxu3 %v611_v62  ;;  %v2381_v62 = vld [vmem:[#allocation7 + $0xf0] sm:$0xf0] }
  0xcf   :  { %722 = vmatpush.msra.mxu1 %v2910_v16  ;;  %782 = vmatpush.msra.mxu2 %v2904_v14 }
  0xd0   :  { %829 = vmatpush.msra.mxu3 %v2942_v28  ;;  %886 = vmatpush.msrb.mxu0 %v2900_v12  ;;  %v2556_v28 = vld [vmem:[#allocation7 + $0xd4] sm:$0xf0] }
  0xd1   :  { %713 = vmatmul.f32.vlgmr.msra.gmra.mxu0 %v3224_v41  ;;  %725 = vmatpush.msra.mxu1 %v2913_v17 }
  0xd2   :  { %784 = vmatpush.msra.mxu2 %v2925_v22  ;;  %833 = vmatpush.msra.mxu3 %v2957_v35  ;;  %v2371_v35 = vld [vmem:[#allocation7 + $0xc8] sm:$0xf] }
  0xd3   :  { %888 = vmatpush.msrb.mxu0 %v2902_v13  ;;  %728 = vmatpush.msra.mxu1 %v2917_v19  ;;  %v2372_v27 = vor.u32 %v2556_v28, %v2371_v35  ;;  %v2357_v28 = vld [vmem:[#allocation7 + $0xb8] sm:$0xf0] }
  0xd4   :  { %786 = vmatpush.msra.mxu2 %v2954_v34  ;;  %837 = vmatpush.msra.mxu3 %v2977_v45  ;;  %v2365_v45 = vld [vmem:[#allocation7 + $0xd0] sm:$0xf0] }
  0xd5   :  { %890 = vmatpush.msrb.mxu0 %v2904_v14  ;;  %533 = vmatmul.f32.vlgmr.msrb.gmra.mxu1 %v265_v30  ;;  %v3622_v30 = vld [vmem:[#allocation28_spill] sm:$0xff] }
  0xd6   :  { %731 = vmatpush.msra.mxu1 %v2920_v20  ;;  %788 = vmatpush.msra.mxu2 %v2979_v46 }
  0xd7   :  { %841 = vmatpush.msra.mxu3 %v2985_v49  ;;  %892 = vmatpush.msrb.mxu0 %v2925_v22  ;;  %v2553_v49 = vld [vmem:[#allocation7 + $0xc4] sm:$0xf] }
  0xd8   :  { %734 = vmatpush.msra.mxu1 %v2923_v21  ;;  %790 = vmatpush.msra.mxu2 %v2981_v47 }
  0xd9   :  { %845 = vmatpush.msra.mxu3 %v3011_v60  ;;  %894 = vmatpush.msrb.mxu0 %v2954_v34  ;;  %v2555_v60 = vld [vmem:[#allocation7 + $0xcc] sm:$0xf0] }
  0xda   :  { %737 = vmatpush.msra.mxu1 %v2945_v29  ;;  %792 = vmatpush.msra.mxu2 %v2988_v50 }
  0xdb   :  { %849 = vmatpush.msra.mxu3 %v3026_v2  ;;  %896 = vmatpush.msrb.mxu0 %v2979_v46 }
  0xdc   :  { %740 = vmatpush.msra.mxu1 %v2968_v40  ;;  %794 = vmatpush.msra.mxu2 %v3003_v56 }
  0xdd   :  { %853 = vmatpush.msra.mxu3 %v3041_v18  ;;  %898 = vmatpush.msrb.mxu0 %v2981_v47  ;;  %v2389_v18 = vld [vmem:[#allocation7 + $0xf8] sm:$0xf0] }
  0xde   :  { %743 = vmatpush.msra.mxu1 %v2996_v53  ;;  %796 = vmatpush.msra.mxu2 %v3020_v0 }
  0xdf   :  { %857 = vmatpush.msra.mxu3 %v3054_v33  ;;  %900 = vmatpush.msrb.mxu0 %v2988_v50  ;;  %v2558_v33 = vld [vmem:[#allocation7 + $0xec] sm:$0xf] }
  0xe0   :  { %746 = vmatpush.msra.mxu1 %v3622_v30  ;;  %798 = vmatpush.msra.mxu2 %v3033_v8  ;;  %v2392_v2 = vor.u32 %v2558_v33, %v2389_v18  ;;  %v2347_v18 = vld [vmem:[#allocation7 + $0xa0] sm:$0xf]  ;;  %v2551_v33 = vld [vmem:[#allocation7 + $0xac] sm:$0xf0] }
  0xe1   :  { %861 = vmatpush.msra.mxu3 %v3073_v57  ;;  %902 = vmatpush.msrb.mxu0 %v3003_v56 }
  0xe2   :  { %749 = vmatpush.msra.mxu1 %v3014_v61  ;;  %800 = vmatpush.msra.mxu2 %v3059_v39 }
  0xe3   :  { %865 = vmatpush.msra.mxu3 %v3086_v4  ;;  %904 = vmatpush.msrb.mxu0 %v3020_v0  ;;  %v2384_v4 = vor.u32 %v2557_v32, %v2381_v62  ;;  %v2373_v32 = vld [vmem:[#allocation7 + $0xd8] sm:$0xf0] }
  0xe4   :  { %752 = vmatpush.msra.mxu1 %v3623_v11  ;;  %802 = vmatpush.msra.mxu2 %v3063_v42 }
  0xe5   :  { %869 = vmatpush.msra.mxu3 %v3101_v54  ;;  %906 = vmatpush.msrb.mxu0 %v3033_v8  ;;  %v2560_v54 = vld [vmem:[#allocation7 + $0xf4] sm:$0xf0] }
  0xe6   :  { %806 = vmatmul.f32.vlgmr.msra.gmra.mxu2 %v609_v48  ;;  %755 = vmatpush.msra.mxu1 %v3624_v43  ;;  %v2559_v48 = vld [vmem:[#allocation7 + $0xec] sm:$0xf0] }
  0xe7   :  { %873 = vmatpush.msra.mxu3 %v3111_v55  ;;  %908 = vmatpush.msrb.mxu0 %v3059_v39  ;;  %v2380_v63 = vor.u32 %v2559_v48, %v2379_v10  ;;  %v2387_v55 = vld [vmem:[#allocation7 + $0xe8] sm:$0xf]  ;;  %v2368_v48 = vor.u32 %v2553_v49, %v2365_v45  ;;  %v2550_v45 = vld [vmem:[#allocation7 + $0xac] sm:$0xf] }
  0xe8   :  { %875 = vmatmul.f32.vlgmr.msra.gmra.mxu3 %v3224_v41  ;;  %758 = vmatpush.msra.mxu1 %v3057_v36  ;;  %v2388_v57 = vor.u32 %v2560_v54, %v2387_v55  ;;  %v2376_v54 = vor.u32 %v2554_v25, %v2373_v32  ;;  %v2360_v35 = vor.u32 %v2550_v45, %v2357_v28  ;;  %v2331_v25 = vld [vmem:[#allocation7 + $0x80] sm:$0xf]  ;;  %v2323_v28 = vld [vmem:[#allocation7 + $0x68] sm:$0xf]  ;;  %v2536_v36 = vld [vmem:[#allocation7 + $0x34] sm:$0xf0] }
  0xe9   :  { %910 = vmatpush.msrb.mxu0 %v3063_v42  ;;  %1152 = vmatpush.bf16.msrb.mxu2 %v2384_v4  ;;  %v2348_v4 = vor.u32 %v2551_v33, %v2347_v18  ;;  %v2339_v18 = vld [vmem:[#allocation7 + $0x88] sm:$0xf]  ;;  %v2548_v33 = vld [vmem:[#allocation7 + $0x94] sm:$0xf0] }
  0xea   :  { %912 = vmatmul.f32.vlgmr.msrb.gmra.mxu0 %v3224_v41  ;;  %761 = vmatpush.msra.mxu1 %v3076_v59  ;;  %v2363_v41 = vld [vmem:[#allocation7 + $0xc0] sm:$0xf]  ;;  %v2340_v23 = vor.u32 %v2548_v33, %v2339_v18  ;;  %v2325_v18 = vld [vmem:[#allocation7 + $0x78] sm:$0xf0] }
  0xeb   :  { %1165 = vmatpush.bf16.msrb.mxu3 %v2388_v57  ;;  %1178 = vmatpush.bf16.msra.mxu0 %v2392_v2  ;;  %v2549_v57 = vld [vmem:[#allocation7 + $0xa4] sm:$0xf]  ;;  %v2349_v2 = vld [vmem:[#allocation7 + $0xb0] sm:$0xf0] }
  0xec   :  { %764 = vmatpush.msra.mxu1 %v3089_v9 }
  0xed   :  { %767 = vmatmul.f32.vlgmr.msra.gmra.mxu1 %v3229_v26  ;;  %v2364_v26 = vor.u32 %v2555_v60, %v2363_v41  ;;  %1153 = vmatpush.bf16.msrb.mxu2 %v2368_v48  ;;  %v2355_v60 = vld [vmem:[#allocation7 + $0xa8] sm:$0xf]  ;;  %v2352_v41 = vor.u32 %v2549_v57, %v2349_v2  ;;  %v2546_v57 = vld [vmem:[#allocation7 + $0x8c] sm:$0xf]  ;;  %v2341_v2 = vld [vmem:[#allocation7 + $0x98] sm:$0xf0] }
  0xee   :  { %1139 = vmatpush.bf16.msrb.mxu1 %v2380_v63  ;;  %v2552_v63 = vld [vmem:[#allocation7 + $0xb4] sm:$0xf0] }
  0xef   :  { %1166 = vmatpush.bf16.msrb.mxu3 %v2372_v27  ;;  %1179 = vmatpush.bf16.msra.mxu0 %v2376_v54  ;;  %v2356_v24 = vor.u32 %v2552_v63, %v2355_v60  ;;  %v2547_v27 = vld [vmem:[#allocation7 + $0x8c] sm:$0xf0]  ;;  %v2333_v54 = vld [vmem:[#allocation7 + $0x90] sm:$0xf0]  ;;  %v2344_v60 = vor.u32 %v2546_v57, %v2341_v2  ;;  %v2315_v63 = vld [vmem:[#allocation7 + $0x60] sm:$0xf] }
  0xf0   :  { %v2332_v32 = vor.u32 %v2547_v27, %v2331_v25  ;;  %v2537_v57 = vld [vmem:[#allocation7 + $0x44] sm:$0xf] }
  0xf1   :  { %1154 = vmatpush.bf16.msrb.mxu2 %v2352_v41  ;;  %v2541_v41 = vld [vmem:[#allocation7 + $0x64] sm:$0xf] }
  0xf2   :  { %1140 = vmatpush.bf16.msrb.mxu1 %v2364_v26  ;;  %v2545_v26 = vld [vmem:[#allocation7 + $0x84] sm:$0xf] }
  0xf3   :  { %1167 = vmatpush.bf16.msrb.mxu3 %v2356_v24  ;;  %1180 = vmatpush.bf16.msra.mxu0 %v2360_v35  ;;  %v2336_v9 = vor.u32 %v2545_v26, %v2333_v54  ;;  %v2543_v24 = vld [vmem:[#allocation7 + $0x6c] sm:$0xf0]  ;;  %v2544_v35 = vld [vmem:[#allocation7 + $0x74] sm:$0xf0]  ;;  %v2542_v54 = vld [vmem:[#allocation7 + $0x6c] sm:$0xf] }
  0xf4   :  { %v2324_v26 = vor.u32 %v2544_v35, %v2323_v28  ;;  %v2309_v28 = vld [vmem:[#allocation7 + $0x58] sm:$0xf0] }
  0xf5   :  { %1155 = vmatpush.bf16.msrb.mxu2 %v2336_v9  ;;  %v2539_v9 = vld [vmem:[#allocation7 + $0x4c] sm:$0xf0] }
  0xf6   :  { %1141 = vmatpush.bf16.msrb.mxu1 %v2348_v4 }
  0xf7   :  { %1168 = vmatpush.bf16.msrb.mxu3 %v2340_v23  ;;  %1181 = vmatpush.bf16.msra.mxu0 %v2344_v60  ;;  %v2299_v23 = vld [vmem:[#allocation7 + $0x40] sm:$0xf]  ;;  %v2307_v60 = vld [vmem:[#allocation7 + $0x48] sm:$0xf] }
  0xfa   :  { %1142 = vmatpush.bf16.msrb.mxu1 %v2332_v32  ;;  %v2328_v32 = vor.u32 %v2542_v54, %v2325_v18  ;;  %v2535_v18 = vld [vmem:[#allocation7 + $0x2c] sm:$0xf0] }
  0xfb   :  { %1169 = vmatpush.bf16.msrb.mxu3 %v2324_v26  ;;  %v2283_v26 = vld [vmem:[#allocation7 + $0x20] sm:$0xf] }
  0xfc   :  { %1182 = vmatpush.bf16.msra.mxu0 %v2328_v32  ;;  %v2284_v32 = vor.u32 %v2535_v18, %v2283_v26  ;;  %v2532_v26 = vld [vmem:[#allocation7 + $0x14] sm:$0xf0]  ;;  %v2530_v18 = vld [vmem:[#allocation7 + $0xc] sm:$0xf] }
 0x144   :  { %v465_v49 = vpop.f32.mrf.mxu0 }
 0x146   :  { %v372_v55 = vpop.f32.mrf.mxu2 }
 0x148   :  { %v271_v10 = vpop.f32.mrf.mxu1  ;;  %v426_v62 = vpop.f32.mrf.mxu3 }
 0x149   :  { %v373_v48 = vadd.f32 %v372_v55, %v271_v10  ;;  %v2316_v10 = vor.u32 %v2543_v24, %v2315_v63  ;;  %v2317_v55 = vld [vmem:[#allocation7 + $0x70] sm:$0xf0]  ;;  %v2540_v63 = vld [vmem:[#allocation7 + $0x54] sm:$0xf0] }
 0x14a   :  { %v2320_v27 = vor.u32 %v2541_v41, %v2317_v55  ;;  %v2308_v41 = vor.u32 %v2540_v63, %v2307_v60  ;;  %v2538_v55 = vld [vmem:[#allocation7 + $0x4c] sm:$0xf] }
 0x14b   :  { %v427_v45 = vadd.f32 %v426_v62, %v373_v48  ;;  %1143 = vmatpush.bf16.msrb.mxu1 %v2316_v10  ;;  %v2300_v62 = vor.u32 %v2539_v9, %v2299_v23  ;;  %v2301_v48 = vld [vmem:[#allocation7 + $0x50] sm:$0xf0]  ;;  %v2312_v54 = vor.u32 %v2538_v55, %v2309_v28  ;;  %v2291_v9 = vld [vmem:[#allocation7 + $0x28] sm:$0xf]  ;;  %v2534_v63 = vld [vmem:[#allocation7 + $0x2c] sm:$0xf] }
 0x14c   :  { %1156 = vmatpush.bf16.msrb.mxu2 %v2320_v27  ;;  %v2304_v59 = vor.u32 %v2537_v57, %v2301_v48  ;;  %1170 = vmatpush.bf16.msrb.mxu3 %v2308_v41  ;;  %v2285_v23 = vld [vmem:[#allocation7 + $0x30] sm:$0xf0]  ;;  %v2292_v60 = vor.u32 %v2536_v36, %v2291_v9  ;;  %v2529_v41 = vld [vmem:[#allocation7 + $0x4] sm:$0xf] }
 0x14d   :  { %v466_v2 = vadd.f32 %v465_v49, %v427_v45  ;;  %v2533_v49 = vld [vmem:[#allocation7 + $0x24] sm:$0xf]  ;;  %1183 = vmatpush.bf16.msra.mxu0 %v2312_v54  ;;  %v2269_v55 = vld [vmem:[#allocation7 + $0x10] sm:$0xf0] }
 0x14e   :  { %v714_v24 = vpop.f32.mrf.mxu0  ;;  %v2288_v48 = vor.u32 %v2533_v49, %v2285_v23  ;;  %v2272_v54 = vor.u32 %v2529_v41, %v2269_v55  ;;  %v2277_v23 = vld [vmem:[#allocation7 + $0x18] sm:$0xf0]  ;;  %v2583_v41 = vld [vmem:[#allocation8 + $0xb0] sm:$0xff]  ;;  %v2566_v55 = vld [vmem:[#allocation8 + $0x28] sm:$0xff] }
 0x14f   :  { %v571_v25 = vpop.f32.mrf.mxu2  ;;  %1144 = vmatpush.bf16.msrb.mxu1 %v2300_v62 }
 0x150   :  { %1157 = vmatpush.bf16.msrb.mxu2 %v2304_v59  ;;  %1171 = vmatpush.bf16.msrb.mxu3 %v2292_v60 }
 0x151   :  { %v613_v33 = vpop.f32.mrf.mxu3 }
 0x152   :  { %v534_v4 = vpop.f32.mrf.mxu1  ;;  %v715_v10 = vadd.f32 %v714_v24, %v613_v33  ;;  %v2267_v33 = vld [vmem:[#allocation7] sm:$0xf]  ;;  %v2531_v24 = vld [vmem:[#allocation7 + $0xc] sm:$0xf0] }
 0x153   :  { %v535_v35 = vadd.f32 %v534_v4, %v466_v2  ;;  %v2293_v4 = vld [vmem:[#allocation7 + $0x38] sm:$0xf0]  ;;  %1145 = vmatpush.bf16.msrb.mxu1 %v2284_v32 }
 0x154   :  { %v2296_v59 = vor.u32 %v2534_v63, %v2293_v4  ;;  %1158 = vmatpush.bf16.msrb.mxu2 %v2288_v48  ;;  %v2592_v48 = vld [vmem:[#allocation8 + $0xf8] sm:$0xff] }
 0x155   :  { %v3300_v2 = vadd.f32 %v571_v25, %v535_v35  ;;  %v2280_v35 = vor.u32 %v2530_v18, %v2277_v23  ;;  %v2576_v63 = vld [vmem:[#allocation8 + $0x78] sm:$0xff] }
 0x156   :  { %1184 = vmatpush.bf16.msra.mxu0 %v2296_v59  ;;  %v2584_v4 = vld [vmem:[#allocation8 + $0xb8] sm:$0xff] }
 0x158   :  { %1159 = vmatpush.bf16.msrb.mxu2 %v2272_v54  ;;  %v2582_v54 = vld [vmem:[#allocation8 + $0xa8] sm:$0xff] }
 0x15a   :  { %1185 = vmatpush.bf16.msra.mxu0 %v2280_v35  ;;  %v2564_v35 = vld [vmem:[#allocation8 + $0x18] sm:$0xff] }
 0x15c   :  { %1469 = vmatpush.bf16.msra.mxu2 %v2576_v63  ;;  %v2587_v63 = vld [vmem:[#allocation8 + $0xd0] sm:$0xff] }
 0x15e   :  { %1495 = vmatpush.bf16.msrb.mxu0 %v2592_v48 }
 0x167   :  { %v913_v25 = vpop.f32.mrf.mxu0 }
 0x169   :  { %v807_v57 = vpop.f32.mrf.mxu2 }
 0x16a   :  { %v768_v27 = vpop.f32.mrf.mxu1 }
 0x16b   :  { %v769_v45 = vadd.f32 %v768_v27, %v715_v10  ;;  %v876_v28 = vpop.f32.mrf.mxu3  ;;  %v2268_v10 = vor.u32 %v2531_v24, %v2267_v33  ;;  %v2275_v27 = vld [vmem:[#allocation7 + $0x8] sm:$0xf]  ;;  %v2567_v33 = vld [vmem:[#allocation8 + $0x30] sm:$0xff] }
 0x16c   :  { %v2276_v49 = vor.u32 %v2532_v26, %v2275_v27  ;;  %v2575_v24 = vld [vmem:[#allocation8 + $0x70] sm:$0xff]  ;;  %v2565_v27 = vld [vmem:[#allocation8 + $0x20] sm:$0xff] }
 0x16d   :  { %v808_v62 = vadd.f32 %v807_v57, %v769_v45  ;;  %v916_v45 = vmul.f32 %v3300_v2, %v3300_v2  ;;  %1146 = vmatpush.bf16.msrb.mxu1 %v2268_v10  ;;  %v2568_v57 = vld [vmem:[#allocation8 + $0x38] sm:$0xff]  ;;  %1470 = vmatpush.bf16.msra.mxu2 %v2575_v24  ;;  %v2574_v10 = vld [vmem:[#allocation8 + $0x68] sm:$0xff]  ;;  %v2589_v26 = vld [vmem:[#allocation8 + $0xe0] sm:$0xff] }
 0x16e   :  { %1172 = vmatpush.bf16.msrb.mxu3 %v2276_v49  ;;  %v2581_v49 = vld [vmem:[#allocation8 + $0xa0] sm:$0xff] }
 0x16f   :  { %v877_v36 = vadd.f32 %v876_v28, %v808_v62  ;;  %v2591_v62 = vld [vmem:[#allocation8 + $0xf0] sm:$0xff]  ;;  %v2590_v28 = vld [vmem:[#allocation8 + $0xe8] sm:$0xff] }
 0x170   :  { %1496 = vmatpush.bf16.msrb.mxu0 %v2591_v62  ;;  %v2608_v62 = vld [vmem:[#allocation11 + $0x1] ss:$0 sm:$0xff] }
 0x171   :  { %v914_v32 = vadd.f32 %v913_v25, %v877_v36  ;;  %1456 = vmatpush.bf16.msra.mxu1 %v2568_v57  ;;  %1471 = vmatpush.bf16.msra.mxu2 %v2574_v10  ;;  %v2573_v36 = vld [vmem:[#allocation8 + $0x60] sm:$0xff] }
 0x172   :  { %1482 = vmatpush.bf16.msra.mxu3 %v2584_v4 }
 0x173   :  { %v917_v9 = vsub.f32 %v914_v32, %v916_v45  ;;  %v2588_v45 = vld [vmem:[#allocation8 + $0xd8] sm:$0xff] }
 0x174   :  { %1497 = vmatpush.bf16.msrb.mxu0 %v2590_v28  ;;  %v2572_v32 = vld [vmem:[#allocation8 + $0x58] sm:$0xff] }
 0x175   :  { %v918_v60 = vmax.f32 %v917_v9, 0.0  ;;  %1457 = vmatpush.bf16.msra.mxu1 %v2567_v33  ;;  %1472 = vmatpush.bf16.msra.mxu2 %v2573_v36  ;;  %v2580_v9 = vld [vmem:[#allocation8 + $0x98] sm:$0xff]  ;;  %v919_v33 = vsub.f32 %v3219_v31, %v3300_v2  ;;  %v2571_v31 = vld [vmem:[#allocation8 + $0x50] sm:$0xff]  ;;  %v2570_v36 = vld [vmem:[#allocation8 + $0x48] sm:$0xff] }
 0x176   :  { %1483 = vmatpush.bf16.msra.mxu3 %v2583_v41  ;;  %v2579_v2 = vld [vmem:[#allocation8 + $0x90] sm:$0xff] }
 0x177   :  { %v920_v59 = vadd.f32 1e-05, %v918_v60  ;;  %v2563_v60 = vld [vmem:[#allocation8 + $0x10] sm:$0xff] }
 0x178   :  { %1498 = vmatpush.bf16.msrb.mxu0 %v2589_v26  ;;  %v2561_v26 = vld [vmem:[#allocation8] sm:$0xff] }
 0x179   :  { %2613 = vrsqrt.f32 %v920_v59  ;;  %1458 = vmatpush.bf16.msra.mxu1 %v2566_v55  ;;  %1473 = vmatpush.bf16.msra.mxu2 %v2572_v32  ;;  %vm927_vm1 = vweird.f32 %v920_v59  ;;  %v2609_v55 = vld [vmem:[#allocation11 + $0x2] ss:$0 sm:$0xff]  ;;  %v3626_v32 = vld [vmem:[#allocation35_spill] sm:$0xff] }
 0x17a   :  { %1484 = vmatpush.bf16.msra.mxu3 %v2582_v54 }
 0x17c   :  { %1499 = vmatpush.bf16.msrb.mxu0 %v2588_v45  ;;  %v969_v45 = vld [vmem:[#allocation10] sm:$0xf] }
 0x17d   :  { %1459 = vmatpush.bf16.msra.mxu1 %v2565_v27  ;;  %v2586_v27 = vld [vmem:[#allocation8 + $0xc8] sm:$0xff]  ;;  %1474 = vmatpush.bf16.msra.mxu2 %v2571_v31 }
 0x17e   :  { %1485 = vmatpush.bf16.msra.mxu3 %v2581_v49  ;;  %v2578_v49 = vld [vmem:[#allocation8 + $0x88] sm:$0xff] }
 0x17f   :  { %v2614_v18 = vpop.eup %2613 }
 0x180   :  { %v922_v23 = vmul.f32 %v2614_v18, %v920_v59  ;;  %vm928_vm0 = vweird.f32 %v2614_v18  ;;  %1500 = vmatpush.bf16.msrb.mxu0 %v2587_v63  ;;  %v2562_v59 = vld [vmem:[#allocation8 + $0x8] sm:$0xff] }
 0x181   :  { %1460 = vmatpush.bf16.msra.mxu1 %v2564_v35  ;;  %vm929_vm2 = vmor %vm927_vm1, %vm928_vm0  ;;  %1475 = vmatpush.bf16.msra.mxu2 %v2570_v36  ;;  %v3625_v35 = vld [vmem:[#allocation32_spill] sm:$0xff]  ;;  %v3628_v63 = vld [vmem:[#allocation43_spill] sm:$0xff] }
 0x182   :  { %v923_v25 = vmul.f32 %v2614_v18, %v922_v23  ;;  %1486 = vmatpush.bf16.msra.mxu3 %v2580_v9  ;;  %v2569_v23 = vld [vmem:[#allocation8 + $0x40] sm:$0xff]  ;;  %v971_v9 = vperm.slane %v969_v45, 0 }
 0x184   :  { %v924_v57 = vmul.f32 0.5, %v923_v25  ;;  %1501 = vmatpush.bf16.msrb.mxu0 %v2586_v27  ;;  %v2577_v25 = vld [vmem:[#allocation8 + $0x80] sm:$0xff] }
 0x185   :  { %1461 = vmatpush.bf16.msra.mxu1 %v2563_v60  ;;  %1476 = vmatpush.bf16.msra.mxu2 %v2569_v23 }
 0x186   :  { %v925_v48 = vsub.f32 1.5, %v924_v57  ;;  %1487 = vmatpush.bf16.msra.mxu3 %v2579_v2  ;;  %v974_v57 = vperm.slane %v969_v45, 3  ;;  %v3630_v2 = vld [vmem:[#allocation47_spill] sm:$0xff] }
 0x188   :  { %v926_v4 = vmul.f32 %v2614_v18, %v925_v48  ;;  %v3627_v48 = vld [vmem:[#allocation40_spill] sm:$0xff] }
 0x189   :  { %1462 = vmatpush.bf16.msra.mxu1 %v2562_v59 }
 0x18a   :  { %v930_v24 = vsel %vm929_vm2, %v2614_v18, %v926_v4  ;;  %v2585_v18 = vld [vmem:[#allocation8 + $0xc0] sm:$0xff]  ;;  %1488 = vmatpush.bf16.msra.mxu3 %v2578_v49 }
 0x18b   :  { %v931_v41 = vmul.f32 %v930_v24, %v919_v33  ;;  %1502 = vmatpush.bf16.msrb.mxu0 %v2585_v18  ;;  %v3629_v24 = vld [vmem:[#allocation45_spill] sm:$0xff] }
 0x18d   :  { %v933_v28 = vmul.f32 %v2608_v62, %v931_v41  ;;  %1463 = vmatpush.bf16.msra.mxu1 %v2561_v26  ;;  %v3631_v26 = vld [vmem:[#allocation37_spill] sm:$0xff] }
 0x18e   :  { %1489 = vmatpush.bf16.msra.mxu3 %v2577_v25  ;;  %v3632_v25 = vld [vmem:[#allocation48_spill] sm:$0xff] }
 0x18f   :  { %v3306_v10 = vadd.f32 %v2609_v55, %v933_v28  ;;  %v972_v55 = vperm.slane %v969_v45, 1 }
 0x191   :  { %v936_v54 = vpack.c.bf16 %v3306_v10, %v3306_v10 }
 0x193   :  { %1147 = vmatmul.bf16.vlgmr.msrb.gmra.mxu1 %v936_v54  ;;  %1160 = vmatmul.bf16.vlgmr.msrb.gmra.mxu2 %v936_v54 }
 0x194   :  { %1173 = vmatmul.bf16.vlgmr.msrb.gmra.mxu3 %v936_v54  ;;  %1186 = vmatmul.bf16.vlgmr.msra.gmra.mxu0 %v936_v54  ;;  %v973_v54 = vperm.slane %v969_v45, 2 }
 0x195   :  { %1706 = vmatpush.msra.mxu0 %v2894_v5  ;;  %1510 = vmatpush.msrb.mxu1 %v2894_v5 }
 0x196   :  { %1555 = vmatpush.msrb.mxu2 %v2960_v37  ;;  %1653 = vmatpush.msrb.mxu3 %v2907_v15 }
 0x197   :  { %1708 = vmatpush.msra.mxu0 %v2896_v6  ;;  %1512 = vmatpush.msrb.mxu1 %v2896_v6 }
 0x198   :  { %1561 = vmatpush.msrb.mxu2 %v2962_v38  ;;  %1656 = vmatpush.msrb.mxu3 %v2910_v16 }
 0x199   :  { %1710 = vmatpush.msra.mxu0 %v2898_v7  ;;  %1514 = vmatpush.msrb.mxu1 %v2898_v7 }
 0x19a   :  { %1567 = vmatpush.msrb.mxu2 %v2974_v44  ;;  %1659 = vmatpush.msrb.mxu3 %v2913_v17 }
 0x19b   :  { %1712 = vmatpush.msra.mxu0 %v2900_v12  ;;  %1516 = vmatpush.msrb.mxu1 %v2900_v12 }
 0x19c   :  { %1573 = vmatpush.msrb.mxu2 %v2991_v51  ;;  %1662 = vmatpush.msrb.mxu3 %v2917_v19 }
 0x19d   :  { %1714 = vmatpush.msra.mxu0 %v2902_v13  ;;  %1518 = vmatpush.msrb.mxu1 %v2902_v13 }
 0x19e   :  { %1579 = vmatpush.msrb.mxu2 %v3006_v58  ;;  %1665 = vmatpush.msrb.mxu3 %v2920_v20 }
 0x19f   :  { %1716 = vmatpush.msra.mxu0 %v2904_v14  ;;  %1520 = vmatpush.msrb.mxu1 %v2904_v14 }
 0x1a0   :  { %1585 = vmatpush.msrb.mxu2 %v3023_v1  ;;  %1668 = vmatpush.msrb.mxu3 %v2923_v21 }
 0x1a1   :  { %1718 = vmatpush.msra.mxu0 %v2925_v22  ;;  %1522 = vmatpush.msrb.mxu1 %v2925_v22 }
 0x1a2   :  { %1591 = vmatpush.msrb.mxu2 %v3625_v35  ;;  %1671 = vmatpush.msrb.mxu3 %v2945_v29 }
 0x1a3   :  { %1720 = vmatpush.msra.mxu0 %v2954_v34  ;;  %1524 = vmatpush.msrb.mxu1 %v2954_v34 }
 0x1a4   :  { %1597 = vmatpush.msrb.mxu2 %v3626_v32  ;;  %1674 = vmatpush.msrb.mxu3 %v2968_v40 }
 0x1a5   :  { %1722 = vmatpush.msra.mxu0 %v2979_v46  ;;  %1526 = vmatpush.msrb.mxu1 %v2979_v46 }
 0x1a6   :  { %1603 = vmatpush.msrb.mxu2 %v3068_v52  ;;  %1677 = vmatpush.msrb.mxu3 %v2996_v53 }
 0x1a7   :  { %1724 = vmatpush.msra.mxu0 %v2981_v47  ;;  %1528 = vmatpush.msrb.mxu1 %v2981_v47 }
 0x1a8   :  { %1609 = vmatpush.msrb.mxu2 %v3627_v48  ;;  %1680 = vmatpush.msrb.mxu3 %v3622_v30 }
 0x1a9   :  { %1726 = vmatpush.msra.mxu0 %v2988_v50  ;;  %1530 = vmatpush.msrb.mxu1 %v2988_v50 }
 0x1aa   :  { %1615 = vmatpush.msrb.mxu2 %v3628_v63  ;;  %1683 = vmatpush.msrb.mxu3 %v3014_v61 }
 0x1ab   :  { %1728 = vmatpush.msra.mxu0 %v3003_v56  ;;  %1532 = vmatpush.msrb.mxu1 %v3003_v56 }
 0x1ac   :  { %1621 = vmatpush.msrb.mxu2 %v3629_v24  ;;  %1686 = vmatpush.msrb.mxu3 %v3623_v11 }
 0x1ad   :  { %1730 = vmatpush.msra.mxu0 %v3020_v0  ;;  %1534 = vmatpush.msrb.mxu1 %v3020_v0 }
 0x1ae   :  { %1627 = vmatpush.msrb.mxu2 %v3117_v3  ;;  %1689 = vmatpush.msrb.mxu3 %v3624_v43 }
 0x1af   :  { %1732 = vmatpush.msra.mxu0 %v3033_v8  ;;  %1536 = vmatpush.msrb.mxu1 %v3033_v8 }
 0x1b0   :  { %1633 = vmatpush.msrb.mxu2 %v3630_v2  ;;  %1692 = vmatpush.msrb.mxu3 %v3631_v26 }
 0x1b1   :  { %1734 = vmatpush.msra.mxu0 %v3059_v39  ;;  %1538 = vmatpush.msrb.mxu1 %v3059_v39 }
 0x1b2   :  { %1639 = vmatpush.msrb.mxu2 %v3632_v25 }
 0x1b3   :  { %1736 = vmatpush.msra.mxu0 %v3063_v42  ;;  %1540 = vmatpush.msrb.mxu1 %v3063_v42 }
 0x210   :  { %v1148_v60 = vpop.f32.mrf.mxu1 }
 0x211   :  { %v1149_v4 = vadd.f32 %v1148_v60, %v971_v9  ;;  %v1187_v33 = vpop.f32.mrf.mxu0 }
 0x212   :  { %v1188_v62 = vadd.f32 %v1187_v33, %v974_v57  ;;  %v3633_v57 = vld [vmem:[#allocation39_spill] sm:$0xff]  ;;  %v3635_v33 = vld [vmem:[#allocation20_spill] sm:$0xff] }
 0x213   :  { %v1191_v41 = vmax.f32 %v1149_v4, 0.0  ;;  %1695 = vmatpush.msrb.mxu3 %v3633_v57  ;;  %v3634_v4 = vld [vmem:[#allocation49_spill] sm:$0xff] }
 0x214   :  { %v1194_v28 = vmax.f32 %v1188_v62, 0.0  ;;  %1645 = vmatpush.msrb.mxu2 %v3634_v4 }
 0x215   :  { %v1195_v59 = vpack.c.bf16 %v1191_v41, %v1191_v41  ;;  %v3636_v41 = vld [vmem:[#allocation42_spill] sm:$0xff] }
 0x216   :  { %v1198_v27 = vpack.c.bf16 %v1194_v28, %v1194_v28  ;;  %v1161_v31 = vpop.f32.mrf.mxu2  ;;  %1698 = vmatpush.msrb.mxu3 %v3636_v41  ;;  %v3637_v28 = vld [vmem:[#allocation21_spill] sm:$0xff] }
 0x217   :  { %v1162_v18 = vadd.f32 %v1161_v31, %v972_v55  ;;  %v1174_v36 = vpop.f32.mrf.mxu3  ;;  %1464 = vmatmul.bf16.vlgmr.msra.gmra.mxu1 %v1195_v59  ;;  %v3638_v59 = vld [vmem:[#allocation22_spill] sm:$0xff] }
 0x218   :  { %v1175_v49 = vadd.f32 %v1174_v36, %v973_v54  ;;  %1503 = vmatmul.bf16.vlgmr.msrb.gmra.mxu0 %v1198_v27  ;;  %v1150_v23 = vpop.f32.mrf.mxu1  ;;  %1747 = vmatpush.msra.mxu1 %v3635_v33  ;;  %v3651_v27 = vld [vmem:[#allocation46_spill] sm:$0xff] }
 0x219   :  { %v1192_v45 = vmax.f32 %v1162_v18, 0.0  ;;  %v1189_v9 = vpop.f32.mrf.mxu0  ;;  %1897 = vmatpush.msrb.mxu0 %v2960_v37  ;;  %v2610_v18 = vld [vmem:[#allocation11 + $0x3] ss:$0 sm:$0xff] }
 0x21a   :  { %v1193_v60 = vmax.f32 %v1175_v49, 0.0  ;;  %1751 = vmatpush.msra.mxu1 %v3637_v28 }
 0x21b   :  { %v1196_v62 = vpack.c.bf16 %v1192_v45, %v1192_v45  ;;  %1903 = vmatpush.msrb.mxu0 %v2962_v38  ;;  %v3639_v38 = vld [vmem:[#allocation23_spill] sm:$0xff] }
 0x21c   :  { %v1197_v55 = vpack.c.bf16 %v1193_v60, %v1193_v60  ;;  %1755 = vmatpush.msra.mxu1 %v3638_v59 }
 0x21d   :  { %1477 = vmatmul.bf16.vlgmr.msra.gmra.mxu2 %v1196_v62  ;;  %1909 = vmatpush.msrb.mxu0 %v2974_v44  ;;  %v3640_v44 = vld [vmem:[#allocation24_spill] sm:$0xff] }
 0x21e   :  { %1490 = vmatmul.bf16.vlgmr.msra.gmra.mxu3 %v1197_v55  ;;  %v1163_v54 = vpop.f32.mrf.mxu2  ;;  %1814 = vmatpush.msra.mxu2 %v2894_v5 }
 0x21f   :  { %v1176_v37 = vpop.f32.mrf.mxu3  ;;  %1852 = vmatpush.msra.mxu3 %v2894_v5  ;;  %1915 = vmatpush.msrb.mxu0 %v2991_v51  ;;  %v3641_v51 = vld [vmem:[#allocation25_spill] sm:$0xff] }
 0x220   :  { %1816 = vmatpush.msra.mxu2 %v2896_v6  ;;  %1759 = vmatpush.msra.mxu1 %v3639_v38 }
 0x221   :  { %1854 = vmatpush.msra.mxu3 %v2896_v6  ;;  %1921 = vmatpush.msrb.mxu0 %v3006_v58  ;;  %v3642_v58 = vld [vmem:[#allocation26_spill] sm:$0xff] }
 0x222   :  { %1818 = vmatpush.msra.mxu2 %v2898_v7  ;;  %1763 = vmatpush.msra.mxu1 %v3640_v44 }
 0x223   :  { %1856 = vmatpush.msra.mxu3 %v2898_v7  ;;  %1927 = vmatpush.msrb.mxu0 %v3023_v1  ;;  %v3643_v1 = vld [vmem:[#allocation27_spill] sm:$0xff] }
 0x224   :  { %1820 = vmatpush.msra.mxu2 %v2900_v12  ;;  %1767 = vmatpush.msra.mxu1 %v3641_v51 }
 0x225   :  { %1858 = vmatpush.msra.mxu3 %v2900_v12  ;;  %1933 = vmatpush.msrb.mxu0 %v3625_v35  ;;  %v3644_v35 = vld [vmem:[#allocation29_spill] sm:$0xff] }
 0x226   :  { %1822 = vmatpush.msra.mxu2 %v2902_v13  ;;  %1771 = vmatpush.msra.mxu1 %v3642_v58 }
 0x227   :  { %1860 = vmatpush.msra.mxu3 %v2902_v13  ;;  %1939 = vmatpush.msrb.mxu0 %v3626_v32  ;;  %v3645_v32 = vld [vmem:[#allocation30_spill] sm:$0xff] }
 0x228   :  { %1824 = vmatpush.msra.mxu2 %v2904_v14  ;;  %1775 = vmatpush.msra.mxu1 %v3643_v1 }
 0x229   :  { %1862 = vmatpush.msra.mxu3 %v2904_v14  ;;  %1945 = vmatpush.msrb.mxu0 %v3068_v52  ;;  %v3646_v52 = vld [vmem:[#allocation33_spill] sm:$0xff] }
 0x22a   :  { %1826 = vmatpush.msra.mxu2 %v2925_v22  ;;  %1779 = vmatpush.msra.mxu1 %v3644_v35 }
 0x22b   :  { %1864 = vmatpush.msra.mxu3 %v2925_v22  ;;  %1951 = vmatpush.msrb.mxu0 %v3627_v48  ;;  %v3647_v48 = vld [vmem:[#allocation36_spill] sm:$0xff] }
 0x22c   :  { %1828 = vmatpush.msra.mxu2 %v2954_v34  ;;  %1783 = vmatpush.msra.mxu1 %v3645_v32 }
 0x22d   :  { %1866 = vmatpush.msra.mxu3 %v2954_v34  ;;  %1957 = vmatpush.msrb.mxu0 %v3628_v63  ;;  %v3648_v63 = vld [vmem:[#allocation38_spill] sm:$0xff] }
 0x22e   :  { %1830 = vmatpush.msra.mxu2 %v2979_v46  ;;  %1787 = vmatpush.msra.mxu1 %v3646_v52 }
 0x22f   :  { %1868 = vmatpush.msra.mxu3 %v2979_v46  ;;  %1963 = vmatpush.msrb.mxu0 %v3629_v24  ;;  %v3649_v24 = vld [vmem:[#allocation41_spill] sm:$0xff] }
 0x230   :  { %1832 = vmatpush.msra.mxu2 %v2981_v47  ;;  %1791 = vmatpush.msra.mxu1 %v3647_v48 }
 0x231   :  { %1870 = vmatpush.msra.mxu3 %v2981_v47  ;;  %1969 = vmatpush.msrb.mxu0 %v3117_v3  ;;  %v3650_v3 = vld [vmem:[#allocation44_spill] sm:$0xff] }
 0x232   :  { %1834 = vmatpush.msra.mxu2 %v2988_v50  ;;  %1795 = vmatpush.msra.mxu1 %v3648_v63 }
 0x233   :  { %1872 = vmatpush.msra.mxu3 %v2988_v50  ;;  %1975 = vmatpush.msrb.mxu0 %v3630_v2 }
 0x234   :  { %1836 = vmatpush.msra.mxu2 %v3003_v56  ;;  %1799 = vmatpush.msra.mxu1 %v3649_v24 }
 0x235   :  { %1874 = vmatpush.msra.mxu3 %v3003_v56  ;;  %1981 = vmatpush.msrb.mxu0 %v3632_v25 }
 0x236   :  { %1838 = vmatpush.msra.mxu2 %v3020_v0  ;;  %1803 = vmatpush.msra.mxu1 %v3650_v3 }
 0x237   :  { %1876 = vmatpush.msra.mxu3 %v3020_v0  ;;  %1987 = vmatpush.msrb.mxu0 %v3634_v4 }
 0x238   :  { %1840 = vmatpush.msra.mxu2 %v3033_v8  ;;  %1807 = vmatpush.msra.mxu1 %v3651_v27 }
 0x239   :  { %1878 = vmatpush.msra.mxu3 %v3033_v8 }
 0x23a   :  { %1842 = vmatpush.msra.mxu2 %v3059_v39 }
 0x23b   :  { %1880 = vmatpush.msra.mxu3 %v3059_v39 }
 0x23c   :  { %1844 = vmatpush.msra.mxu2 %v3063_v42 }
 0x23d   :  { %1882 = vmatpush.msra.mxu3 %v3063_v42 }
 0x294   :  { %v1465_v31 = vpop.f32.mrf.mxu1 }
 0x295   :  { %v1504_v2 = vpop.f32.mrf.mxu0  ;;  %v1466_v23 = vadd.f32 %v2610_v18, %v1465_v31 }
 0x29c   :  { %v1467_v36 = vpop.f32.mrf.mxu1 }
 0x29d   :  { %v1506_v49 = vpop.f32.mrf.mxu0 }
 0x2a0   :  { %v1478_v25 = vpop.f32.mrf.mxu2 }
 0x2a1   :  { %v1479_v45 = vadd.f32 %v1478_v25, %v1466_v23  ;;  %v1491_v9 = vpop.f32.mrf.mxu3 }
 0x2a3   :  { %v1492_v60 = vadd.f32 %v1491_v9, %v1479_v45 }
 0x2a5   :  { %v1505_v4 = vadd.f32 %v1504_v2, %v1492_v60 }
 0x2a7   :  { %v3439_v62 = vadd.f32 %v1505_v4, %v3306_v10 }
 0x2a8   :  { %v1480_v55 = vpop.f32.mrf.mxu2 }
 0x2a9   :  { %v1850_v54 = vmul.f32 %v3439_v62, %v3439_v62  ;;  %v1493_v37 = vpop.f32.mrf.mxu3  ;;  %v1541_v41 = vand.u32 4294901760, %v3439_v62 }
 0x2ab   :  { %v3444_v57 = vand.u32 4294901760, %v1850_v54  ;;  %1647 = vmatmul.f32.vlgmr.msrb.gmra.mxu2 %v1541_v41  ;;  %v1542_v31 = vsub.f32 %v3439_v62, %v1541_v41 }
 0x2ac   :  { %2048 = vmatpush.msrb.mxu2 %v2894_v5 }
 0x2ad   :  { %1701 = vmatmul.f32.vlgmr.msrb.gmra.mxu3 %v1542_v31  ;;  %v1543_v18 = vand.u32 4294901760, %v1542_v31  ;;  %v3449_v2 = vsub.f32 %v1850_v54, %v3444_v57 }
 0x2ae   :  { %2050 = vmatpush.msrb.mxu2 %v2896_v6  ;;  %2089 = vmatpush.msrb.mxu3 %v3635_v33 }
 0x2af   :  { %1740 = vmatmul.f32.vlgmr.msra.gmra.mxu0 %v1543_v18  ;;  %v1544_v10 = vsub.f32 %v1542_v31, %v1543_v18  ;;  %v1885_v36 = vand.u32 4294901760, %v3449_v2 }
 0x2b0   :  { %2052 = vmatpush.msrb.mxu2 %v2898_v7  ;;  %2093 = vmatpush.msrb.mxu3 %v3637_v28 }
 0x2b1   :  { %2156 = vmatpush.msra.mxu0 %v2894_v5  ;;  %v1545_v49 = vand.u32 4294901760, %v1544_v10  ;;  %v1886_v23 = vsub.f32 %v3449_v2, %v1885_v36  ;;  %v3652_v5 = vld [vmem:[#allocation39_spill] sm:$0xff] }
 0x2b2   :  { %2054 = vmatpush.msrb.mxu2 %v2900_v12  ;;  %2097 = vmatpush.msrb.mxu3 %v3638_v59 }
 0x2b3   :  { %2158 = vmatpush.msra.mxu0 %v2896_v6  ;;  %1546 = vmatmul.f32.vlgmr.msrb.gmra.mxu1 %v1545_v49  ;;  %v1887_v33 = vand.u32 4294901760, %v1886_v23  ;;  %v3653_v6 = vld [vmem:[#allocation42_spill] sm:$0xff] }
 0x2b4   :  { %1846 = vmatmul.f32.vlgmr.msra.gmra.mxu2 %v1541_v41  ;;  %1995 = vmatpush.msrb.mxu1 %v2907_v15 }
 0x2b5   :  { %2056 = vmatpush.msrb.mxu2 %v2902_v13  ;;  %2101 = vmatpush.msrb.mxu3 %v3639_v38 }
 0x2b6   :  { %2160 = vmatpush.msra.mxu0 %v2898_v7  ;;  %1888 = vmatmul.f32.vlgmr.msra.gmra.mxu3 %v1887_v33 }
 0x2b7   :  { %1998 = vmatpush.msrb.mxu1 %v2910_v16  ;;  %2058 = vmatpush.msrb.mxu2 %v2904_v14 }
 0x2b8   :  { %2105 = vmatpush.msrb.mxu3 %v3640_v44  ;;  %2162 = vmatpush.msra.mxu0 %v2900_v12  ;;  %v2611_v44 = vld [vmem:[#allocation11 + $0x4] ss:$0 sm:$0xff] }
 0x2b9   :  { %1989 = vmatmul.f32.vlgmr.msrb.gmra.mxu0 %v3444_v57  ;;  %2001 = vmatpush.msrb.mxu1 %v2913_v17 }
 0x2ba   :  { %2060 = vmatpush.msrb.mxu2 %v2925_v22  ;;  %2109 = vmatpush.msrb.mxu3 %v3641_v51 }
 0x2bb   :  { %2164 = vmatpush.msra.mxu0 %v2902_v13  ;;  %2004 = vmatpush.msrb.mxu1 %v2917_v19 }
 0x2bc   :  { %2062 = vmatpush.msrb.mxu2 %v2954_v34  ;;  %2113 = vmatpush.msrb.mxu3 %v3642_v58 }
 0x2bd   :  { %2166 = vmatpush.msra.mxu0 %v2904_v14  ;;  %1809 = vmatmul.f32.vlgmr.msra.gmra.mxu1 %v1541_v41 }
 0x2be   :  { %2007 = vmatpush.msrb.mxu1 %v2920_v20  ;;  %2064 = vmatpush.msrb.mxu2 %v2979_v46 }
 0x2bf   :  { %2117 = vmatpush.msrb.mxu3 %v3643_v1  ;;  %2168 = vmatpush.msra.mxu0 %v2925_v22  ;;  %v2612_v1 = vld [vmem:[#allocation11 + $0x5] ss:$0 sm:$0xff] }
 0x2c0   :  { %2010 = vmatpush.msrb.mxu1 %v2923_v21  ;;  %2066 = vmatpush.msrb.mxu2 %v2981_v47 }
 0x2c1   :  { %2121 = vmatpush.msrb.mxu3 %v3644_v35  ;;  %2170 = vmatpush.msra.mxu0 %v2954_v34 }
 0x2c2   :  { %2013 = vmatpush.msrb.mxu1 %v2945_v29  ;;  %2068 = vmatpush.msrb.mxu2 %v2988_v50 }
 0x2c3   :  { %2125 = vmatpush.msrb.mxu3 %v3645_v32  ;;  %2172 = vmatpush.msra.mxu0 %v2979_v46 }
 0x2c4   :  { %2016 = vmatpush.msrb.mxu1 %v2968_v40  ;;  %2070 = vmatpush.msrb.mxu2 %v3003_v56 }
 0x2c5   :  { %2129 = vmatpush.msrb.mxu3 %v3646_v52  ;;  %2174 = vmatpush.msra.mxu0 %v2981_v47 }
 0x2c6   :  { %2019 = vmatpush.msrb.mxu1 %v2996_v53  ;;  %2072 = vmatpush.msrb.mxu2 %v3020_v0 }
 0x2c7   :  { %2133 = vmatpush.msrb.mxu3 %v3647_v48  ;;  %2176 = vmatpush.msra.mxu0 %v2988_v50 }
 0x2c8   :  { %2022 = vmatpush.msrb.mxu1 %v3622_v30  ;;  %2074 = vmatpush.msrb.mxu2 %v3033_v8 }
 0x2c9   :  { %2137 = vmatpush.msrb.mxu3 %v3648_v63  ;;  %2178 = vmatpush.msra.mxu0 %v3003_v56 }
 0x2ca   :  { %2025 = vmatpush.msrb.mxu1 %v3014_v61  ;;  %2076 = vmatpush.msrb.mxu2 %v3059_v39 }
 0x2cb   :  { %2141 = vmatpush.msrb.mxu3 %v3649_v24  ;;  %2180 = vmatpush.msra.mxu0 %v3020_v0 }
 0x2cc   :  { %2028 = vmatpush.msrb.mxu1 %v3623_v11  ;;  %2078 = vmatpush.msrb.mxu2 %v3063_v42 }
 0x2cd   :  { %2145 = vmatpush.msrb.mxu3 %v3650_v3  ;;  %2182 = vmatpush.msra.mxu0 %v3033_v8 }
 0x2ce   :  { %2082 = vmatmul.f32.vlgmr.msrb.gmra.mxu2 %v1885_v36  ;;  %2031 = vmatpush.msrb.mxu1 %v3624_v43 }
 0x2cf   :  { %2149 = vmatpush.msrb.mxu3 %v3651_v27  ;;  %2184 = vmatpush.msra.mxu0 %v3059_v39 }
 0x2d0   :  { %2151 = vmatmul.f32.vlgmr.msrb.gmra.mxu3 %v3444_v57  ;;  %2034 = vmatpush.msrb.mxu1 %v3631_v26 }
 0x2d1   :  { %2186 = vmatpush.msra.mxu0 %v3063_v42 }
 0x2d2   :  { %2188 = vmatmul.f32.vlgmr.msra.gmra.mxu0 %v3444_v57  ;;  %2037 = vmatpush.msrb.mxu1 %v3652_v5 }
 0x2d4   :  { %2040 = vmatpush.msrb.mxu1 %v3653_v6 }
 0x2d5   :  { %2043 = vmatmul.f32.vlgmr.msrb.gmra.mxu1 %v3449_v2 }
 0x32c   :  { %v1741_v14 = vpop.f32.mrf.mxu0 }
 0x32e   :  { %v1648_v12 = vpop.f32.mrf.mxu2 }
 0x330   :  { %v1547_v7 = vpop.f32.mrf.mxu1  ;;  %v1702_v13 = vpop.f32.mrf.mxu3 }
 0x331   :  { %v1649_v15 = vadd.f32 %v1648_v12, %v1547_v7 }
 0x333   :  { %v1703_v17 = vadd.f32 %v1702_v13, %v1649_v15 }
 0x335   :  { %v1742_v21 = vadd.f32 %v1741_v14, %v1703_v17 }
 0x336   :  { %v1990_v22 = vpop.f32.mrf.mxu0 }
 0x337   :  { %v1847_v19 = vpop.f32.mrf.mxu2 }
 0x339   :  { %v1889_v20 = vpop.f32.mrf.mxu3 }
 0x33a   :  { %v1810_v16 = vpop.f32.mrf.mxu1  ;;  %v1991_v34 = vadd.f32 %v1990_v22, %v1889_v20 }
 0x33b   :  { %v1811_v29 = vadd.f32 %v1810_v16, %v1742_v21 }
 0x33d   :  { %v1848_v50 = vadd.f32 %v1847_v19, %v1811_v29 }
 0x33f   :  { %v2192_v8 = vmul.f32 %v1848_v50, %v1848_v50  ;;  %v2195_v38 = vsub.f32 %v3439_v62, %v1848_v50 }
 0x34f   :  { %v2189_v0 = vpop.f32.mrf.mxu0 }
 0x351   :  { %v2083_v47 = vpop.f32.mrf.mxu2 }
 0x352   :  { %v2044_v40 = vpop.f32.mrf.mxu1 }
 0x353   :  { %v2045_v46 = vadd.f32 %v2044_v40, %v1991_v34  ;;  %v2152_v56 = vpop.f32.mrf.mxu3 }
 0x355   :  { %v2084_v53 = vadd.f32 %v2083_v47, %v2045_v46 }
 0x357   :  { %v2153_v61 = vadd.f32 %v2152_v56, %v2084_v53 }
 0x359   :  { %v2190_v39 = vadd.f32 %v2189_v0, %v2153_v61 }
 0x35b   :  { %v2193_v42 = vsub.f32 %v2190_v39, %v2192_v8 }
 0x35d   :  { %v2194_v30 = vmax.f32 %v2193_v42, 0.0 }
 0x35f   :  { %v2196_v11 = vadd.f32 1e-05, %v2194_v30 }
 0x361   :  { %2615 = vrsqrt.f32 %v2196_v11  ;;  %vm2203_vm4 = vweird.f32 %v2196_v11 }
 0x367   :  { %v2616_v43 = vpop.eup %2615 }
 0x368   :  { %v2198_v26 = vmul.f32 %v2616_v43, %v2196_v11  ;;  %vm2204_vm3 = vweird.f32 %v2616_v43 }
 0x369   :  { %vm2205_vm5 = vmor %vm2203_vm4, %vm2204_vm3 }
 0x36a   :  { %v2199_v57 = vmul.f32 %v2616_v43, %v2198_v26 }
 0x36c   :  { %v2200_v41 = vmul.f32 0.5, %v2199_v57 }
 0x36e   :  { %v2201_v28 = vsub.f32 1.5, %v2200_v41 }
 0x370   :  { %v2202_v59 = vmul.f32 %v2616_v43, %v2201_v28 }
 0x372   :  { %v2206_v51 = vsel %vm2205_vm5, %v2616_v43, %v2202_v59 }
 0x373   :  { %v2207_v58 = vmul.f32 %v2206_v51, %v2195_v38 }
 0x375   :  { %v2209_v35 = vmul.f32 %v2611_v44, %v2207_v58 }
 0x377   :  { %v2211_v32 = vadd.f32 %v2612_v1, %v2209_v35 }
 0x379   :  { %2212 = vst [vmem:[#allocation14] sm:$0xff] %v2211_v32 }
 0x37a   :  { %2223 = dma.vmem_to_hbm [thread:$0]  %s2219_s6, 128, %s2221_s1, [#allocation4]  }
 0x37b   :  { %2817 = dma.done.wait [#allocation4], 128  }
 0x37c   :  { %2818 = vsyncadd [#allocation4], 4294967168 }
 0x37d   :  { %2228 = vsyncpa [#allocation3], 1 }
 0x37e   :  { %2229 = vsyncpa [#allocation6], 1 }
 0x37f   :  { %2230 = vsyncpa [#allocation9], 1 }
 0x380   :  { %2231 = vsyncpa [#allocation12], 1 }
 0x381   :  { %2232 = vsyncpa [#allocation4], 1 }

// kernel: tpu_custom_call.1
= control target key start
LH: loop header
LB: loop body
LE: loop exit
PB: predicated region body
PF: predicated region fallthrough
CT: control target
= control target key end

     0   :  { %12 = vsyncpa [#allocation3], 0  ;;  %s3524_s0 = inlined_call_operand.hbm [shape: f32[8,128], index: 0, kind: input, shape index: {}]   ;;  %s3525_s1 = inlined_call_operand.hbm [shape: bf16[128,128], index: 1, kind: input, shape index: {}]   ;;  %s3526_s2 = inlined_call_operand.hbm [shape: bf16[128,512], index: 2, kind: input, shape index: {}]   ;;  %s3527_s3 = inlined_call_operand.hbm [shape: bf16[512,128], index: 3, kind: input, shape index: {}]   ;;  %s3528_s4 = inlined_call_operand.hbm [shape: f32[1,512], index: 4, kind: input, shape index: {}]   ;;  %s3529_s5 = inlined_call_operand.hbm [shape: f32[8,128], index: 5, kind: input, shape index: {}]   ;;  %s3530_s6 = inlined_call_operand.hbm [shape: f32[128,128], index: 6, kind: input, shape index: {}]   ;;  %s3531_s7 = inlined_call_operand.hbm [shape: f32[8,128], index: 7, kind: output, shape index: {}]  }
   0x1   :  { %13 = vsyncpa [#allocation6], 0 }
   0x2   :  { %14 = vsyncpa [#allocation9], 0 }
   0x3   :  { %15 = vsyncpa [#allocation12], 0  ;;  %s32_s26 = sshll.u32 %s3525_s1, 4  ;;  %s33_s26 = int_to_ptr.hbm [resolvable:$true] %s32_s26 }
   0x4   :  { %16 = vsyncpa [#allocation4], 0  ;;  %s2819_s27 = smov [#allocation5]   ;;  %s58_s8 = sshll.u32 %s3527_s3, 4  ;;  %s59_s8 = int_to_ptr.hbm [resolvable:$true] %s58_s8 }
   0x5   :  { %s34_s28 = sshll.u32 %s2819_s27, 4  ;;  %s2820_s9 = smov 64   ;;  %s35_s28 = int_to_ptr.vmem [resolvable:$true] %s34_s28 }
   0x6   :  { %s2821_s10 = smov 4   ;;  %s2822_s11 = smov [#allocation8]  }
   0x7   :  { %40 = dma.hbm_to_vmem [thread:$0]  %s33_s26, 1024, %s35_s28, [#allocation6], %s2820_s9, %s2820_s9, %s2821_s10  }
   0x8   :  { %s60_s12 = sshll.u32 %s2822_s11, 4  ;;  %s83_s15 = sshll.u32 %s3529_s5, 4  ;;  %s61_s12 = int_to_ptr.vmem [resolvable:$true] %s60_s12  ;;  %s84_s15 = int_to_ptr.hbm [resolvable:$true] %s83_s15 }
   0x9   :  { %66 = dma.hbm_to_vmem [thread:$0]  %s59_s8, 4096, %s61_s12, [#allocation9], %s2820_s9, %s2820_s9, %s2821_s10  }
   0xa   :  { %s22_s17 = sshll.u32 %s3524_s0, 4  ;;  %s2823_s18 = smov [#allocation11]   ;;  %s23_s17 = int_to_ptr.hbm [resolvable:$true] %s22_s17 }
   0xb   :  { %s85_s19 = sshll.u32 %s2823_s18, 4  ;;  %s2824_s3 = smov [#allocation2]   ;;  %s86_s19 = int_to_ptr.vmem [resolvable:$true] %s85_s19 }
   0xc   :  { %88 = dma.hbm_to_vmem [thread:$0]  %s84_s15, 128, %s86_s19, [#allocation12]  }
   0xd   :  { %s24_s20 = sshll.u32 %s2824_s3, 4  ;;  %s45_s23 = sshll.u32 %s3526_s2, 4  ;;  %s25_s20 = int_to_ptr.vmem [resolvable:$true] %s24_s20  ;;  %s46_s23 = int_to_ptr.hbm [resolvable:$true] %s45_s23 }
   0xe   :  { %27 = dma.hbm_to_vmem [thread:$0]  %s23_s17, 128, %s25_s20, [#allocation3]  }
   0xf   :  { %s2825_s5 = smov [#allocation7]   ;;  %s72_s0 = sshll.u32 %s3528_s4, 4  ;;  %s73_s0 = int_to_ptr.hbm [resolvable:$true] %s72_s0 }
  0x10   :  { %s47_s24 = sshll.u32 %s2825_s5, 4  ;;  %s2826_s27 = smov 256   ;;  %s48_s24 = int_to_ptr.vmem [resolvable:$true] %s47_s24 }
  0x11   :  { %s2827_s28 = smov 16   ;;  %s2828_s29 = smov [#allocation10]  }
  0x12   :  { %53 = dma.hbm_to_vmem [thread:$0]  %s46_s23, 4096, %s48_s24, [#allocation6], %s2826_s27, %s2826_s27, %s2827_s28  }
  0x13   :  { %s74_s30 = sshll.u32 %s2828_s29, 4  ;;  %s93_s2 = sshll.u32 %s3530_s6, 4  ;;  %s75_s30 = int_to_ptr.vmem [resolvable:$true] %s74_s30  ;;  %s94_s2 = int_to_ptr.hbm [resolvable:$true] %s93_s2 }
  0x14   :  { %77 = dma.hbm_to_vmem [thread:$0]  %s73_s0, 64, %s75_s30, [#allocation9]  }
  0x15   :  { %s2829_s10 = smov [#allocation13]   ;;  %s2830_s12 = smov 128  }
  0x16   :  { %s95_s11 = sshll.u32 %s2829_s10, 4  ;;  %s2831_s13 = smov 8   ;;  %s96_s11 = int_to_ptr.vmem [resolvable:$true] %s95_s11 }
  0x17   :  { %101 = dma.hbm_to_vmem [thread:$0]  %s94_s2, 2048, %s96_s11, [#allocation12], %s2830_s12, %s2830_s12, %s2831_s13  }
  0x18   :  { %2809 = dma.done.wait [#allocation3], 128  }
  0x19   :  { %2810 = vsyncadd [#allocation3], 4294967168 }
  0x1a   :  { %2811 = dma.done.wait [#allocation6], 5120  }
  0x1b   :  { %2812 = vsyncadd [#allocation6], 4294962176 }
  0x1c   :  { %2813 = dma.done.wait [#allocation9], 4160  }
  0x1d   :  { %2814 = vsyncadd [#allocation9], 4294963136 }
  0x1e   :  { %2815 = dma.done.wait [#allocation12], 2176  }
  0x1f   :  { %2816 = vsyncadd [#allocation12], 4294965120  ;;  %v2528_v0 = vld [vmem:[#allocation5 + $0x38] sm:$0xff]  ;;  %v2527_v1 = vld [vmem:[#allocation5 + $0x30] sm:$0xff]  ;;  %s2832_s4 = smov [#allocation14]   ;;  %s2220_s1 = sshll.u32 %s3531_s7, 4  ;;  %s2221_s1 = int_to_ptr.hbm [resolvable:$true] %s2220_s1 }
  0x20   :  { %219 = vmatpush.bf16.msra.mxu0 %v2528_v0  ;;  %v152_v2 = vld [vmem:[#allocation13 + $0x78] sm:$0xff]  ;;  %v151_v3 = vld [vmem:[#allocation13 + $0x70] sm:$0xff]  ;;  %v150_v4 = vld [vmem:[#allocation13 + $0x68] sm:$0xff]  ;;  %s2218_s6 = sshll.u32 %s2832_s4, 4  ;;  %s2219_s6 = int_to_ptr.vmem [resolvable:$true] %s2218_s6 }
  0x21   :  { %v2894_v5 = vand.u32 4294901760, %v152_v2  ;;  %v2896_v6 = vand.u32 4294901760, %v151_v3  ;;  %v2898_v7 = vand.u32 4294901760, %v150_v4  ;;  %v149_v8 = vld [vmem:[#allocation13 + $0x60] sm:$0xff]  ;;  %v148_v9 = vld [vmem:[#allocation13 + $0x58] sm:$0xff]  ;;  %v147_v10 = vld [vmem:[#allocation13 + $0x50] sm:$0xff] }
  0x22   :  { %v2526_v11 = vld [vmem:[#allocation5 + $0x28] sm:$0xff]  ;;  %v2900_v12 = vand.u32 4294901760, %v149_v8  ;;  %v2902_v13 = vand.u32 4294901760, %v148_v9  ;;  %v2904_v14 = vand.u32 4294901760, %v147_v10  ;;  %v146_v18 = vld [vmem:[#allocation13 + $0x48] sm:$0xff]  ;;  %v2525_v30 = vld [vmem:[#allocation5 + $0x20] sm:$0xff] }
  0x23   :  { %v2907_v15 = vsub.f32 %v152_v2, %v2894_v5  ;;  %v2910_v16 = vsub.f32 %v151_v3, %v2896_v6  ;;  %v2913_v17 = vsub.f32 %v150_v4, %v2898_v7  ;;  %234 = vmatpush.msra.mxu1 %v2894_v5  ;;  %v2925_v22 = vand.u32 4294901760, %v146_v18  ;;  %v145_v26 = vld [vmem:[#allocation13 + $0x40] sm:$0xff]  ;;  %v144_v36 = vld [vmem:[#allocation13 + $0x38] sm:$0xff]  ;;  %v143_v41 = vld [vmem:[#allocation13 + $0x30] sm:$0xff] }
  0x24   :  { %220 = vmatpush.bf16.msra.mxu0 %v2527_v1  ;;  %v2917_v19 = vsub.f32 %v149_v8, %v2900_v12  ;;  %v2920_v20 = vsub.f32 %v148_v9, %v2902_v13  ;;  %v2923_v21 = vsub.f32 %v147_v10, %v2904_v14  ;;  %v2954_v34 = vand.u32 4294901760, %v145_v26  ;;  %v2524_v43 = vld [vmem:[#allocation5 + $0x18] sm:$0xff]  ;;  %v141_v55 = vld [vmem:[#allocation13 + $0x20] sm:$0xff]  ;;  %v140_v62 = vld [vmem:[#allocation13 + $0x18] sm:$0xff] }
  0x25   :  { %v2928_v23 = vand.u32 4294901760, %v2907_v15  ;;  %v2931_v24 = vand.u32 4294901760, %v2910_v16  ;;  %377 = vmatpush.msra.mxu3 %v2907_v15  ;;  %v2935_v25 = vand.u32 4294901760, %v2913_v17  ;;  %236 = vmatpush.msra.mxu1 %v2896_v6  ;;  %v2945_v29 = vsub.f32 %v146_v18, %v2925_v22  ;;  %v142_v48 = vld [vmem:[#allocation13 + $0x28] sm:$0xff]  ;;  %v139_v4 = vld [vmem:[#allocation13 + $0x10] sm:$0xff]  ;;  %v2522_v9 = vld [vmem:[#allocation5 + $0x8] sm:$0xff] }
  0x26   :  { %v2939_v27 = vand.u32 4294901760, %v2917_v19  ;;  %v2942_v28 = vand.u32 4294901760, %v2920_v20  ;;  %v2957_v35 = vand.u32 4294901760, %v2923_v21  ;;  %v2968_v40 = vsub.f32 %v145_v26, %v2954_v34  ;;  %v2523_v57 = vld [vmem:[#allocation5 + $0x10] sm:$0xff] }
  0x27   :  { %3592 = vst [vmem:[#allocation20_spill] sm:$0xff] %v2928_v23  ;;  %v277_v31 = vsub.f32 %v2907_v15, %v2928_v23  ;;  %v283_v32 = vsub.f32 %v2910_v16, %v2931_v24  ;;  %v289_v33 = vsub.f32 %v2913_v17, %v2935_v25  ;;  %380 = vmatpush.msra.mxu3 %v2910_v16  ;;  %v2977_v45 = vand.u32 4294901760, %v2945_v29 }
  0x28   :  { %3593 = vst [vmem:[#allocation21_spill] sm:$0xff] %v2931_v24  ;;  %221 = vmatpush.bf16.msra.mxu0 %v2526_v11  ;;  %238 = vmatpush.msra.mxu1 %v2898_v7  ;;  %v295_v39 = vsub.f32 %v2917_v19, %v2939_v27  ;;  %v301_v42 = vsub.f32 %v2920_v20, %v2942_v28  ;;  %v2979_v46 = vand.u32 4294901760, %v144_v36  ;;  %v2981_v47 = vand.u32 4294901760, %v143_v41 }
  0x29   :  { %3594 = vst [vmem:[#allocation22_spill] sm:$0xff] %v2935_v25  ;;  %v2960_v37 = vand.u32 4294901760, %v277_v31  ;;  %v2962_v38 = vand.u32 4294901760, %v283_v32  ;;  %383 = vmatpush.msra.mxu3 %v2913_v17  ;;  %v2974_v44 = vand.u32 4294901760, %v289_v33  ;;  %v2985_v49 = vand.u32 4294901760, %v2968_v40 }
  0x2a   :  { %3595 = vst [vmem:[#allocation23_spill] sm:$0xff] %v2939_v27  ;;  %240 = vmatpush.msra.mxu1 %v2900_v12  ;;  %v2988_v50 = vand.u32 4294901760, %v142_v48  ;;  %v2991_v51 = vand.u32 4294901760, %v295_v39  ;;  %v307_v52 = vsub.f32 %v2923_v21, %v2957_v35  ;;  %v2996_v53 = vsub.f32 %v144_v36, %v2979_v46 }
  0x2b   :  { %3596 = vst [vmem:[#allocation24_spill] sm:$0xff] %v2942_v28  ;;  %279 = vmatpush.msra.mxu2 %v2960_v37  ;;  %386 = vmatpush.msra.mxu3 %v2917_v19  ;;  %v2999_v54 = vsub.f32 %v143_v41, %v2981_v47  ;;  %v3003_v56 = vand.u32 4294901760, %v141_v55  ;;  %v3006_v58 = vand.u32 4294901760, %v301_v42  ;;  %v313_v59 = vsub.f32 %v2945_v29, %v2977_v45  ;;  %v137_v41 = vld [vmem:[#allocation13] sm:$0xff] }
  0x2c   :  { %3597 = vst [vmem:[#allocation25_spill] sm:$0xff] %v2957_v35  ;;  %222 = vmatpush.bf16.msra.mxu0 %v2525_v30  ;;  %242 = vmatpush.msra.mxu1 %v2902_v13  ;;  %v3011_v60 = vand.u32 4294901760, %v2996_v53  ;;  %v3014_v61 = vsub.f32 %v142_v48, %v2988_v50  ;;  %v319_v63 = vsub.f32 %v2968_v40, %v2985_v49  ;;  %v3020_v0 = vand.u32 4294901760, %v140_v62  ;;  %v138_v30 = vld [vmem:[#allocation13 + $0x8] sm:$0xff] }
  0x2d   :  { %3598 = vst [vmem:[#allocation26_spill] sm:$0xff] %v2977_v45  ;;  %285 = vmatpush.msra.mxu2 %v2962_v38  ;;  %389 = vmatpush.msra.mxu3 %v2920_v20  ;;  %v3023_v1 = vand.u32 4294901760, %v307_v52  ;;  %v3026_v2 = vand.u32 4294901760, %v2999_v54  ;;  %v3029_v3 = vsub.f32 %v141_v55, %v3003_v56  ;;  %v3033_v8 = vand.u32 4294901760, %v139_v4  ;;  %v3065_v48 = vld [vmem:[#allocation2] sm:$0xff] }
  0x2e   :  { %3599 = vst [vmem:[#allocation27_spill] sm:$0xff] %v2985_v49  ;;  %244 = vmatpush.msra.mxu1 %v2904_v14  ;;  %v3036_v10 = vand.u32 4294901760, %v313_v59  ;;  %v325_v11 = vsub.f32 %v2996_v53, %v3011_v60  ;;  %v3041_v18 = vand.u32 4294901760, %v3014_v61  ;;  %v3044_v26 = vsub.f32 %v140_v62, %v3020_v0 }
  0x2f   :  { %3600 = vst [vmem:[#allocation28_spill] sm:$0xff] %v2999_v54  ;;  %291 = vmatpush.msra.mxu2 %v2974_v44  ;;  %392 = vmatpush.msra.mxu3 %v2923_v21  ;;  %v3046_v31 = vand.u32 4294901760, %v319_v63  ;;  %v331_v32 = vsub.f32 %v2999_v54, %v3026_v2  ;;  %v3054_v33 = vand.u32 4294901760, %v3029_v3  ;;  %v3057_v36 = vsub.f32 %v139_v4, %v3033_v8 }
  0x30   :  { %223 = vmatpush.bf16.msra.mxu0 %v2524_v43  ;;  %3601 = vst [vmem:[#allocation29_spill] sm:$0xff] %v3011_v60  ;;  %246 = vmatpush.msra.mxu1 %v2925_v22  ;;  %v3059_v39 = vand.u32 4294901760, %v138_v30  ;;  %v3063_v42 = vand.u32 4294901760, %v137_v41  ;;  %v2521_v43 = vld [vmem:[#allocation5] sm:$0xff]  ;;  %v3068_v52 = vand.u32 4294901760, %v325_v11  ;;  %v337_v55 = vsub.f32 %v3014_v61, %v3041_v18 }
  0x31   :  { %297 = vmatpush.msra.mxu2 %v2991_v51  ;;  %3602 = vst [vmem:[#allocation30_spill] sm:$0xff] %v3026_v2  ;;  %395 = vmatpush.msra.mxu3 %v2945_v29  ;;  %v3081_v62 = vand.u32 4294901760, %v331_v32  ;;  %v343_v63 = vsub.f32 %v3029_v3, %v3054_v33  ;;  %v3086_v4 = vand.u32 4294901760, %v3057_v36  ;;  %v153_v11 = vpack.c.bf16 %v3065_v48, %v3065_v48 }
  0x32   :  { %3603 = vst [vmem:[#allocation31_spill] sm:$0xff] %v3029_v3  ;;  %248 = vmatpush.msra.mxu1 %v2954_v34  ;;  %v3076_v59 = vsub.f32 %v138_v30, %v3059_v39  ;;  %v3096_v30 = vand.u32 4294901760, %v337_v55 }
  0x33   :  { %303 = vmatpush.msra.mxu2 %v3006_v58  ;;  %3604 = vst [vmem:[#allocation32_spill] sm:$0xff] %v3036_v10  ;;  %398 = vmatpush.msra.mxu3 %v2968_v40 }
  0x34   :  { %224 = vmatpush.bf16.msra.mxu0 %v2523_v57  ;;  %3605 = vst [vmem:[#allocation33_spill] sm:$0xff] %v3041_v18  ;;  %250 = vmatpush.msra.mxu1 %v2979_v46  ;;  %v3073_v57 = vand.u32 4294901760, %v3044_v26 }
  0x35   :  { %3606 = vst [vmem:[#allocation34_spill] sm:$0xff] %v3044_v26  ;;  %309 = vmatpush.msra.mxu2 %v3023_v1  ;;  %401 = vmatpush.msra.mxu3 %v2996_v53 }
  0x36   :  { %3607 = vst [vmem:[#allocation35_spill] sm:$0xff] %v3046_v31  ;;  %252 = vmatpush.msra.mxu1 %v2981_v47  ;;  %v349_v32 = vsub.f32 %v3044_v26, %v3073_v57 }
  0x37   :  { %3608 = vst [vmem:[#allocation36_spill] sm:$0xff] %v3054_v33  ;;  %315 = vmatpush.msra.mxu2 %v3036_v10  ;;  %404 = vmatpush.msra.mxu3 %v2999_v54  ;;  %v3101_v54 = vand.u32 4294901760, %v3076_v59 }
  0x38   :  { %3609 = vst [vmem:[#allocation37_spill] sm:$0xff] %v3057_v36  ;;  %225 = vmatpush.bf16.msra.mxu0 %v2522_v9  ;;  %254 = vmatpush.msra.mxu1 %v2988_v50  ;;  %v3089_v9 = vsub.f32 %v137_v41, %v3063_v42  ;;  %v3106_v41 = vand.u32 4294901760, %v343_v63 }
  0x39   :  { %3610 = vst [vmem:[#allocation38_spill] sm:$0xff] %v3073_v57  ;;  %321 = vmatpush.msra.mxu2 %v3046_v31  ;;  %407 = vmatpush.msra.mxu3 %v3014_v61  ;;  %v361_v63 = vsub.f32 %v3076_v59, %v3101_v54 }
  0x3a   :  { %3611 = vst [vmem:[#allocation39_spill] sm:$0xff] %v3076_v59  ;;  %256 = vmatpush.msra.mxu1 %v3003_v56  ;;  %v3111_v55 = vand.u32 4294901760, %v3089_v9 }
  0x3b   :  { %3612 = vst [vmem:[#allocation40_spill] sm:$0xff] %v3081_v62  ;;  %327 = vmatpush.msra.mxu2 %v3068_v52  ;;  %410 = vmatpush.msra.mxu3 %v3029_v3  ;;  %v3117_v3 = vand.u32 4294901760, %v349_v32  ;;  %v3133_v32 = vand.u32 4294901760, %v361_v63 }
  0x3c   :  { %3613 = vst [vmem:[#allocation41_spill] sm:$0xff] %v3086_v4  ;;  %226 = vmatpush.bf16.msra.mxu0 %v2521_v43  ;;  %v355_v43 = vsub.f32 %v3057_v36, %v3086_v4  ;;  %258 = vmatpush.msra.mxu1 %v3020_v0 }
  0x3d   :  { %3614 = vst [vmem:[#allocation42_spill] sm:$0xff] %v3089_v9  ;;  %333 = vmatpush.msra.mxu2 %v3081_v62  ;;  %413 = vmatpush.msra.mxu3 %v3044_v26  ;;  %v367_v26 = vsub.f32 %v3089_v9, %v3111_v55 }
  0x3e   :  { %3615 = vst [vmem:[#allocation43_spill] sm:$0xff] %v3096_v30  ;;  %260 = vmatpush.msra.mxu1 %v3033_v8 }
  0x3f   :  { %3616 = vst [vmem:[#allocation44_spill] sm:$0xff] %v3101_v54  ;;  %227 = vmatmul.bf16.vlgmr.msra.gmra.mxu0 %v153_v11  ;;  %339 = vmatpush.msra.mxu2 %v3096_v30  ;;  %v3125_v11 = vand.u32 4294901760, %v355_v43  ;;  %v3139_v43 = vand.u32 4294901760, %v367_v26  ;;  %v2607_v26 = vld [vmem:[#allocation11] ss:$0 sm:$0xff] }
  0x40   :  { %430 = vmatpush.msrb.mxu0 %v2894_v5  ;;  %3617 = vst [vmem:[#allocation45_spill] sm:$0xff] %v3106_v41  ;;  %416 = vmatpush.msra.mxu3 %v3057_v36 }
  0x41   :  { %3618 = vst [vmem:[#allocation46_spill] sm:$0xff] %v3111_v55  ;;  %345 = vmatpush.msra.mxu2 %v3106_v41  ;;  %262 = vmatpush.msra.mxu1 %v3059_v39 }
  0x42   :  { %432 = vmatpush.msrb.mxu0 %v2896_v6  ;;  %3619 = vst [vmem:[#allocation47_spill] sm:$0xff] %v3125_v11  ;;  %419 = vmatpush.msra.mxu3 %v3076_v59 }
  0x43   :  { %351 = vmatpush.msra.mxu2 %v3117_v3  ;;  %3620 = vst [vmem:[#allocation48_spill] sm:$0xff] %v3133_v32  ;;  %264 = vmatpush.msra.mxu1 %v3063_v42 }
  0x44   :  { %434 = vmatpush.msrb.mxu0 %v2898_v7  ;;  %422 = vmatpush.msra.mxu3 %v3089_v9  ;;  %3621 = vst [vmem:[#allocation49_spill] sm:$0xff] %v3139_v43 }
  0x45   :  { %357 = vmatpush.msra.mxu2 %v3125_v11  ;;  %471 = vmatpush.msrb.mxu1 %v2928_v23 }
  0x46   :  { %436 = vmatpush.msrb.mxu0 %v2900_v12  ;;  %576 = vmatpush.msrb.mxu3 %v2894_v5 }
  0x47   :  { %363 = vmatpush.msra.mxu2 %v3133_v32  ;;  %475 = vmatpush.msrb.mxu1 %v2931_v24 }
  0x48   :  { %438 = vmatpush.msrb.mxu0 %v2902_v13  ;;  %578 = vmatpush.msrb.mxu3 %v2896_v6 }
  0x49   :  { %369 = vmatpush.msra.mxu2 %v3139_v43  ;;  %479 = vmatpush.msrb.mxu1 %v2935_v25 }
  0x4a   :  { %440 = vmatpush.msrb.mxu0 %v2904_v14  ;;  %580 = vmatpush.msrb.mxu3 %v2898_v7 }
  0x4b   :  { %538 = vmatpush.msrb.mxu2 %v2894_v5  ;;  %483 = vmatpush.msrb.mxu1 %v2939_v27 }
  0x4c   :  { %442 = vmatpush.msrb.mxu0 %v2925_v22  ;;  %582 = vmatpush.msrb.mxu3 %v2900_v12 }
  0x4d   :  { %540 = vmatpush.msrb.mxu2 %v2896_v6  ;;  %487 = vmatpush.msrb.mxu1 %v2942_v28 }
  0x4e   :  { %444 = vmatpush.msrb.mxu0 %v2954_v34  ;;  %584 = vmatpush.msrb.mxu3 %v2902_v13 }
  0x4f   :  { %542 = vmatpush.msrb.mxu2 %v2898_v7  ;;  %491 = vmatpush.msrb.mxu1 %v2957_v35 }
  0x50   :  { %446 = vmatpush.msrb.mxu0 %v2979_v46  ;;  %586 = vmatpush.msrb.mxu3 %v2904_v14 }
  0x51   :  { %544 = vmatpush.msrb.mxu2 %v2900_v12  ;;  %495 = vmatpush.msrb.mxu1 %v2977_v45 }
  0x52   :  { %448 = vmatpush.msrb.mxu0 %v2981_v47  ;;  %588 = vmatpush.msrb.mxu3 %v2925_v22 }
  0x53   :  { %546 = vmatpush.msrb.mxu2 %v2902_v13  ;;  %499 = vmatpush.msrb.mxu1 %v2985_v49 }
  0x54   :  { %450 = vmatpush.msrb.mxu0 %v2988_v50  ;;  %590 = vmatpush.msrb.mxu3 %v2954_v34 }
  0x55   :  { %548 = vmatpush.msrb.mxu2 %v2904_v14  ;;  %503 = vmatpush.msrb.mxu1 %v3011_v60 }
  0x56   :  { %452 = vmatpush.msrb.mxu0 %v3003_v56  ;;  %592 = vmatpush.msrb.mxu3 %v2979_v46 }
  0x57   :  { %550 = vmatpush.msrb.mxu2 %v2925_v22  ;;  %507 = vmatpush.msrb.mxu1 %v3026_v2 }
  0x58   :  { %454 = vmatpush.msrb.mxu0 %v3020_v0  ;;  %594 = vmatpush.msrb.mxu3 %v2981_v47 }
  0x59   :  { %552 = vmatpush.msrb.mxu2 %v2954_v34  ;;  %511 = vmatpush.msrb.mxu1 %v3041_v18 }
  0x5a   :  { %456 = vmatpush.msrb.mxu0 %v3033_v8  ;;  %596 = vmatpush.msrb.mxu3 %v2988_v50 }
  0x5b   :  { %554 = vmatpush.msrb.mxu2 %v2979_v46  ;;  %515 = vmatpush.msrb.mxu1 %v3054_v33 }
  0x5c   :  { %458 = vmatpush.msrb.mxu0 %v3059_v39  ;;  %598 = vmatpush.msrb.mxu3 %v3003_v56 }
  0x5d   :  { %556 = vmatpush.msrb.mxu2 %v2981_v47  ;;  %519 = vmatpush.msrb.mxu1 %v3073_v57 }
  0x5e   :  { %460 = vmatpush.msrb.mxu0 %v3063_v42  ;;  %600 = vmatpush.msrb.mxu3 %v3020_v0 }
  0x5f   :  { %558 = vmatpush.msrb.mxu2 %v2988_v50  ;;  %523 = vmatpush.msrb.mxu1 %v3086_v4 }
  0x60   :  { %621 = vmatpush.msra.mxu0 %v2960_v37  ;;  %602 = vmatpush.msrb.mxu3 %v3033_v8 }
  0x61   :  { %560 = vmatpush.msrb.mxu2 %v3003_v56  ;;  %527 = vmatpush.msrb.mxu1 %v3101_v54 }
  0x62   :  { %627 = vmatpush.msra.mxu0 %v2962_v38  ;;  %604 = vmatpush.msrb.mxu3 %v3059_v39 }
  0x63   :  { %562 = vmatpush.msrb.mxu2 %v3020_v0  ;;  %531 = vmatpush.msrb.mxu1 %v3111_v55 }
  0x64   :  { %633 = vmatpush.msra.mxu0 %v2974_v44  ;;  %606 = vmatpush.msrb.mxu3 %v3063_v42 }
  0x65   :  { %564 = vmatpush.msrb.mxu2 %v3033_v8 }
  0x66   :  { %639 = vmatpush.msra.mxu0 %v2991_v51 }
  0x67   :  { %566 = vmatpush.msrb.mxu2 %v3059_v39 }
  0x68   :  { %645 = vmatpush.msra.mxu0 %v3006_v58 }
  0x69   :  { %568 = vmatpush.msrb.mxu2 %v3063_v42 }
  0x6a   :  { %651 = vmatpush.msra.mxu0 %v3023_v1 }
  0x6c   :  { %657 = vmatpush.msra.mxu0 %v3036_v10 }
  0x6e   :  { %663 = vmatpush.msra.mxu0 %v3046_v31 }
  0x70   :  { %669 = vmatpush.msra.mxu0 %v3068_v52 }
  0x72   :  { %675 = vmatpush.msra.mxu0 %v3081_v62 }
  0x74   :  { %681 = vmatpush.msra.mxu0 %v3096_v30 }
  0x76   :  { %687 = vmatpush.msra.mxu0 %v3106_v41 }
  0x78   :  { %693 = vmatpush.msra.mxu0 %v3117_v3 }
  0x7a   :  { %699 = vmatpush.msra.mxu0 %v3125_v11 }
  0x7c   :  { %705 = vmatpush.msra.mxu0 %v3133_v32 }
  0x7e   :  { %711 = vmatpush.msra.mxu0 %v3139_v43 }
  0xbc   :  { %v228_v63 = vpop.f32.mrf.mxu0 }
  0xbd   :  { %v229_v10 = vadd.f32 %v2607_v26, %v228_v63 }
  0xbf   :  { %v3219_v31 = vadd.f32 %v229_v10, %v3065_v48 }
  0xc1   :  { %v574_v62 = vmul.f32 %v3219_v31, %v3219_v31  ;;  %v265_v30 = vand.u32 4294901760, %v3219_v31 }
  0xc3   :  { %v3224_v41 = vand.u32 4294901760, %v574_v62  ;;  %371 = vmatmul.f32.vlgmr.msra.gmra.mxu2 %v265_v30  ;;  %v266_v11 = vsub.f32 %v3219_v31, %v265_v30 }
  0xc4   :  { %772 = vmatpush.msra.mxu2 %v2894_v5  ;;  %v230_v32 = vpop.f32.mrf.mxu0 }
  0xc5   :  { %425 = vmatmul.f32.vlgmr.msra.gmra.mxu3 %v266_v11  ;;  %v267_v43 = vand.u32 4294901760, %v266_v11  ;;  %v3229_v26 = vsub.f32 %v574_v62, %v3224_v41 }
  0xc6   :  { %774 = vmatpush.msra.mxu2 %v2896_v6  ;;  %813 = vmatpush.msra.mxu3 %v2928_v23 }
  0xc7   :  { %464 = vmatmul.f32.vlgmr.msrb.gmra.mxu0 %v267_v43  ;;  %v268_v10 = vsub.f32 %v266_v11, %v267_v43  ;;  %v609_v48 = vand.u32 4294901760, %v3229_v26  ;;  %v3623_v11 = vld [vmem:[#allocation31_spill] sm:$0xff]  ;;  %v3624_v43 = vld [vmem:[#allocation34_spill] sm:$0xff] }
  0xc8   :  { %776 = vmatpush.msra.mxu2 %v2898_v7  ;;  %817 = vmatpush.msra.mxu3 %v2931_v24 }
  0xc9   :  { %880 = vmatpush.msrb.mxu0 %v2894_v5  ;;  %v269_v32 = vand.u32 4294901760, %v268_v10  ;;  %v610_v63 = vsub.f32 %v3229_v26, %v609_v48  ;;  %v2379_v10 = vld [vmem:[#allocation7 + $0xe0] sm:$0xf] }
  0xca   :  { %778 = vmatpush.msra.mxu2 %v2900_v12  ;;  %821 = vmatpush.msra.mxu3 %v2935_v25  ;;  %v2554_v25 = vld [vmem:[#allocation7 + $0xcc] sm:$0xf] }
  0xcb   :  { %882 = vmatpush.msrb.mxu0 %v2896_v6  ;;  %270 = vmatmul.f32.vlgmr.msra.gmra.mxu1 %v269_v32  ;;  %v611_v62 = vand.u32 4294901760, %v610_v63  ;;  %v2557_v32 = vld [vmem:[#allocation7 + $0xe4] sm:$0xf] }
  0xcc   :  { %570 = vmatmul.f32.vlgmr.msrb.gmra.mxu2 %v265_v30  ;;  %719 = vmatpush.msra.mxu1 %v2907_v15 }
  0xcd   :  { %780 = vmatpush.msra.mxu2 %v2902_v13  ;;  %825 = vmatpush.msra.mxu3 %v2939_v27 }
  0xce   :  { %884 = vmatpush.msrb.mxu0 %v2898_v7  ;;  %612 = vmatmul.f32.vlgmr.msrb.gmra.mxu3 %v611_v62  ;;  %v2381_v62 = vld [vmem:[#allocation7 + $0xf0] sm:$0xf0] }
  0xcf   :  { %722 = vmatpush.msra.mxu1 %v2910_v16  ;;  %782 = vmatpush.msra.mxu2 %v2904_v14 }
  0xd0   :  { %829 = vmatpush.msra.mxu3 %v2942_v28  ;;  %886 = vmatpush.msrb.mxu0 %v2900_v12  ;;  %v2556_v28 = vld [vmem:[#allocation7 + $0xd4] sm:$0xf0] }
  0xd1   :  { %713 = vmatmul.f32.vlgmr.msra.gmra.mxu0 %v3224_v41  ;;  %725 = vmatpush.msra.mxu1 %v2913_v17 }
  0xd2   :  { %784 = vmatpush.msra.mxu2 %v2925_v22  ;;  %833 = vmatpush.msra.mxu3 %v2957_v35  ;;  %v2371_v35 = vld [vmem:[#allocation7 + $0xc8] sm:$0xf] }
  0xd3   :  { %888 = vmatpush.msrb.mxu0 %v2902_v13  ;;  %728 = vmatpush.msra.mxu1 %v2917_v19  ;;  %v2372_v27 = vor.u32 %v2556_v28, %v2371_v35  ;;  %v2357_v28 = vld [vmem:[#allocation7 + $0xb8] sm:$0xf0] }
  0xd4   :  { %786 = vmatpush.msra.mxu2 %v2954_v34  ;;  %837 = vmatpush.msra.mxu3 %v2977_v45  ;;  %v2365_v45 = vld [vmem:[#allocation7 + $0xd0] sm:$0xf0] }
  0xd5   :  { %890 = vmatpush.msrb.mxu0 %v2904_v14  ;;  %533 = vmatmul.f32.vlgmr.msrb.gmra.mxu1 %v265_v30  ;;  %v3622_v30 = vld [vmem:[#allocation28_spill] sm:$0xff] }
  0xd6   :  { %731 = vmatpush.msra.mxu1 %v2920_v20  ;;  %788 = vmatpush.msra.mxu2 %v2979_v46 }
  0xd7   :  { %841 = vmatpush.msra.mxu3 %v2985_v49  ;;  %892 = vmatpush.msrb.mxu0 %v2925_v22  ;;  %v2553_v49 = vld [vmem:[#allocation7 + $0xc4] sm:$0xf] }
  0xd8   :  { %734 = vmatpush.msra.mxu1 %v2923_v21  ;;  %790 = vmatpush.msra.mxu2 %v2981_v47 }
  0xd9   :  { %845 = vmatpush.msra.mxu3 %v3011_v60  ;;  %894 = vmatpush.msrb.mxu0 %v2954_v34  ;;  %v2555_v60 = vld [vmem:[#allocation7 + $0xcc] sm:$0xf0] }
  0xda   :  { %737 = vmatpush.msra.mxu1 %v2945_v29  ;;  %792 = vmatpush.msra.mxu2 %v2988_v50 }
  0xdb   :  { %849 = vmatpush.msra.mxu3 %v3026_v2  ;;  %896 = vmatpush.msrb.mxu0 %v2979_v46 }
  0xdc   :  { %740 = vmatpush.msra.mxu1 %v2968_v40  ;;  %794 = vmatpush.msra.mxu2 %v3003_v56 }
  0xdd   :  { %853 = vmatpush.msra.mxu3 %v3041_v18  ;;  %898 = vmatpush.msrb.mxu0 %v2981_v47  ;;  %v2389_v18 = vld [vmem:[#allocation7 + $0xf8] sm:$0xf0] }
  0xde   :  { %743 = vmatpush.msra.mxu1 %v2996_v53  ;;  %796 = vmatpush.msra.mxu2 %v3020_v0 }
  0xdf   :  { %857 = vmatpush.msra.mxu3 %v3054_v33  ;;  %900 = vmatpush.msrb.mxu0 %v2988_v50  ;;  %v2558_v33 = vld [vmem:[#allocation7 + $0xec] sm:$0xf] }
  0xe0   :  { %746 = vmatpush.msra.mxu1 %v3622_v30  ;;  %798 = vmatpush.msra.mxu2 %v3033_v8  ;;  %v2392_v2 = vor.u32 %v2558_v33, %v2389_v18  ;;  %v2347_v18 = vld [vmem:[#allocation7 + $0xa0] sm:$0xf]  ;;  %v2551_v33 = vld [vmem:[#allocation7 + $0xac] sm:$0xf0] }
  0xe1   :  { %861 = vmatpush.msra.mxu3 %v3073_v57  ;;  %902 = vmatpush.msrb.mxu0 %v3003_v56 }
  0xe2   :  { %749 = vmatpush.msra.mxu1 %v3014_v61  ;;  %800 = vmatpush.msra.mxu2 %v3059_v39 }
  0xe3   :  { %865 = vmatpush.msra.mxu3 %v3086_v4  ;;  %904 = vmatpush.msrb.mxu0 %v3020_v0  ;;  %v2384_v4 = vor.u32 %v2557_v32, %v2381_v62  ;;  %v2373_v32 = vld [vmem:[#allocation7 + $0xd8] sm:$0xf0] }
  0xe4   :  { %752 = vmatpush.msra.mxu1 %v3623_v11  ;;  %802 = vmatpush.msra.mxu2 %v3063_v42 }
  0xe5   :  { %869 = vmatpush.msra.mxu3 %v3101_v54  ;;  %906 = vmatpush.msrb.mxu0 %v3033_v8  ;;  %v2560_v54 = vld [vmem:[#allocation7 + $0xf4] sm:$0xf0] }
  0xe6   :  { %806 = vmatmul.f32.vlgmr.msra.gmra.mxu2 %v609_v48  ;;  %755 = vmatpush.msra.mxu1 %v3624_v43  ;;  %v2559_v48 = vld [vmem:[#allocation7 + $0xec] sm:$0xf0] }
  0xe7   :  { %873 = vmatpush.msra.mxu3 %v3111_v55  ;;  %908 = vmatpush.msrb.mxu0 %v3059_v39  ;;  %v2380_v63 = vor.u32 %v2559_v48, %v2379_v10  ;;  %v2387_v55 = vld [vmem:[#allocation7 + $0xe8] sm:$0xf]  ;;  %v2368_v48 = vor.u32 %v2553_v49, %v2365_v45  ;;  %v2550_v45 = vld [vmem:[#allocation7 + $0xac] sm:$0xf] }
  0xe8   :  { %875 = vmatmul.f32.vlgmr.msra.gmra.mxu3 %v3224_v41  ;;  %758 = vmatpush.msra.mxu1 %v3057_v36  ;;  %v2388_v57 = vor.u32 %v2560_v54, %v2387_v55  ;;  %v2376_v54 = vor.u32 %v2554_v25, %v2373_v32  ;;  %v2360_v35 = vor.u32 %v2550_v45, %v2357_v28  ;;  %v2331_v25 = vld [vmem:[#allocation7 + $0x80] sm:$0xf]  ;;  %v2323_v28 = vld [vmem:[#allocation7 + $0x68] sm:$0xf]  ;;  %v2536_v36 = vld [vmem:[#allocation7 + $0x34] sm:$0xf0] }
  0xe9   :  { %910 = vmatpush.msrb.mxu0 %v3063_v42  ;;  %1152 = vmatpush.bf16.msrb.mxu2 %v2384_v4  ;;  %v2348_v4 = vor.u32 %v2551_v33, %v2347_v18  ;;  %v2339_v18 = vld [vmem:[#allocation7 + $0x88] sm:$0xf]  ;;  %v2548_v33 = vld [vmem:[#allocation7 + $0x94] sm:$0xf0] }
  0xea   :  { %912 = vmatmul.f32.vlgmr.msrb.gmra.mxu0 %v3224_v41  ;;  %761 = vmatpush.msra.mxu1 %v3076_v59  ;;  %v2363_v41 = vld [vmem:[#allocation7 + $0xc0] sm:$0xf]  ;;  %v2340_v23 = vor.u32 %v2548_v33, %v2339_v18  ;;  %v2325_v18 = vld [vmem:[#allocation7 + $0x78] sm:$0xf0] }
  0xeb   :  { %1165 = vmatpush.bf16.msrb.mxu3 %v2388_v57  ;;  %1178 = vmatpush.bf16.msra.mxu0 %v2392_v2  ;;  %v2549_v57 = vld [vmem:[#allocation7 + $0xa4] sm:$0xf]  ;;  %v2349_v2 = vld [vmem:[#allocation7 + $0xb0] sm:$0xf0] }
  0xec   :  { %764 = vmatpush.msra.mxu1 %v3089_v9 }
  0xed   :  { %767 = vmatmul.f32.vlgmr.msra.gmra.mxu1 %v3229_v26  ;;  %v2364_v26 = vor.u32 %v2555_v60, %v2363_v41  ;;  %1153 = vmatpush.bf16.msrb.mxu2 %v2368_v48  ;;  %v2355_v60 = vld [vmem:[#allocation7 + $0xa8] sm:$0xf]  ;;  %v2352_v41 = vor.u32 %v2549_v57, %v2349_v2  ;;  %v2546_v57 = vld [vmem:[#allocation7 + $0x8c] sm:$0xf]  ;;  %v2341_v2 = vld [vmem:[#allocation7 + $0x98] sm:$0xf0] }
  0xee   :  { %1139 = vmatpush.bf16.msrb.mxu1 %v2380_v63  ;;  %v2552_v63 = vld [vmem:[#allocation7 + $0xb4] sm:$0xf0] }
  0xef   :  { %1166 = vmatpush.bf16.msrb.mxu3 %v2372_v27  ;;  %1179 = vmatpush.bf16.msra.mxu0 %v2376_v54  ;;  %v2356_v24 = vor.u32 %v2552_v63, %v2355_v60  ;;  %v2547_v27 = vld [vmem:[#allocation7 + $0x8c] sm:$0xf0]  ;;  %v2333_v54 = vld [vmem:[#allocation7 + $0x90] sm:$0xf0]  ;;  %v2344_v60 = vor.u32 %v2546_v57, %v2341_v2  ;;  %v2315_v63 = vld [vmem:[#allocation7 + $0x60] sm:$0xf] }
  0xf0   :  { %v2332_v32 = vor.u32 %v2547_v27, %v2331_v25  ;;  %v2537_v57 = vld [vmem:[#allocation7 + $0x44] sm:$0xf] }
  0xf1   :  { %1154 = vmatpush.bf16.msrb.mxu2 %v2352_v41  ;;  %v2541_v41 = vld [vmem:[#allocation7 + $0x64] sm:$0xf] }
  0xf2   :  { %1140 = vmatpush.bf16.msrb.mxu1 %v2364_v26  ;;  %v2545_v26 = vld [vmem:[#allocation7 + $0x84] sm:$0xf] }
  0xf3   :  { %1167 = vmatpush.bf16.msrb.mxu3 %v2356_v24  ;;  %1180 = vmatpush.bf16.msra.mxu0 %v2360_v35  ;;  %v2336_v9 = vor.u32 %v2545_v26, %v2333_v54  ;;  %v2543_v24 = vld [vmem:[#allocation7 + $0x6c] sm:$0xf0]  ;;  %v2544_v35 = vld [vmem:[#allocation7 + $0x74] sm:$0xf0]  ;;  %v2542_v54 = vld [vmem:[#allocation7 + $0x6c] sm:$0xf] }
  0xf4   :  { %v2324_v26 = vor.u32 %v2544_v35, %v2323_v28  ;;  %v2309_v28 = vld [vmem:[#allocation7 + $0x58] sm:$0xf0] }
  0xf5   :  { %1155 = vmatpush.bf16.msrb.mxu2 %v2336_v9  ;;  %v2539_v9 = vld [vmem:[#allocation7 + $0x4c] sm:$0xf0] }
  0xf6   :  { %1141 = vmatpush.bf16.msrb.mxu1 %v2348_v4 }
  0xf7   :  { %1168 = vmatpush.bf16.msrb.mxu3 %v2340_v23  ;;  %1181 = vmatpush.bf16.msra.mxu0 %v2344_v60  ;;  %v2299_v23 = vld [vmem:[#allocation7 + $0x40] sm:$0xf]  ;;  %v2307_v60 = vld [vmem:[#allocation7 + $0x48] sm:$0xf] }
  0xfa   :  { %1142 = vmatpush.bf16.msrb.mxu1 %v2332_v32  ;;  %v2328_v32 = vor.u32 %v2542_v54, %v2325_v18  ;;  %v2535_v18 = vld [vmem:[#allocation7 + $0x2c] sm:$0xf0] }
  0xfb   :  { %1169 = vmatpush.bf16.msrb.mxu3 %v2324_v26  ;;  %v2283_v26 = vld [vmem:[#allocation7 + $0x20] sm:$0xf] }
  0xfc   :  { %1182 = vmatpush.bf16.msra.mxu0 %v2328_v32  ;;  %v2284_v32 = vor.u32 %v2535_v18, %v2283_v26  ;;  %v2532_v26 = vld [vmem:[#allocation7 + $0x14] sm:$0xf0]  ;;  %v2530_v18 = vld [vmem:[#allocation7 + $0xc] sm:$0xf] }
 0x144   :  { %v465_v49 = vpop.f32.mrf.mxu0 }
 0x146   :  { %v372_v55 = vpop.f32.mrf.mxu2 }
 0x148   :  { %v271_v10 = vpop.f32.mrf.mxu1  ;;  %v426_v62 = vpop.f32.mrf.mxu3 }
 0x149   :  { %v373_v48 = vadd.f32 %v372_v55, %v271_v10  ;;  %v2316_v10 = vor.u32 %v2543_v24, %v2315_v63  ;;  %v2317_v55 = vld [vmem:[#allocation7 + $0x70] sm:$0xf0]  ;;  %v2540_v63 = vld [vmem:[#allocation7 + $0x54] sm:$0xf0] }
 0x14a   :  { %v2320_v27 = vor.u32 %v2541_v41, %v2317_v55  ;;  %v2308_v41 = vor.u32 %v2540_v63, %v2307_v60  ;;  %v2538_v55 = vld [vmem:[#allocation7 + $0x4c] sm:$0xf] }
 0x14b   :  { %v427_v45 = vadd.f32 %v426_v62, %v373_v48  ;;  %1143 = vmatpush.bf16.msrb.mxu1 %v2316_v10  ;;  %v2300_v62 = vor.u32 %v2539_v9, %v2299_v23  ;;  %v2301_v48 = vld [vmem:[#allocation7 + $0x50] sm:$0xf0]  ;;  %v2312_v54 = vor.u32 %v2538_v55, %v2309_v28  ;;  %v2291_v9 = vld [vmem:[#allocation7 + $0x28] sm:$0xf]  ;;  %v2534_v63 = vld [vmem:[#allocation7 + $0x2c] sm:$0xf] }
 0x14c   :  { %1156 = vmatpush.bf16.msrb.mxu2 %v2320_v27  ;;  %v2304_v59 = vor.u32 %v2537_v57, %v2301_v48  ;;  %1170 = vmatpush.bf16.msrb.mxu3 %v2308_v41  ;;  %v2285_v23 = vld [vmem:[#allocation7 + $0x30] sm:$0xf0]  ;;  %v2292_v60 = vor.u32 %v2536_v36, %v2291_v9  ;;  %v2529_v41 = vld [vmem:[#allocation7 + $0x4] sm:$0xf] }
 0x14d   :  { %v466_v2 = vadd.f32 %v465_v49, %v427_v45  ;;  %v2533_v49 = vld [vmem:[#allocation7 + $0x24] sm:$0xf]  ;;  %1183 = vmatpush.bf16.msra.mxu0 %v2312_v54  ;;  %v2269_v55 = vld [vmem:[#allocation7 + $0x10] sm:$0xf0] }
 0x14e   :  { %v714_v24 = vpop.f32.mrf.mxu0  ;;  %v2288_v48 = vor.u32 %v2533_v49, %v2285_v23  ;;  %v2272_v54 = vor.u32 %v2529_v41, %v2269_v55  ;;  %v2277_v23 = vld [vmem:[#allocation7 + $0x18] sm:$0xf0]  ;;  %v2583_v41 = vld [vmem:[#allocation8 + $0xb0] sm:$0xff]  ;;  %v2566_v55 = vld [vmem:[#allocation8 + $0x28] sm:$0xff] }
 0x14f   :  { %v571_v25 = vpop.f32.mrf.mxu2  ;;  %1144 = vmatpush.bf16.msrb.mxu1 %v2300_v62 }
 0x150   :  { %1157 = vmatpush.bf16.msrb.mxu2 %v2304_v59  ;;  %1171 = vmatpush.bf16.msrb.mxu3 %v2292_v60 }
 0x151   :  { %v613_v33 = vpop.f32.mrf.mxu3 }
 0x152   :  { %v534_v4 = vpop.f32.mrf.mxu1  ;;  %v715_v10 = vadd.f32 %v714_v24, %v613_v33  ;;  %v2267_v33 = vld [vmem:[#allocation7] sm:$0xf]  ;;  %v2531_v24 = vld [vmem:[#allocation7 + $0xc] sm:$0xf0] }
 0x153   :  { %v535_v35 = vadd.f32 %v534_v4, %v466_v2  ;;  %v2293_v4 = vld [vmem:[#allocation7 + $0x38] sm:$0xf0]  ;;  %1145 = vmatpush.bf16.msrb.mxu1 %v2284_v32 }
 0x154   :  { %v2296_v59 = vor.u32 %v2534_v63, %v2293_v4  ;;  %1158 = vmatpush.bf16.msrb.mxu2 %v2288_v48  ;;  %v2592_v48 = vld [vmem:[#allocation8 + $0xf8] sm:$0xff] }
 0x155   :  { %v3300_v2 = vadd.f32 %v571_v25, %v535_v35  ;;  %v2280_v35 = vor.u32 %v2530_v18, %v2277_v23  ;;  %v2576_v63 = vld [vmem:[#allocation8 + $0x78] sm:$0xff] }
 0x156   :  { %1184 = vmatpush.bf16.msra.mxu0 %v2296_v59  ;;  %v2584_v4 = vld [vmem:[#allocation8 + $0xb8] sm:$0xff] }
 0x158   :  { %1159 = vmatpush.bf16.msrb.mxu2 %v2272_v54  ;;  %v2582_v54 = vld [vmem:[#allocation8 + $0xa8] sm:$0xff] }
 0x15a   :  { %1185 = vmatpush.bf16.msra.mxu0 %v2280_v35  ;;  %v2564_v35 = vld [vmem:[#allocation8 + $0x18] sm:$0xff] }
 0x15c   :  { %1469 = vmatpush.bf16.msra.mxu2 %v2576_v63  ;;  %v2587_v63 = vld [vmem:[#allocation8 + $0xd0] sm:$0xff] }
 0x15e   :  { %1495 = vmatpush.bf16.msrb.mxu0 %v2592_v48 }
 0x167   :  { %v913_v25 = vpop.f32.mrf.mxu0 }
 0x169   :  { %v807_v57 = vpop.f32.mrf.mxu2 }
 0x16a   :  { %v768_v27 = vpop.f32.mrf.mxu1 }
 0x16b   :  { %v769_v45 = vadd.f32 %v768_v27, %v715_v10  ;;  %v876_v28 = vpop.f32.mrf.mxu3  ;;  %v2268_v10 = vor.u32 %v2531_v24, %v2267_v33  ;;  %v2275_v27 = vld [vmem:[#allocation7 + $0x8] sm:$0xf]  ;;  %v2567_v33 = vld [vmem:[#allocation8 + $0x30] sm:$0xff] }
 0x16c   :  { %v2276_v49 = vor.u32 %v2532_v26, %v2275_v27  ;;  %v2575_v24 = vld [vmem:[#allocation8 + $0x70] sm:$0xff]  ;;  %v2565_v27 = vld [vmem:[#allocation8 + $0x20] sm:$0xff] }
 0x16d   :  { %v808_v62 = vadd.f32 %v807_v57, %v769_v45  ;;  %v916_v45 = vmul.f32 %v3300_v2, %v3300_v2  ;;  %1146 = vmatpush.bf16.msrb.mxu1 %v2268_v10  ;;  %v2568_v57 = vld [vmem:[#allocation8 + $0x38] sm:$0xff]  ;;  %1470 = vmatpush.bf16.msra.mxu2 %v2575_v24  ;;  %v2574_v10 = vld [vmem:[#allocation8 + $0x68] sm:$0xff]  ;;  %v2589_v26 = vld [vmem:[#allocation8 + $0xe0] sm:$0xff] }
 0x16e   :  { %1172 = vmatpush.bf16.msrb.mxu3 %v2276_v49  ;;  %v2581_v49 = vld [vmem:[#allocation8 + $0xa0] sm:$0xff] }
 0x16f   :  { %v877_v36 = vadd.f32 %v876_v28, %v808_v62  ;;  %v2591_v62 = vld [vmem:[#allocation8 + $0xf0] sm:$0xff]  ;;  %v2590_v28 = vld [vmem:[#allocation8 + $0xe8] sm:$0xff] }
 0x170   :  { %1496 = vmatpush.bf16.msrb.mxu0 %v2591_v62  ;;  %v2608_v62 = vld [vmem:[#allocation11 + $0x1] ss:$0 sm:$0xff] }
 0x171   :  { %v914_v32 = vadd.f32 %v913_v25, %v877_v36  ;;  %1456 = vmatpush.bf16.msra.mxu1 %v2568_v57  ;;  %1471 = vmatpush.bf16.msra.mxu2 %v2574_v10  ;;  %v2573_v36 = vld [vmem:[#allocation8 + $0x60] sm:$0xff] }
 0x172   :  { %1482 = vmatpush.bf16.msra.mxu3 %v2584_v4 }
 0x173   :  { %v917_v9 = vsub.f32 %v914_v32, %v916_v45  ;;  %v2588_v45 = vld [vmem:[#allocation8 + $0xd8] sm:$0xff] }
 0x174   :  { %1497 = vmatpush.bf16.msrb.mxu0 %v2590_v28  ;;  %v2572_v32 = vld [vmem:[#allocation8 + $0x58] sm:$0xff] }
 0x175   :  { %v918_v60 = vmax.f32 %v917_v9, 0.0  ;;  %1457 = vmatpush.bf16.msra.mxu1 %v2567_v33  ;;  %1472 = vmatpush.bf16.msra.mxu2 %v2573_v36  ;;  %v2580_v9 = vld [vmem:[#allocation8 + $0x98] sm:$0xff]  ;;  %v919_v33 = vsub.f32 %v3219_v31, %v3300_v2  ;;  %v2571_v31 = vld [vmem:[#allocation8 + $0x50] sm:$0xff]  ;;  %v2570_v36 = vld [vmem:[#allocation8 + $0x48] sm:$0xff] }
 0x176   :  { %1483 = vmatpush.bf16.msra.mxu3 %v2583_v41  ;;  %v2579_v2 = vld [vmem:[#allocation8 + $0x90] sm:$0xff] }
 0x177   :  { %v920_v59 = vadd.f32 1e-05, %v918_v60  ;;  %v2563_v60 = vld [vmem:[#allocation8 + $0x10] sm:$0xff] }
 0x178   :  { %1498 = vmatpush.bf16.msrb.mxu0 %v2589_v26  ;;  %v2561_v26 = vld [vmem:[#allocation8] sm:$0xff] }
 0x179   :  { %2613 = vrsqrt.f32 %v920_v59  ;;  %1458 = vmatpush.bf16.msra.mxu1 %v2566_v55  ;;  %1473 = vmatpush.bf16.msra.mxu2 %v2572_v32  ;;  %vm927_vm1 = vweird.f32 %v920_v59  ;;  %v2609_v55 = vld [vmem:[#allocation11 + $0x2] ss:$0 sm:$0xff]  ;;  %v3626_v32 = vld [vmem:[#allocation35_spill] sm:$0xff] }
 0x17a   :  { %1484 = vmatpush.bf16.msra.mxu3 %v2582_v54 }
 0x17c   :  { %1499 = vmatpush.bf16.msrb.mxu0 %v2588_v45  ;;  %v969_v45 = vld [vmem:[#allocation10] sm:$0xf] }
 0x17d   :  { %1459 = vmatpush.bf16.msra.mxu1 %v2565_v27  ;;  %v2586_v27 = vld [vmem:[#allocation8 + $0xc8] sm:$0xff]  ;;  %1474 = vmatpush.bf16.msra.mxu2 %v2571_v31 }
 0x17e   :  { %1485 = vmatpush.bf16.msra.mxu3 %v2581_v49  ;;  %v2578_v49 = vld [vmem:[#allocation8 + $0x88] sm:$0xff] }
 0x17f   :  { %v2614_v18 = vpop.eup %2613 }
 0x180   :  { %v922_v23 = vmul.f32 %v2614_v18, %v920_v59  ;;  %vm928_vm0 = vweird.f32 %v2614_v18  ;;  %1500 = vmatpush.bf16.msrb.mxu0 %v2587_v63  ;;  %v2562_v59 = vld [vmem:[#allocation8 + $0x8] sm:$0xff] }
 0x181   :  { %1460 = vmatpush.bf16.msra.mxu1 %v2564_v35  ;;  %vm929_vm2 = vmor %vm927_vm1, %vm928_vm0  ;;  %1475 = vmatpush.bf16.msra.mxu2 %v2570_v36  ;;  %v3625_v35 = vld [vmem:[#allocation32_spill] sm:$0xff]  ;;  %v3628_v63 = vld [vmem:[#allocation43_spill] sm:$0xff] }
 0x182   :  { %v923_v25 = vmul.f32 %v2614_v18, %v922_v23  ;;  %1486 = vmatpush.bf16.msra.mxu3 %v2580_v9  ;;  %v2569_v23 = vld [vmem:[#allocation8 + $0x40] sm:$0xff]  ;;  %v971_v9 = vperm.slane %v969_v45, 0 }
 0x184   :  { %v924_v57 = vmul.f32 0.5, %v923_v25  ;;  %1501 = vmatpush.bf16.msrb.mxu0 %v2586_v27  ;;  %v2577_v25 = vld [vmem:[#allocation8 + $0x80] sm:$0xff] }
 0x185   :  { %1461 = vmatpush.bf16.msra.mxu1 %v2563_v60  ;;  %1476 = vmatpush.bf16.msra.mxu2 %v2569_v23 }
 0x186   :  { %v925_v48 = vsub.f32 1.5, %v924_v57  ;;  %1487 = vmatpush.bf16.msra.mxu3 %v2579_v2  ;;  %v974_v57 = vperm.slane %v969_v45, 3  ;;  %v3630_v2 = vld [vmem:[#allocation47_spill] sm:$0xff] }
 0x188   :  { %v926_v4 = vmul.f32 %v2614_v18, %v925_v48  ;;  %v3627_v48 = vld [vmem:[#allocation40_spill] sm:$0xff] }
 0x189   :  { %1462 = vmatpush.bf16.msra.mxu1 %v2562_v59 }
 0x18a   :  { %v930_v24 = vsel %vm929_vm2, %v2614_v18, %v926_v4  ;;  %v2585_v18 = vld [vmem:[#allocation8 + $0xc0] sm:$0xff]  ;;  %1488 = vmatpush.bf16.msra.mxu3 %v2578_v49 }
 0x18b   :  { %v931_v41 = vmul.f32 %v930_v24, %v919_v33  ;;  %1502 = vmatpush.bf16.msrb.mxu0 %v2585_v18  ;;  %v3629_v24 = vld [vmem:[#allocation45_spill] sm:$0xff] }
 0x18d   :  { %v933_v28 = vmul.f32 %v2608_v62, %v931_v41  ;;  %1463 = vmatpush.bf16.msra.mxu1 %v2561_v26  ;;  %v3631_v26 = vld [vmem:[#allocation37_spill] sm:$0xff] }
 0x18e   :  { %1489 = vmatpush.bf16.msra.mxu3 %v2577_v25  ;;  %v3632_v25 = vld [vmem:[#allocation48_spill] sm:$0xff] }
 0x18f   :  { %v3306_v10 = vadd.f32 %v2609_v55, %v933_v28  ;;  %v972_v55 = vperm.slane %v969_v45, 1 }
 0x191   :  { %v936_v54 = vpack.c.bf16 %v3306_v10, %v3306_v10 }
 0x193   :  { %1147 = vmatmul.bf16.vlgmr.msrb.gmra.mxu1 %v936_v54  ;;  %1160 = vmatmul.bf16.vlgmr.msrb.gmra.mxu2 %v936_v54 }
 0x194   :  { %1173 = vmatmul.bf16.vlgmr.msrb.gmra.mxu3 %v936_v54  ;;  %1186 = vmatmul.bf16.vlgmr.msra.gmra.mxu0 %v936_v54  ;;  %v973_v54 = vperm.slane %v969_v45, 2 }
 0x195   :  { %1706 = vmatpush.msra.mxu0 %v2894_v5  ;;  %1510 = vmatpush.msrb.mxu1 %v2894_v5 }
 0x196   :  { %1555 = vmatpush.msrb.mxu2 %v2960_v37  ;;  %1653 = vmatpush.msrb.mxu3 %v2907_v15 }
 0x197   :  { %1708 = vmatpush.msra.mxu0 %v2896_v6  ;;  %1512 = vmatpush.msrb.mxu1 %v2896_v6 }
 0x198   :  { %1561 = vmatpush.msrb.mxu2 %v2962_v38  ;;  %1656 = vmatpush.msrb.mxu3 %v2910_v16 }
 0x199   :  { %1710 = vmatpush.msra.mxu0 %v2898_v7  ;;  %1514 = vmatpush.msrb.mxu1 %v2898_v7 }
 0x19a   :  { %1567 = vmatpush.msrb.mxu2 %v2974_v44  ;;  %1659 = vmatpush.msrb.mxu3 %v2913_v17 }
 0x19b   :  { %1712 = vmatpush.msra.mxu0 %v2900_v12  ;;  %1516 = vmatpush.msrb.mxu1 %v2900_v12 }
 0x19c   :  { %1573 = vmatpush.msrb.mxu2 %v2991_v51  ;;  %1662 = vmatpush.msrb.mxu3 %v2917_v19 }
 0x19d   :  { %1714 = vmatpush.msra.mxu0 %v2902_v13  ;;  %1518 = vmatpush.msrb.mxu1 %v2902_v13 }
 0x19e   :  { %1579 = vmatpush.msrb.mxu2 %v3006_v58  ;;  %1665 = vmatpush.msrb.mxu3 %v2920_v20 }
 0x19f   :  { %1716 = vmatpush.msra.mxu0 %v2904_v14  ;;  %1520 = vmatpush.msrb.mxu1 %v2904_v14 }
 0x1a0   :  { %1585 = vmatpush.msrb.mxu2 %v3023_v1  ;;  %1668 = vmatpush.msrb.mxu3 %v2923_v21 }
 0x1a1   :  { %1718 = vmatpush.msra.mxu0 %v2925_v22  ;;  %1522 = vmatpush.msrb.mxu1 %v2925_v22 }
 0x1a2   :  { %1591 = vmatpush.msrb.mxu2 %v3625_v35  ;;  %1671 = vmatpush.msrb.mxu3 %v2945_v29 }
 0x1a3   :  { %1720 = vmatpush.msra.mxu0 %v2954_v34  ;;  %1524 = vmatpush.msrb.mxu1 %v2954_v34 }
 0x1a4   :  { %1597 = vmatpush.msrb.mxu2 %v3626_v32  ;;  %1674 = vmatpush.msrb.mxu3 %v2968_v40 }
 0x1a5   :  { %1722 = vmatpush.msra.mxu0 %v2979_v46  ;;  %1526 = vmatpush.msrb.mxu1 %v2979_v46 }
 0x1a6   :  { %1603 = vmatpush.msrb.mxu2 %v3068_v52  ;;  %1677 = vmatpush.msrb.mxu3 %v2996_v53 }
 0x1a7   :  { %1724 = vmatpush.msra.mxu0 %v2981_v47  ;;  %1528 = vmatpush.msrb.mxu1 %v2981_v47 }
 0x1a8   :  { %1609 = vmatpush.msrb.mxu2 %v3627_v48  ;;  %1680 = vmatpush.msrb.mxu3 %v3622_v30 }
 0x1a9   :  { %1726 = vmatpush.msra.mxu0 %v2988_v50  ;;  %1530 = vmatpush.msrb.mxu1 %v2988_v50 }
 0x1aa   :  { %1615 = vmatpush.msrb.mxu2 %v3628_v63  ;;  %1683 = vmatpush.msrb.mxu3 %v3014_v61 }
 0x1ab   :  { %1728 = vmatpush.msra.mxu0 %v3003_v56  ;;  %1532 = vmatpush.msrb.mxu1 %v3003_v56 }
 0x1ac   :  { %1621 = vmatpush.msrb.mxu2 %v3629_v24  ;;  %1686 = vmatpush.msrb.mxu3 %v3623_v11 }
 0x1ad   :  { %1730 = vmatpush.msra.mxu0 %v3020_v0  ;;  %1534 = vmatpush.msrb.mxu1 %v3020_v0 }
 0x1ae   :  { %1627 = vmatpush.msrb.mxu2 %v3117_v3  ;;  %1689 = vmatpush.msrb.mxu3 %v3624_v43 }
 0x1af   :  { %1732 = vmatpush.msra.mxu0 %v3033_v8  ;;  %1536 = vmatpush.msrb.mxu1 %v3033_v8 }
 0x1b0   :  { %1633 = vmatpush.msrb.mxu2 %v3630_v2  ;;  %1692 = vmatpush.msrb.mxu3 %v3631_v26 }
 0x1b1   :  { %1734 = vmatpush.msra.mxu0 %v3059_v39  ;;  %1538 = vmatpush.msrb.mxu1 %v3059_v39 }
 0x1b2   :  { %1639 = vmatpush.msrb.mxu2 %v3632_v25 }
 0x1b3   :  { %1736 = vmatpush.msra.mxu0 %v3063_v42  ;;  %1540 = vmatpush.msrb.mxu1 %v3063_v42 }
 0x210   :  { %v1148_v60 = vpop.f32.mrf.mxu1 }
 0x211   :  { %v1149_v4 = vadd.f32 %v1148_v60, %v971_v9  ;;  %v1187_v33 = vpop.f32.mrf.mxu0 }
 0x212   :  { %v1188_v62 = vadd.f32 %v1187_v33, %v974_v57  ;;  %v3633_v57 = vld [vmem:[#allocation39_spill] sm:$0xff]  ;;  %v3635_v33 = vld [vmem:[#allocation20_spill] sm:$0xff] }
 0x213   :  { %v1191_v41 = vmax.f32 %v1149_v4, 0.0  ;;  %1695 = vmatpush.msrb.mxu3 %v3633_v57  ;;  %v3634_v4 = vld [vmem:[#allocation49_spill] sm:$0xff] }
 0x214   :  { %v1194_v28 = vmax.f32 %v1188_v62, 0.0  ;;  %1645 = vmatpush.msrb.mxu2 %v3634_v4 }
 0x215   :  { %v1195_v59 = vpack.c.bf16 %v1191_v41, %v1191_v41  ;;  %v3636_v41 = vld [vmem:[#allocation42_spill] sm:$0xff] }
 0x216   :  { %v1198_v27 = vpack.c.bf16 %v1194_v28, %v1194_v28  ;;  %v1161_v31 = vpop.f32.mrf.mxu2  ;;  %1698 = vmatpush.msrb.mxu3 %v3636_v41  ;;  %v3637_v28 = vld [vmem:[#allocation21_spill] sm:$0xff] }
 0x217   :  { %v1162_v18 = vadd.f32 %v1161_v31, %v972_v55  ;;  %v1174_v36 = vpop.f32.mrf.mxu3  ;;  %1464 = vmatmul.bf16.vlgmr.msra.gmra.mxu1 %v1195_v59  ;;  %v3638_v59 = vld [vmem:[#allocation22_spill] sm:$0xff] }
 0x218   :  { %v1175_v49 = vadd.f32 %v1174_v36, %v973_v54  ;;  %1503 = vmatmul.bf16.vlgmr.msrb.gmra.mxu0 %v1198_v27  ;;  %v1150_v23 = vpop.f32.mrf.mxu1  ;;  %1747 = vmatpush.msra.mxu1 %v3635_v33  ;;  %v3651_v27 = vld [vmem:[#allocation46_spill] sm:$0xff] }
 0x219   :  { %v1192_v45 = vmax.f32 %v1162_v18, 0.0  ;;  %v1189_v9 = vpop.f32.mrf.mxu0  ;;  %1897 = vmatpush.msrb.mxu0 %v2960_v37  ;;  %v2610_v18 = vld [vmem:[#allocation11 + $0x3] ss:$0 sm:$0xff] }
 0x21a   :  { %v1193_v60 = vmax.f32 %v1175_v49, 0.0  ;;  %1751 = vmatpush.msra.mxu1 %v3637_v28 }
 0x21b   :  { %v1196_v62 = vpack.c.bf16 %v1192_v45, %v1192_v45  ;;  %1903 = vmatpush.msrb.mxu0 %v2962_v38  ;;  %v3639_v38 = vld [vmem:[#allocation23_spill] sm:$0xff] }
 0x21c   :  { %v1197_v55 = vpack.c.bf16 %v1193_v60, %v1193_v60  ;;  %1755 = vmatpush.msra.mxu1 %v3638_v59 }
 0x21d   :  { %1477 = vmatmul.bf16.vlgmr.msra.gmra.mxu2 %v1196_v62  ;;  %1909 = vmatpush.msrb.mxu0 %v2974_v44  ;;  %v3640_v44 = vld [vmem:[#allocation24_spill] sm:$0xff] }
 0x21e   :  { %1490 = vmatmul.bf16.vlgmr.msra.gmra.mxu3 %v1197_v55  ;;  %v1163_v54 = vpop.f32.mrf.mxu2  ;;  %1814 = vmatpush.msra.mxu2 %v2894_v5 }
 0x21f   :  { %v1176_v37 = vpop.f32.mrf.mxu3  ;;  %1852 = vmatpush.msra.mxu3 %v2894_v5  ;;  %1915 = vmatpush.msrb.mxu0 %v2991_v51  ;;  %v3641_v51 = vld [vmem:[#allocation25_spill] sm:$0xff] }
 0x220   :  { %1816 = vmatpush.msra.mxu2 %v2896_v6  ;;  %1759 = vmatpush.msra.mxu1 %v3639_v38 }
 0x221   :  { %1854 = vmatpush.msra.mxu3 %v2896_v6  ;;  %1921 = vmatpush.msrb.mxu0 %v3006_v58  ;;  %v3642_v58 = vld [vmem:[#allocation26_spill] sm:$0xff] }
 0x222   :  { %1818 = vmatpush.msra.mxu2 %v2898_v7  ;;  %1763 = vmatpush.msra.mxu1 %v3640_v44 }
 0x223   :  { %1856 = vmatpush.msra.mxu3 %v2898_v7  ;;  %1927 = vmatpush.msrb.mxu0 %v3023_v1  ;;  %v3643_v1 = vld [vmem:[#allocation27_spill] sm:$0xff] }
 0x224   :  { %1820 = vmatpush.msra.mxu2 %v2900_v12  ;;  %1767 = vmatpush.msra.mxu1 %v3641_v51 }
 0x225   :  { %1858 = vmatpush.msra.mxu3 %v2900_v12  ;;  %1933 = vmatpush.msrb.mxu0 %v3625_v35  ;;  %v3644_v35 = vld [vmem:[#allocation29_spill] sm:$0xff] }
 0x226   :  { %1822 = vmatpush.msra.mxu2 %v2902_v13  ;;  %1771 = vmatpush.msra.mxu1 %v3642_v58 }
 0x227   :  { %1860 = vmatpush.msra.mxu3 %v2902_v13  ;;  %1939 = vmatpush.msrb.mxu0 %v3626_v32  ;;  %v3645_v32 = vld [vmem:[#allocation30_spill] sm:$0xff] }
 0x228   :  { %1824 = vmatpush.msra.mxu2 %v2904_v14  ;;  %1775 = vmatpush.msra.mxu1 %v3643_v1 }
 0x229   :  { %1862 = vmatpush.msra.mxu3 %v2904_v14  ;;  %1945 = vmatpush.msrb.mxu0 %v3068_v52  ;;  %v3646_v52 = vld [vmem:[#allocation33_spill] sm:$0xff] }
 0x22a   :  { %1826 = vmatpush.msra.mxu2 %v2925_v22  ;;  %1779 = vmatpush.msra.mxu1 %v3644_v35 }
 0x22b   :  { %1864 = vmatpush.msra.mxu3 %v2925_v22  ;;  %1951 = vmatpush.msrb.mxu0 %v3627_v48  ;;  %v3647_v48 = vld [vmem:[#allocation36_spill] sm:$0xff] }
 0x22c   :  { %1828 = vmatpush.msra.mxu2 %v2954_v34  ;;  %1783 = vmatpush.msra.mxu1 %v3645_v32 }
 0x22d   :  { %1866 = vmatpush.msra.mxu3 %v2954_v34  ;;  %1957 = vmatpush.msrb.mxu0 %v3628_v63  ;;  %v3648_v63 = vld [vmem:[#allocation38_spill] sm:$0xff] }
 0x22e   :  { %1830 = vmatpush.msra.mxu2 %v2979_v46  ;;  %1787 = vmatpush.msra.mxu1 %v3646_v52 }
 0x22f   :  { %1868 = vmatpush.msra.mxu3 %v2979_v46  ;;  %1963 = vmatpush.msrb.mxu0 %v3629_v24  ;;  %v3649_v24 = vld [vmem:[#allocation41_spill] sm:$0xff] }
 0x230   :  { %1832 = vmatpush.msra.mxu2 %v2981_v47  ;;  %1791 = vmatpush.msra.mxu1 %v3647_v48 }
 0x231   :  { %1870 = vmatpush.msra.mxu3 %v2981_v47  ;;  %1969 = vmatpush.msrb.mxu0 %v3117_v3  ;;  %v3650_v3 = vld [vmem:[#allocation44_spill] sm:$0xff] }
 0x232   :  { %1834 = vmatpush.msra.mxu2 %v2988_v50  ;;  %1795 = vmatpush.msra.mxu1 %v3648_v63 }
 0x233   :  { %1872 = vmatpush.msra.mxu3 %v2988_v50  ;;  %1975 = vmatpush.msrb.mxu0 %v3630_v2 }
 0x234   :  { %1836 = vmatpush.msra.mxu2 %v3003_v56  ;;  %1799 = vmatpush.msra.mxu1 %v3649_v24 }
 0x235   :  { %1874 = vmatpush.msra.mxu3 %v3003_v56  ;;  %1981 = vmatpush.msrb.mxu0 %v3632_v25 }
 0x236   :  { %1838 = vmatpush.msra.mxu2 %v3020_v0  ;;  %1803 = vmatpush.msra.mxu1 %v3650_v3 }
 0x237   :  { %1876 = vmatpush.msra.mxu3 %v3020_v0  ;;  %1987 = vmatpush.msrb.mxu0 %v3634_v4 }
 0x238   :  { %1840 = vmatpush.msra.mxu2 %v3033_v8  ;;  %1807 = vmatpush.msra.mxu1 %v3651_v27 }
 0x239   :  { %1878 = vmatpush.msra.mxu3 %v3033_v8 }
 0x23a   :  { %1842 = vmatpush.msra.mxu2 %v3059_v39 }
 0x23b   :  { %1880 = vmatpush.msra.mxu3 %v3059_v39 }
 0x23c   :  { %1844 = vmatpush.msra.mxu2 %v3063_v42 }
 0x23d   :  { %1882 = vmatpush.msra.mxu3 %v3063_v42 }
 0x294   :  { %v1465_v31 = vpop.f32.mrf.mxu1 }
 0x295   :  { %v1504_v2 = vpop.f32.mrf.mxu0  ;;  %v1466_v23 = vadd.f32 %v2610_v18, %v1465_v31 }
 0x29c   :  { %v1467_v36 = vpop.f32.mrf.mxu1 }
 0x29d   :  { %v1506_v49 = vpop.f32.mrf.mxu0 }
 0x2a0   :  { %v1478_v25 = vpop.f32.mrf.mxu2 }
 0x2a1   :  { %v1479_v45 = vadd.f32 %v1478_v25, %v1466_v23  ;;  %v1491_v9 = vpop.f32.mrf.mxu3 }
 0x2a3   :  { %v1492_v60 = vadd.f32 %v1491_v9, %v1479_v45 }
 0x2a5   :  { %v1505_v4 = vadd.f32 %v1504_v2, %v1492_v60 }
 0x2a7   :  { %v3439_v62 = vadd.f32 %v1505_v4, %v3306_v10 }
 0x2a8   :  { %v1480_v55 = vpop.f32.mrf.mxu2 }
 0x2a9   :  { %v1850_v54 = vmul.f32 %v3439_v62, %v3439_v62  ;;  %v1493_v37 = vpop.f32.mrf.mxu3  ;;  %v1541_v41 = vand.u32 4294901760, %v3439_v62 }
 0x2ab   :  { %v3444_v57 = vand.u32 4294901760, %v1850_v54  ;;  %1647 = vmatmul.f32.vlgmr.msrb.gmra.mxu2 %v1541_v41  ;;  %v1542_v31 = vsub.f32 %v3439_v62, %v1541_v41 }
 0x2ac   :  { %2048 = vmatpush.msrb.mxu2 %v2894_v5 }
 0x2ad   :  { %1701 = vmatmul.f32.vlgmr.msrb.gmra.mxu3 %v1542_v31  ;;  %v1543_v18 = vand.u32 4294901760, %v1542_v31  ;;  %v3449_v2 = vsub.f32 %v1850_v54, %v3444_v57 }
 0x2ae   :  { %2050 = vmatpush.msrb.mxu2 %v2896_v6  ;;  %2089 = vmatpush.msrb.mxu3 %v3635_v33 }
 0x2af   :  { %1740 = vmatmul.f32.vlgmr.msra.gmra.mxu0 %v1543_v18  ;;  %v1544_v10 = vsub.f32 %v1542_v31, %v1543_v18  ;;  %v1885_v36 = vand.u32 4294901760, %v3449_v2 }
 0x2b0   :  { %2052 = vmatpush.msrb.mxu2 %v2898_v7  ;;  %2093 = vmatpush.msrb.mxu3 %v3637_v28 }
 0x2b1   :  { %2156 = vmatpush.msra.mxu0 %v2894_v5  ;;  %v1545_v49 = vand.u32 4294901760, %v1544_v10  ;;  %v1886_v23 = vsub.f32 %v3449_v2, %v1885_v36  ;;  %v3652_v5 = vld [vmem:[#allocation39_spill] sm:$0xff] }
 0x2b2   :  { %2054 = vmatpush.msrb.mxu2 %v2900_v12  ;;  %2097 = vmatpush.msrb.mxu3 %v3638_v59 }
 0x2b3   :  { %2158 = vmatpush.msra.mxu0 %v2896_v6  ;;  %1546 = vmatmul.f32.vlgmr.msrb.gmra.mxu1 %v1545_v49  ;;  %v1887_v33 = vand.u32 4294901760, %v1886_v23  ;;  %v3653_v6 = vld [vmem:[#allocation42_spill] sm:$0xff] }
 0x2b4   :  { %1846 = vmatmul.f32.vlgmr.msra.gmra.mxu2 %v1541_v41  ;;  %1995 = vmatpush.msrb.mxu1 %v2907_v15 }
 0x2b5   :  { %2056 = vmatpush.msrb.mxu2 %v2902_v13  ;;  %2101 = vmatpush.msrb.mxu3 %v3639_v38 }
 0x2b6   :  { %2160 = vmatpush.msra.mxu0 %v2898_v7  ;;  %1888 = vmatmul.f32.vlgmr.msra.gmra.mxu3 %v1887_v33 }
 0x2b7   :  { %1998 = vmatpush.msrb.mxu1 %v2910_v16  ;;  %2058 = vmatpush.msrb.mxu2 %v2904_v14 }
 0x2b8   :  { %2105 = vmatpush.msrb.mxu3 %v3640_v44  ;;  %2162 = vmatpush.msra.mxu0 %v2900_v12  ;;  %v2611_v44 = vld [vmem:[#allocation11 + $0x4] ss:$0 sm:$0xff] }
 0x2b9   :  { %1989 = vmatmul.f32.vlgmr.msrb.gmra.mxu0 %v3444_v57  ;;  %2001 = vmatpush.msrb.mxu1 %v2913_v17 }
 0x2ba   :  { %2060 = vmatpush.msrb.mxu2 %v2925_v22  ;;  %2109 = vmatpush.msrb.mxu3 %v3641_v51 }
 0x2bb   :  { %2164 = vmatpush.msra.mxu0 %v2902_v13  ;;  %2004 = vmatpush.msrb.mxu1 %v2917_v19 }
 0x2bc   :  { %2062 = vmatpush.msrb.mxu2 %v2954_v34  ;;  %2113 = vmatpush.msrb.mxu3 %v3642_v58 }
 0x2bd   :  { %2166 = vmatpush.msra.mxu0 %v2904_v14  ;;  %1809 = vmatmul.f32.vlgmr.msra.gmra.mxu1 %v1541_v41 }
 0x2be   :  { %2007 = vmatpush.msrb.mxu1 %v2920_v20  ;;  %2064 = vmatpush.msrb.mxu2 %v2979_v46 }
 0x2bf   :  { %2117 = vmatpush.msrb.mxu3 %v3643_v1  ;;  %2168 = vmatpush.msra.mxu0 %v2925_v22  ;;  %v2612_v1 = vld [vmem:[#allocation11 + $0x5] ss:$0 sm:$0xff] }
 0x2c0   :  { %2010 = vmatpush.msrb.mxu1 %v2923_v21  ;;  %2066 = vmatpush.msrb.mxu2 %v2981_v47 }
 0x2c1   :  { %2121 = vmatpush.msrb.mxu3 %v3644_v35  ;;  %2170 = vmatpush.msra.mxu0 %v2954_v34 }
 0x2c2   :  { %2013 = vmatpush.msrb.mxu1 %v2945_v29  ;;  %2068 = vmatpush.msrb.mxu2 %v2988_v50 }
 0x2c3   :  { %2125 = vmatpush.msrb.mxu3 %v3645_v32  ;;  %2172 = vmatpush.msra.mxu0 %v2979_v46 }
 0x2c4   :  { %2016 = vmatpush.msrb.mxu1 %v2968_v40  ;;  %2070 = vmatpush.msrb.mxu2 %v3003_v56 }
 0x2c5   :  { %2129 = vmatpush.msrb.mxu3 %v3646_v52  ;;  %2174 = vmatpush.msra.mxu0 %v2981_v47 }
 0x2c6   :  { %2019 = vmatpush.msrb.mxu1 %v2996_v53  ;;  %2072 = vmatpush.msrb.mxu2 %v3020_v0 }
 0x2c7   :  { %2133 = vmatpush.msrb.mxu3 %v3647_v48  ;;  %2176 = vmatpush.msra.mxu0 %v2988_v50 }
 0x2c8   :  { %2022 = vmatpush.msrb.mxu1 %v3622_v30  ;;  %2074 = vmatpush.msrb.mxu2 %v3033_v8 }
 0x2c9   :  { %2137 = vmatpush.msrb.mxu3 %v3648_v63  ;;  %2178 = vmatpush.msra.mxu0 %v3003_v56 }
 0x2ca   :  { %2025 = vmatpush.msrb.mxu1 %v3014_v61  ;;  %2076 = vmatpush.msrb.mxu2 %v3059_v39 }
 0x2cb   :  { %2141 = vmatpush.msrb.mxu3 %v3649_v24  ;;  %2180 = vmatpush.msra.mxu0 %v3020_v0 }
 0x2cc   :  { %2028 = vmatpush.msrb.mxu1 %v3623_v11  ;;  %2078 = vmatpush.msrb.mxu2 %v3063_v42 }
 0x2cd   :  { %2145 = vmatpush.msrb.mxu3 %v3650_v3  ;;  %2182 = vmatpush.msra.mxu0 %v3033_v8 }
 0x2ce   :  { %2082 = vmatmul.f32.vlgmr.msrb.gmra.mxu2 %v1885_v36  ;;  %2031 = vmatpush.msrb.mxu1 %v3624_v43 }
 0x2cf   :  { %2149 = vmatpush.msrb.mxu3 %v3651_v27  ;;  %2184 = vmatpush.msra.mxu0 %v3059_v39 }
 0x2d0   :  { %2151 = vmatmul.f32.vlgmr.msrb.gmra.mxu3 %v3444_v57  ;;  %2034 = vmatpush.msrb.mxu1 %v3631_v26 }
 0x2d1   :  { %2186 = vmatpush.msra.mxu0 %v3063_v42 }
 0x2d2   :  { %2188 = vmatmul.f32.vlgmr.msra.gmra.mxu0 %v3444_v57  ;;  %2037 = vmatpush.msrb.mxu1 %v3652_v5 }
 0x2d4   :  { %2040 = vmatpush.msrb.mxu1 %v3653_v6 }
 0x2d5   :  { %2043 = vmatmul.f32.vlgmr.msrb.gmra.mxu1 %v3449_v2 }
 0x32c   :  { %v1741_v14 = vpop.f32.mrf.mxu0 }
 0x32e   :  { %v1648_v12 = vpop.f32.mrf.mxu2 }
 0x330   :  { %v1547_v7 = vpop.f32.mrf.mxu1  ;;  %v1702_v13 = vpop.f32.mrf.mxu3 }
 0x331   :  { %v1649_v15 = vadd.f32 %v1648_v12, %v1547_v7 }
 0x333   :  { %v1703_v17 = vadd.f32 %v1702_v13, %v1649_v15 }
 0x335   :  { %v1742_v21 = vadd.f32 %v1741_v14, %v1703_v17 }
 0x336   :  { %v1990_v22 = vpop.f32.mrf.mxu0 }
 0x337   :  { %v1847_v19 = vpop.f32.mrf.mxu2 }
 0x339   :  { %v1889_v20 = vpop.f32.mrf.mxu3 }
 0x33a   :  { %v1810_v16 = vpop.f32.mrf.mxu1  ;;  %v1991_v34 = vadd.f32 %v1990_v22, %v1889_v20 }
 0x33b   :  { %v1811_v29 = vadd.f32 %v1810_v16, %v1742_v21 }
 0x33d   :  { %v1848_v50 = vadd.f32 %v1847_v19, %v1811_v29 }
 0x33f   :  { %v2192_v8 = vmul.f32 %v1848_v50, %v1848_v50  ;;  %v2195_v38 = vsub.f32 %v3439_v62, %v1848_v50 }
 0x34f   :  { %v2189_v0 = vpop.f32.mrf.mxu0 }
 0x351   :  { %v2083_v47 = vpop.f32.mrf.mxu2 }
 0x352   :  { %v2044_v40 = vpop.f32.mrf.mxu1 }
 0x353   :  { %v2045_v46 = vadd.f32 %v2044_v40, %v1991_v34  ;;  %v2152_v56 = vpop.f32.mrf.mxu3 }
 0x355   :  { %v2084_v53 = vadd.f32 %v2083_v47, %v2045_v46 }
 0x357   :  { %v2153_v61 = vadd.f32 %v2152_v56, %v2084_v53 }
 0x359   :  { %v2190_v39 = vadd.f32 %v2189_v0, %v2153_v61 }
 0x35b   :  { %v2193_v42 = vsub.f32 %v2190_v39, %v2192_v8 }
 0x35d   :  { %v2194_v30 = vmax.f32 %v2193_v42, 0.0 }
 0x35f   :  { %v2196_v11 = vadd.f32 1e-05, %v2194_v30 }
 0x361   :  { %2615 = vrsqrt.f32 %v2196_v11  ;;  %vm2203_vm4 = vweird.f32 %v2196_v11 }
 0x367   :  { %v2616_v43 = vpop.eup %2615 }
 0x368   :  { %v2198_v26 = vmul.f32 %v2616_v43, %v2196_v11  ;;  %vm2204_vm3 = vweird.f32 %v2616_v43 }
 0x369   :  { %vm2205_vm5 = vmor %vm2203_vm4, %vm2204_vm3 }
 0x36a   :  { %v2199_v57 = vmul.f32 %v2616_v43, %v2198_v26 }
 0x36c   :  { %v2200_v41 = vmul.f32 0.5, %v2199_v57 }
 0x36e   :  { %v2201_v28 = vsub.f32 1.5, %v2200_v41 }
 0x370   :  { %v2202_v59 = vmul.f32 %v2616_v43, %v2201_v28 }
 0x372   :  { %v2206_v51 = vsel %vm2205_vm5, %v2616_v43, %v2202_v59 }
 0x373   :  { %v2207_v58 = vmul.f32 %v2206_v51, %v2195_v38 }
 0x375   :  { %v2209_v35 = vmul.f32 %v2611_v44, %v2207_v58 }
 0x377   :  { %v2211_v32 = vadd.f32 %v2612_v1, %v2209_v35 }
 0x379   :  { %2212 = vst [vmem:[#allocation14] sm:$0xff] %v2211_v32 }
 0x37a   :  { %2223 = dma.vmem_to_hbm [thread:$0]  %s2219_s6, 128, %s2221_s1, [#allocation4]  }
 0x37b   :  { %2817 = dma.done.wait [#allocation4], 128  }
 0x37c   :  { %2818 = vsyncadd [#allocation4], 4294967168 }
 0x37d   :  { %2228 = vsyncpa [#allocation3], 1 }
 0x37e   :  { %2229 = vsyncpa [#allocation6], 1 }
 0x37f   :  { %2230 = vsyncpa [#allocation9], 1 }
 0x380   :  { %2231 = vsyncpa [#allocation12], 1 }
 0x381   :  { %2232 = vsyncpa [#allocation4], 1 }

</bundles_post_ra>
